<compile_context>
chip_gen: v5e
topology: v5e:2x2
jax: 0.10.0
libtpu: 0.0.40
codegen_flags: <defaults>
</compile_context>

<pallas_src>
import functools

import jax
import jax.numpy as jnp
from jax.experimental import pallas as pl
from jax.experimental.pallas import tpu as pltpu


# --------------------------------------------------------------------------- #
# Kernel
# --------------------------------------------------------------------------- #
def _mlp_kernel(x_ref, w_in_ref, b_in_ref, w_h_ref, b_h_ref, w_out_ref,
                b_out_ref, o_ref, *, hidden_layer, v2, mxu_out):
    f32 = jnp.float32
    cdt = w_h_ref.dtype                       # matmul (MXU) dtype
    edt = b_in_ref.dtype                      # epilogue (bias/ReLU) dtype
    prec = jax.lax.Precision.HIGHEST if cdt == jnp.float32 else None

    # ---- input layer -------------------------------------------------------
    if v2:
        # Reference builds tmp with only columns 0 and 1 nonzero, so only the
        # first two input columns of w_in contribute: two VPU outer products.
        # TODO(synk): like the PyTorch reference, no guard against x[:, 1] == 0.
        x0 = x_ref[0:1, :] / x_ref[1:2, :]                       # (1, Bt)
        x1 = x_ref[2:3, :]                                       # (1, Bt)
        a = (w_in_ref[:, 0:1].astype(f32) * x0
             + w_in_ref[:, 1:2].astype(f32) * x1)                # (H, Bt)
    else:
        p_dim = x_ref.shape[0]
        if p_dim <= 8:
            # K<=8 fills <7% of the MXU contraction depth and its push/drain
            # latency would sit exposed at the head of the serial layer chain;
            # a handful of VPU FMAs is cheaper on every generation.
            a = w_in_ref[:, 0:1].astype(f32) * x_ref[0:1, :]
            for p in range(1, p_dim):
                a = a + w_in_ref[:, p:p + 1].astype(f32) * x_ref[p:p + 1, :]
        else:
            a = jnp.dot(w_in_ref[...], x_ref[...].astype(w_in_ref.dtype),
                        preferred_element_type=f32, precision=prec)
    # bias + ReLU in the epilogue dtype (bf16 on v6e/v7x fast path, f32 else)
    a = jnp.maximum(a.astype(edt) + b_in_ref[...], 0)            # (H, Bt)

    # ---- hidden layers (static unroll; MXU in compute dtype, f32 accum) ----
    for l in range(hidden_layer):
        z = jnp.dot(w_h_ref[l], a.astype(cdt),
                    preferred_element_type=f32, precision=prec)
        a = jnp.maximum(z.astype(edt) + b_h_ref[l], 0)

    # ---- output layer -------------------------------------------------------
    if mxu_out:
        # v6e/v7x: MXU has slack at H~128, VALU/XLU is the tight slot -> do
        # the M=1 matmul on the MXU.  w_out_ref is (1, H) in compute dtype.
        y = jnp.dot(w_out_ref[...], a.astype(cdt),
                    preferred_element_type=f32, precision=prec)  # (1, Bt)
    else:
        # v5e: MXU is the busier unit; VPU multiply + sublane reduce instead.
        # w_out_ref is a (H, 1) f32 column.
        y = jnp.sum(a.astype(f32) * w_out_ref[...], axis=0, keepdims=True)
    o_ref[...] = (y + b_out_ref[0]).astype(o_ref.dtype)          # lane-dense row


# --------------------------------------------------------------------------- #
# Host-side helpers
# --------------------------------------------------------------------------- #
def _round_up(x, m):
    return ((x + m - 1) // m) * m


def _chip_traits():
    """Best-effort (num_tensorcores, prefer_bf16/mxu_epilogue, vmem_ceiling)."""
    kind = ""
    try:
        kind = jax.devices()[0].device_kind.lower()
    except Exception:
        pass
    num_cores = 2 if ("v7" in kind or "7x" in kind) else 1
    # bf16 VALU epilogue + MXU output layer pay off on v6e/v7x; keep the f32
    # epilogue + VPU reduce on v5e (no bf16 VALU, MXU already busy) / unknown.
    modern = ("v6" in kind) or ("v7" in kind) or ("7x" in kind)
    try:
        vmem_cap = int(pltpu.get_tpu_info().vmem_capacity_bytes)
    except Exception:
        vmem_cap = 64 * 2**20          # conservative: v7x per-TC VMEM
    vmem_ceiling = max((vmem_cap * 3) // 4, 32 * 2**20)
    return num_cores, modern, vmem_ceiling


def _default_block_b(B, num_cores=1):
    """Lane-aligned batch tile: multiple of 128, capped at 2048 lanes.

    Single-TC chips (v5e/v6e): one big tile (up to 2048) amortizes the
    ~0.35 us per-grid-step overhead.  2-TC chips (v7x): target >=2 tiles per
    core and keep the tile count a multiple of the core count so the single
    'parallel' grid axis splits evenly.
    """
    cap = 2048
    if num_cores <= 1:
        return max(128, min(_round_up(max(B, 1), 128), cap))
    n_target = 2 * num_cores
    bb = max(128, min(_round_up(pl.cdiv(B, n_target), 128), cap))
    n_tiles = pl.cdiv(B, bb)
    if n_tiles > 1 and n_tiles % num_cores:
        # prefer a slightly smaller tile over an uneven split across cores
        n_tiles = _round_up(n_tiles, num_cores)
        bb = max(128, _round_up(pl.cdiv(B, n_tiles), 128))
    return bb


# --------------------------------------------------------------------------- #
# Forward wrapper
# --------------------------------------------------------------------------- #
def par_merge_time_forward(x, params, *, v2=False, block_b=None,
                           compute_dtype=jnp.bfloat16):
    """Forward pass matching Par_MergeTime.forward. Returns shape (B,)."""
    x = jnp.asarray(x, jnp.float32)
    B, P = x.shape
    H, Pin = params["w_in"].shape
    L = int(params["w_h"].shape[0])
    assert L >= 1
    if v2:
        assert P >= 3 and Pin == P - 1
    else:
        assert Pin == P

    num_cores, modern, vmem_ceiling = _chip_traits()

    if block_b is None:
        block_b = _default_block_b(B, num_cores)
    assert block_b % 128 == 0, "batch tile must be lane-aligned (multiple of 128)"

    n_tiles = pl.cdiv(B, block_b)
    b_pad = n_tiles * block_b

    cdt = jnp.dtype(compute_dtype)
    use_bf16_epi = modern and cdt == jnp.bfloat16
    edt = cdt if use_bf16_epi else jnp.float32   # epilogue dtype
    mxu_out = modern                             # MXU output layer on v6e/v7x

    # Input stays f32 when it feeds VPU FMAs (tiny P) or the v2 division; only
    # the large-P MXU input path benefits from a narrower HBM->VMEM stream.
    x_in_dtype = cdt if (not v2 and Pin > 8) else jnp.float32

    # Feature-major: batch on the lane axis. Pad with ones (not zeros) so the
    # v2 in-kernel division never sees 0/0 in the dead padded lanes (those
    # lanes are sliced away below anyway).  Cast before the transpose to keep
    # the wrapper pass as cheap as possible.
    x_t = jnp.pad(x.astype(x_in_dtype), ((0, b_pad - B), (0, 0)),
                  constant_values=1.0).T                          # (P, b_pad)

    w_in = params["w_in"].astype(jnp.float32 if (v2 or Pin <= 8) else cdt)
    b_in = params["b_in"].astype(edt)                             # (H, 1)
    w_h = params["w_h"].astype(cdt)                               # (L, H, H)
    b_h = params["b_h"].astype(edt)                               # (L, H, 1)
    if mxu_out:
        w_out = params["w_out"].reshape(1, H).astype(cdt)         # (1, H) row
    else:
        w_out = params["w_out"].reshape(H, 1).astype(jnp.float32)  # (H, 1) col
    b_out = params["b_out"].reshape(1).astype(jnp.float32)        # scalar -> SMEM

    kernel = functools.partial(_mlp_kernel, hidden_layer=L, v2=v2,
                               mxu_out=mxu_out)

    def _weight_spec(shape):
        # Grid-invariant operand: single-buffer it (default double buffering
        # would just burn VMEM since the index map never changes).
        zero = (0,) * len(shape)
        return pl.BlockSpec(shape, lambda i, _z=zero: _z,
                            pipeline_mode=pl.Buffered(1))

    # Rough VMEM budget: single-buffered weights + double-buffered x/out tiles
    # + live (H, block_b) activation, x2 slack; capped at ~3/4 of physical
    # VMEM for this generation (48 MiB on v7x, ~96 MiB on v5e/v6e).
    est = (w_in.size * w_in.dtype.itemsize + w_h.size * w_h.dtype.itemsize
           + b_in.size * b_in.dtype.itemsize + b_h.size * b_h.dtype.itemsize
           + w_out.size * w_out.dtype.itemsize + 64
           + 2 * max(P, 8) * block_b * x_t.dtype.itemsize   # x tile, dbl-buffered
           + 2 * 8 * block_b * 4                            # out tile, dbl-buffered
           + 2 * H * block_b * 4)                           # activation + headroom
    vmem_limit = int(min(max(32 * 2**20, 2 * est), vmem_ceiling))

    out = pl.pallas_call(
        kernel,
        out_shape=jax.ShapeDtypeStruct((1, b_pad), jnp.float32),
        grid=(n_tiles,),
        in_specs=[
            pl.BlockSpec((P, block_b), lambda i: (0, i)),        # x, feature-major
            _weight_spec((H, Pin)),                              # w_in
            _weight_spec((H, 1)),                                # b_in
            _weight_spec((L, H, H)),                             # stacked hidden W
            _weight_spec((L, H, 1)),                             # stacked hidden b
            _weight_spec(w_out.shape),                           # w_out row/column
            pl.BlockSpec(memory_space=pltpu.MemorySpace.SMEM),   # b_out scalar
        ],
        out_specs=pl.BlockSpec((1, block_b), lambda i: (0, i)),  # lane-dense rows
        compiler_params=pltpu.CompilerParams(
            dimension_semantics=("parallel",),
            vmem_limit_bytes=vmem_limit),
    )(x_t, w_in, b_in, w_h, b_h, w_out, b_out)

    return out[0, :B]   # squeeze(1) + drop batch padding


# --------------------------------------------------------------------------- #
# Parameters / reference
# --------------------------------------------------------------------------- #
def init_params(key, par_dim, hidden_dim, hidden_layer=4, v2=False):
    """Synthetic params in PyTorch nn.Linear layout: weights are (out, in)."""
    if v2:
        par_dim = int(par_dim - 1)
    ks = jax.random.split(key, 6)
    s = 0.1
    return {
        "w_in": s * jax.random.normal(ks[0], (hidden_dim, par_dim), jnp.float32),
        "b_in": s * jax.random.normal(ks[1], (hidden_dim, 1), jnp.float32),
        "w_h": s * jax.random.normal(ks[2], (hidden_layer, hidden_dim, hidden_dim),
                                     jnp.float32),
        "b_h": s * jax.random.normal(ks[3], (hidden_layer, hidden_dim, 1), jnp.float32),
        "w_out": s * jax.random.normal(ks[4], (1, hidden_dim), jnp.float32),
        "b_out": s * jax.random.normal(ks[5], (1,), jnp.float32),
    }


def _reference_forward(x, params, v2=False):
    """Pure-JAX reference mirroring the PyTorch module."""
    if v2:
        tmp = jnp.zeros((x.shape[0], x.shape[1] - 1), dtype=x.dtype)
        tmp = tmp.at[:, 0].set(x[:, 0] / x[:, 1])
        tmp = tmp.at[:, 1].set(x[:, 2])
        x = tmp
    out = jnp.maximum(x @ params["w_in"].T + params["b_in"][:, 0], 0.0)
    for l in range(params["w_h"].shape[0]):
        out = jnp.maximum(out @ params["w_h"][l].T + params["b_h"][l, :, 0], 0.0)
    out = out @ params["w_out"].T + params["b_out"]
    return out[:, 0]


# --------------------------------------------------------------------------- #
# Self-test
# --------------------------------------------------------------------------- #
if __name__ == "__main__":
    key = jax.random.PRNGKey(0)
    k_param, k_x = jax.random.split(key)

    batch, par_dim, hidden_dim, hidden_layer = 16, 8, 128, 4

    for v2 in (False, True):
        params = init_params(k_param, par_dim, hidden_dim,
                             hidden_layer=hidden_layer, v2=v2)
        x = jax.random.normal(k_x, (batch, par_dim), jnp.float32)
        if v2:
            # keep the divisor x[:, 1] away from zero for a stable test
            x = x.at[:, 1].set(jnp.abs(x[:, 1]) + 1.0)

        y_ref = _reference_forward(x, params, v2=v2)

        # Exact-semantics path (f32 matmuls, precision=HIGHEST): tight tolerance.
        y32 = jax.block_until_ready(
            par_merge_time_forward(x, params, v2=v2, compute_dtype=jnp.float32))
        assert y32.shape == (batch,)
        assert jnp.allclose(y32, y_ref, atol=1e-3, rtol=1e-3), \
            f"f32 kernel mismatch (v2={v2})"

        # Default fast path (bf16 matmuls, f32 accumulate): loose tolerance.
        ybf = jax.block_until_ready(par_merge_time_forward(x, params, v2=v2))
        assert ybf.shape == (batch,)
        assert jnp.allclose(ybf, y_ref, atol=5e-2, rtol=5e-2), \
            f"bf16 kernel mismatch (v2={v2})"

    # Multi-tile grid + batch-padding path (explicit small tile).
    big_b = 300
    params = init_params(k_param, par_dim, hidden_dim, hidden_layer=hidden_layer)
    xb = jax.random.normal(k_x, (big_b, par_dim), jnp.float32)
    yb_ref = _reference_forward(xb, params)
    yb = jax.block_until_ready(
        par_merge_time_forward(xb, params, block_b=128,
                               compute_dtype=jnp.float32))
    assert yb.shape == (big_b,)
    assert jnp.allclose(yb, yb_ref, atol=1e-3, rtol=1e-3), "multi-tile mismatch"

    print("KERNEL_OK")
</pallas_src>

<mosaic_0001>
module attributes {stable_mosaic.version = 11 : i64} {
  func.func @_mlp_kernel(%arg0: i32, %arg1: memref<8x128xf32, #tpu.memory_space<vmem>>, %arg2: memref<128x8xf32, #tpu.memory_space<vmem>>, %arg3: memref<128x1xf32, #tpu.memory_space<vmem>>, %arg4: memref<4x128x128xf32, #tpu.memory_space<vmem>>, %arg5: memref<4x128x1xf32, #tpu.memory_space<vmem>>, %arg6: memref<128x1xf32, #tpu.memory_space<vmem>>, %arg7: memref<1xf32, #tpu.memory_space<smem>>, %arg8: memref<1x128xf32, #tpu.memory_space<vmem>>) attributes {dimension_semantics = [#tpu.dimension_semantics<parallel>], iteration_bounds = array<i64: 1>, scalar_prefetch = 0 : i64, scratch_operands = 0 : i64, tpu.core_type = #tpu.core_type<tc>, window_params = [{transform_indices = @transform_0, window_bounds = array<i64: 8, 128>}, {pipeline_mode = #tpu.pipeline_mode<synchronous>, transform_indices = @transform_1, window_bounds = array<i64: 128, 8>}, {pipeline_mode = #tpu.pipeline_mode<synchronous>, transform_indices = @transform_2, window_bounds = array<i64: 128, 1>}, {pipeline_mode = #tpu.pipeline_mode<synchronous>, transform_indices = @transform_3, window_bounds = array<i64: 4, 128, 128>}, {pipeline_mode = #tpu.pipeline_mode<synchronous>, transform_indices = @transform_4, window_bounds = array<i64: 4, 128, 1>}, {pipeline_mode = #tpu.pipeline_mode<synchronous>, transform_indices = @transform_5, window_bounds = array<i64: 128, 1>}, {transform_indices = @transform_6, window_bounds = array<i64: 1>}, {transform_indices = @transform_7, window_bounds = array<i64: 1, 128>}]} {
    %c0 = arith.constant 0 : index
    %c0_0 = arith.constant 0 : index
    %0 = vector.load %arg2[%c0, %c0_0] : memref<128x8xf32, #tpu.memory_space<vmem>>, vector<128x1xf32>
    %c0_1 = arith.constant 0 : index
    %c0_2 = arith.constant 0 : index
    %1 = vector.load %arg1[%c0_1, %c0_2] : memref<8x128xf32, #tpu.memory_space<vmem>>, vector<1x128xf32>
    %2 = vector.broadcast %0 : vector<128x1xf32> to vector<128x128xf32>
    %3 = vector.broadcast %1 : vector<1x128xf32> to vector<128x128xf32>
    %4 = arith.mulf %2, %3 : vector<128x128xf32>
    %c0_3 = arith.constant 0 : index
    %c1 = arith.constant 1 : index
    %5 = vector.load %arg2[%c0_3, %c1] : memref<128x8xf32, #tpu.memory_space<vmem>>, vector<128x1xf32>
    %c1_4 = arith.constant 1 : index
    %c0_5 = arith.constant 0 : index
    %6 = vector.load %arg1[%c1_4, %c0_5] : memref<8x128xf32, #tpu.memory_space<vmem>>, vector<1x128xf32>
    %7 = vector.broadcast %5 : vector<128x1xf32> to vector<128x128xf32>
    %8 = vector.broadcast %6 : vector<1x128xf32> to vector<128x128xf32>
    %9 = arith.mulf %7, %8 : vector<128x128xf32>
    %10 = arith.addf %4, %9 : vector<128x128xf32>
    %c0_6 = arith.constant 0 : index
    %c2 = arith.constant 2 : index
    %11 = vector.load %arg2[%c0_6, %c2] : memref<128x8xf32, #tpu.memory_space<vmem>>, vector<128x1xf32>
    %c2_7 = arith.constant 2 : index
    %c0_8 = arith.constant 0 : index
    %12 = vector.load %arg1[%c2_7, %c0_8] : memref<8x128xf32, #tpu.memory_space<vmem>>, vector<1x128xf32>
    %13 = vector.broadcast %11 : vector<128x1xf32> to vector<128x128xf32>
    %14 = vector.broadcast %12 : vector<1x128xf32> to vector<128x128xf32>
    %15 = arith.mulf %13, %14 : vector<128x128xf32>
    %16 = arith.addf %10, %15 : vector<128x128xf32>
    %c0_9 = arith.constant 0 : index
    %c3 = arith.constant 3 : index
    %17 = vector.load %arg2[%c0_9, %c3] : memref<128x8xf32, #tpu.memory_space<vmem>>, vector<128x1xf32>
    %c3_10 = arith.constant 3 : index
    %c0_11 = arith.constant 0 : index
    %18 = vector.load %arg1[%c3_10, %c0_11] : memref<8x128xf32, #tpu.memory_space<vmem>>, vector<1x128xf32>
    %19 = vector.broadcast %17 : vector<128x1xf32> to vector<128x128xf32>
    %20 = vector.broadcast %18 : vector<1x128xf32> to vector<128x128xf32>
    %21 = arith.mulf %19, %20 : vector<128x128xf32>
    %22 = arith.addf %16, %21 : vector<128x128xf32>
    %c0_12 = arith.constant 0 : index
    %c4 = arith.constant 4 : index
    %23 = vector.load %arg2[%c0_12, %c4] : memref<128x8xf32, #tpu.memory_space<vmem>>, vector<128x1xf32>
    %c4_13 = arith.constant 4 : index
    %c0_14 = arith.constant 0 : index
    %24 = vector.load %arg1[%c4_13, %c0_14] : memref<8x128xf32, #tpu.memory_space<vmem>>, vector<1x128xf32>
    %25 = vector.broadcast %23 : vector<128x1xf32> to vector<128x128xf32>
    %26 = vector.broadcast %24 : vector<1x128xf32> to vector<128x128xf32>
    %27 = arith.mulf %25, %26 : vector<128x128xf32>
    %28 = arith.addf %22, %27 : vector<128x128xf32>
    %c0_15 = arith.constant 0 : index
    %c5 = arith.constant 5 : index
    %29 = vector.load %arg2[%c0_15, %c5] : memref<128x8xf32, #tpu.memory_space<vmem>>, vector<128x1xf32>
    %c5_16 = arith.constant 5 : index
    %c0_17 = arith.constant 0 : index
    %30 = vector.load %arg1[%c5_16, %c0_17] : memref<8x128xf32, #tpu.memory_space<vmem>>, vector<1x128xf32>
    %31 = vector.broadcast %29 : vector<128x1xf32> to vector<128x128xf32>
    %32 = vector.broadcast %30 : vector<1x128xf32> to vector<128x128xf32>
    %33 = arith.mulf %31, %32 : vector<128x128xf32>
    %34 = arith.addf %28, %33 : vector<128x128xf32>
    %c0_18 = arith.constant 0 : index
    %c6 = arith.constant 6 : index
    %35 = vector.load %arg2[%c0_18, %c6] : memref<128x8xf32, #tpu.memory_space<vmem>>, vector<128x1xf32>
    %c6_19 = arith.constant 6 : index
    %c0_20 = arith.constant 0 : index
    %36 = vector.load %arg1[%c6_19, %c0_20] : memref<8x128xf32, #tpu.memory_space<vmem>>, vector<1x128xf32>
    %37 = vector.broadcast %35 : vector<128x1xf32> to vector<128x128xf32>
    %38 = vector.broadcast %36 : vector<1x128xf32> to vector<128x128xf32>
    %39 = arith.mulf %37, %38 : vector<128x128xf32>
    %40 = arith.addf %34, %39 : vector<128x128xf32>
    %c0_21 = arith.constant 0 : index
    %c7 = arith.constant 7 : index
    %41 = vector.load %arg2[%c0_21, %c7] : memref<128x8xf32, #tpu.memory_space<vmem>>, vector<128x1xf32>
    %c7_22 = arith.constant 7 : index
    %c0_23 = arith.constant 0 : index
    %42 = vector.load %arg1[%c7_22, %c0_23] : memref<8x128xf32, #tpu.memory_space<vmem>>, vector<1x128xf32>
    %43 = vector.broadcast %41 : vector<128x1xf32> to vector<128x128xf32>
    %44 = vector.broadcast %42 : vector<1x128xf32> to vector<128x128xf32>
    %45 = arith.mulf %43, %44 : vector<128x128xf32>
    %46 = arith.addf %40, %45 : vector<128x128xf32>
    %c0_24 = arith.constant 0 : index
    %c0_25 = arith.constant 0 : index
    %47 = vector.load %arg3[%c0_24, %c0_25] : memref<128x1xf32, #tpu.memory_space<vmem>>, vector<128x1xf32>
    %48 = vector.broadcast %47 : vector<128x1xf32> to vector<128x128xf32>
    %49 = arith.addf %46, %48 : vector<128x128xf32>
    %cst = arith.constant 0.000000e+00 : f32
    %50 = vector.broadcast %cst : f32 to vector<128x128xf32>
    %51 = arith.maximumf %49, %50 : vector<128x128xf32>
    %c0_26 = arith.constant 0 : index
    %c0_27 = arith.constant 0 : index
    %c0_28 = arith.constant 0 : index
    %52 = vector.load %arg4[%c0_26, %c0_27, %c0_28] : memref<4x128x128xf32, #tpu.memory_space<vmem>>, vector<1x128x128xf32>
    %53 = vector.shape_cast %52 : vector<1x128x128xf32> to vector<128x128xf32>
    %cst_29 = arith.constant dense<0.000000e+00> : vector<128x128xf32>
    %54 = tpu.matmul %53, %51, %cst_29 {dimension_numbers = #tpu.dot_dimension_numbers<[1], [0], [0], [1], [0, 0, 1, 1], [], []>, precision = #tpu.contract_precision<fp32>} : vector<128x128xf32>, vector<128x128xf32>, vector<128x128xf32> -> vector<128x128xf32>
    %c0_30 = arith.constant 0 : index
    %c0_31 = arith.constant 0 : index
    %c0_32 = arith.constant 0 : index
    %55 = vector.load %arg5[%c0_30, %c0_31, %c0_32] : memref<4x128x1xf32, #tpu.memory_space<vmem>>, vector<1x128x1xf32>
    %56 = vector.shape_cast %55 : vector<1x128x1xf32> to vector<128x1xf32>
    %57 = vector.broadcast %56 : vector<128x1xf32> to vector<128x128xf32>
    %58 = arith.addf %54, %57 : vector<128x128xf32>
    %cst_33 = arith.constant 0.000000e+00 : f32
    %59 = vector.broadcast %cst_33 : f32 to vector<128x128xf32>
    %60 = arith.maximumf %58, %59 : vector<128x128xf32>
    %c1_34 = arith.constant 1 : index
    %c0_35 = arith.constant 0 : index
    %c0_36 = arith.constant 0 : index
    %61 = vector.load %arg4[%c1_34, %c0_35, %c0_36] : memref<4x128x128xf32, #tpu.memory_space<vmem>>, vector<1x128x128xf32>
    %62 = vector.shape_cast %61 : vector<1x128x128xf32> to vector<128x128xf32>
    %cst_37 = arith.constant dense<0.000000e+00> : vector<128x128xf32>
    %63 = tpu.matmul %62, %60, %cst_37 {dimension_numbers = #tpu.dot_dimension_numbers<[1], [0], [0], [1], [0, 0, 1, 1], [], []>, precision = #tpu.contract_precision<fp32>} : vector<128x128xf32>, vector<128x128xf32>, vector<128x128xf32> -> vector<128x128xf32>
    %c1_38 = arith.constant 1 : index
    %c0_39 = arith.constant 0 : index
    %c0_40 = arith.constant 0 : index
    %64 = vector.load %arg5[%c1_38, %c0_39, %c0_40] : memref<4x128x1xf32, #tpu.memory_space<vmem>>, vector<1x128x1xf32>
    %65 = vector.shape_cast %64 : vector<1x128x1xf32> to vector<128x1xf32>
    %66 = vector.broadcast %65 : vector<128x1xf32> to vector<128x128xf32>
    %67 = arith.addf %63, %66 : vector<128x128xf32>
    %cst_41 = arith.constant 0.000000e+00 : f32
    %68 = vector.broadcast %cst_41 : f32 to vector<128x128xf32>
    %69 = arith.maximumf %67, %68 : vector<128x128xf32>
    %c2_42 = arith.constant 2 : index
    %c0_43 = arith.constant 0 : index
    %c0_44 = arith.constant 0 : index
    %70 = vector.load %arg4[%c2_42, %c0_43, %c0_44] : memref<4x128x128xf32, #tpu.memory_space<vmem>>, vector<1x128x128xf32>
    %71 = vector.shape_cast %70 : vector<1x128x128xf32> to vector<128x128xf32>
    %cst_45 = arith.constant dense<0.000000e+00> : vector<128x128xf32>
    %72 = tpu.matmul %71, %69, %cst_45 {dimension_numbers = #tpu.dot_dimension_numbers<[1], [0], [0], [1], [0, 0, 1, 1], [], []>, precision = #tpu.contract_precision<fp32>} : vector<128x128xf32>, vector<128x128xf32>, vector<128x128xf32> -> vector<128x128xf32>
    %c2_46 = arith.constant 2 : index
    %c0_47 = arith.constant 0 : index
    %c0_48 = arith.constant 0 : index
    %73 = vector.load %arg5[%c2_46, %c0_47, %c0_48] : memref<4x128x1xf32, #tpu.memory_space<vmem>>, vector<1x128x1xf32>
    %74 = vector.shape_cast %73 : vector<1x128x1xf32> to vector<128x1xf32>
    %75 = vector.broadcast %74 : vector<128x1xf32> to vector<128x128xf32>
    %76 = arith.addf %72, %75 : vector<128x128xf32>
    %cst_49 = arith.constant 0.000000e+00 : f32
    %77 = vector.broadcast %cst_49 : f32 to vector<128x128xf32>
    %78 = arith.maximumf %76, %77 : vector<128x128xf32>
    %c3_50 = arith.constant 3 : index
    %c0_51 = arith.constant 0 : index
    %c0_52 = arith.constant 0 : index
    %79 = vector.load %arg4[%c3_50, %c0_51, %c0_52] : memref<4x128x128xf32, #tpu.memory_space<vmem>>, vector<1x128x128xf32>
    %80 = vector.shape_cast %79 : vector<1x128x128xf32> to vector<128x128xf32>
    %cst_53 = arith.constant dense<0.000000e+00> : vector<128x128xf32>
    %81 = tpu.matmul %80, %78, %cst_53 {dimension_numbers = #tpu.dot_dimension_numbers<[1], [0], [0], [1], [0, 0, 1, 1], [], []>, precision = #tpu.contract_precision<fp32>} : vector<128x128xf32>, vector<128x128xf32>, vector<128x128xf32> -> vector<128x128xf32>
    %c3_54 = arith.constant 3 : index
    %c0_55 = arith.constant 0 : index
    %c0_56 = arith.constant 0 : index
    %82 = vector.load %arg5[%c3_54, %c0_55, %c0_56] : memref<4x128x1xf32, #tpu.memory_space<vmem>>, vector<1x128x1xf32>
    %83 = vector.shape_cast %82 : vector<1x128x1xf32> to vector<128x1xf32>
    %84 = vector.broadcast %83 : vector<128x1xf32> to vector<128x128xf32>
    %85 = arith.addf %81, %84 : vector<128x128xf32>
    %cst_57 = arith.constant 0.000000e+00 : f32
    %86 = vector.broadcast %cst_57 : f32 to vector<128x128xf32>
    %87 = arith.maximumf %85, %86 : vector<128x128xf32>
    %c0_58 = arith.constant 0 : index
    %c0_59 = arith.constant 0 : index
    %88 = vector.load %arg6[%c0_58, %c0_59] : memref<128x1xf32, #tpu.memory_space<vmem>>, vector<128x1xf32>
    %89 = vector.broadcast %88 : vector<128x1xf32> to vector<128x128xf32>
    %90 = arith.mulf %87, %89 : vector<128x128xf32>
    %cst_60 = arith.constant dense<0.000000e+00> : vector<128xf32>
    %91 = vector.multi_reduction <add>, %90, %cst_60 [0] : vector<128x128xf32> to vector<128xf32>
    %92 = vector.shape_cast %91 : vector<128xf32> to vector<1x128xf32>
    %c0_61 = arith.constant 0 : index
    %93 = memref.load %arg7[%c0_61] : memref<1xf32, #tpu.memory_space<smem>>
    %94 = vector.broadcast %93 : f32 to vector<1x128xf32>
    %95 = arith.addf %92, %94 : vector<1x128xf32>
    %c0_62 = arith.constant 0 : index
    %c0_63 = arith.constant 0 : index
    %96 = vector.load %arg8[%c0_62, %c0_63] : memref<1x128xf32, #tpu.memory_space<vmem>>, vector<1x128xf32>
    tpu.vector_store %arg8[%c0_62, %c0_63], %95 {strides = array<i32>} : memref<1x128xf32, #tpu.memory_space<vmem>>, vector<1x128xf32>,
    return
  }
  func.func @transform_0(%arg0: i32) -> (i32, i32) {
    %c0_i32 = arith.constant 0 : i32
    %c0_i32_0 = arith.constant 0 : i32
    return %c0_i32, %arg0 : i32, i32
  }
  func.func @transform_1(%arg0: i32) -> (i32, i32) {
    %c0_i32 = arith.constant 0 : i32
    %c0_i32_0 = arith.constant 0 : i32
    %c0_i32_1 = arith.constant 0 : i32
    return %c0_i32, %c0_i32_0 : i32, i32
  }
  func.func @transform_2(%arg0: i32) -> (i32, i32) {
    %c0_i32 = arith.constant 0 : i32
    %c0_i32_0 = arith.constant 0 : i32
    %c0_i32_1 = arith.constant 0 : i32
    return %c0_i32, %c0_i32_0 : i32, i32
  }
  func.func @transform_3(%arg0: i32) -> (i32, i32, i32) {
    %c0_i32 = arith.constant 0 : i32
    %c0_i32_0 = arith.constant 0 : i32
    %c0_i32_1 = arith.constant 0 : i32
    %c0_i32_2 = arith.constant 0 : i32
    return %c0_i32, %c0_i32_0, %c0_i32_1 : i32, i32, i32
  }
  func.func @transform_4(%arg0: i32) -> (i32, i32, i32) {
    %c0_i32 = arith.constant 0 : i32
    %c0_i32_0 = arith.constant 0 : i32
    %c0_i32_1 = arith.constant 0 : i32
    %c0_i32_2 = arith.constant 0 : i32
    return %c0_i32, %c0_i32_0, %c0_i32_1 : i32, i32, i32
  }
  func.func @transform_5(%arg0: i32) -> (i32, i32) {
    %c0_i32 = arith.constant 0 : i32
    %c0_i32_0 = arith.constant 0 : i32
    %c0_i32_1 = arith.constant 0 : i32
    return %c0_i32, %c0_i32_0 : i32, i32
  }
  func.func @transform_6(%arg0: i32) -> i32 {
    %c0_i32 = arith.constant 0 : i32
    %c0_i32_0 = arith.constant 0 : i32
    return %c0_i32 : i32
  }
  func.func @transform_7(%arg0: i32) -> (i32, i32) {
    %c0_i32 = arith.constant 0 : i32
    %c0_i32_0 = arith.constant 0 : i32
    return %c0_i32, %arg0 : i32, i32
  }
}

</mosaic_0001>

<bundles_post_ra>
// kernel: tpu_custom_call.1
= control target key start
LH: loop header
LB: loop body
LE: loop exit
PB: predicated region body
PF: predicated region fallthrough
CT: control target
= control target key end

     0   :  { %v8733_v2 = vmov 2   ;;  %v8723_v3 = vmov 1   ;;  %v8737_v4 = vmov 0   ;;  %s8715_s0 = inlined_call_operand.vmem [shape: f32[8,128], index: 0, kind: input, shape index: {}]   ;;  %s8716_s1 = inlined_call_operand.vmem [shape: f32[128,8], index: 1, kind: input, shape index: {}]   ;;  %s8717_s2 = inlined_call_operand.vmem [shape: f32[128,1], index: 2, kind: input, shape index: {}]   ;;  %s8718_s3 = inlined_call_operand.vmem [shape: f32[4,128,128], index: 3, kind: input, shape index: {}]   ;;  %s8719_s4 = inlined_call_operand.vmem [shape: f32[4,128,1], index: 4, kind: input, shape index: {}]   ;;  %s8720_s5 = inlined_call_operand.vmem [shape: f32[128,1], index: 5, kind: input, shape index: {}]   ;;  %s8721_s6 = inlined_call_operand.<no memory space> [shape: f32[1], index: 6, kind: input, shape index: {}]   ;;  %s8722_s7 = inlined_call_operand.hbm [shape: f32[1,128], index: 7, kind: output, shape index: {}]  }
   0x1   :  { %v5173_v0 = vld [vmem:[%s8716_s1 + $0x78] sm:$0xff]  ;;  %v5178_v1 = vld [vmem:[%s8716_s1 + $0x70] sm:$0xff]  ;;  %4959 = vset.pattern.permute.xlu2 %v8733_v2  ;;  %4956 = vset.pattern.permute.xlu0 %v8723_v3 }
   0x2   :  { %4957 = vset.pattern.permute.xlu1 %v8737_v4  ;;  %302 = vperm.xlu2 %4959, %v5173_v0  }
   0x3   :  { %204 = vperm.xlu0 %4956, %v5173_v0   ;;  %117 = vperm.xlu1 %4957, %v5178_v1  }
   0x4   :  { %13 = vsyncpa [#allocation4], 0  ;;  %v5189_v5 = vld [vmem:[%s8716_s1 + $0x50] sm:$0xff]  ;;  %v5194_v6 = vld [vmem:[%s8716_s1 + $0x68] sm:$0xff]  ;;  %v8731_v10 = vmov 3   ;;  %v8727_v11 = vmov 4  }
   0x5   :  { %v5204_v7 = vld [vmem:[%s8716_s1 + $0x40] sm:$0xff]  ;;  %v5235_v12 = vld [vmem:[%s8716_s1 + $0x58] sm:$0xff]  ;;  %v8725_v13 = vmov 5   ;;  %v5255_v14 = vld [vmem:[%s8716_s1 + $0x48] sm:$0xff]  ;;  %v8729_v17 = vmov 6   ;;  %v8735_v21 = vmov 7  }
   0x6   :  { %v5213_v8 = vld [vmem:[%s8716_s1 + $0x20] sm:$0xff]  ;;  %v5307_v24 = vld [vmem:[%s8716_s1 + $0x8] sm:$0xff]  ;;  %v5339_v32 = vld [vmem:[%s8716_s1 + $0x38] sm:$0xff]  ;;  %s4842_s13 = sshll.u32 %s8722_s7, 4  ;;  %s4843_s13 = int_to_ptr.hbm [resolvable:$true] %s4842_s13 }
   0x7   :  { %v5218_v9 = vld [vmem:[%s8716_s1 + $0x60] sm:$0xff]  ;;  %v5351_v35 = vld [vmem:[%s8716_s1 + $0x18] sm:$0xff]  ;;  %v5393_v46 = vld [vmem:[%s8716_s1 + $0x30] sm:$0xff] }
   0x8   :  { %v843_v53 = vld [vmem:[%s8717_s2 + $0x78] sm:$0xff]  ;;  %v842_v57 = vld [vmem:[%s8717_s2 + $0x70] sm:$0xff]  ;;  %v5434_v58 = vld [vmem:[%s8716_s1 + $0x28] sm:$0xff] }
   0x9   :  { %v838_v62 = vld [vmem:[%s8717_s2 + $0x50] sm:$0xff] }
   0xa   :  { %4960 = vset.pattern.permute.xlu2 %v8737_v4 }
   0xb   :  { %4958 = vset.pattern.permute.xlu1 %v8723_v3  ;;  %184 = vperm.xlu0 %4956, %v5189_v5  }
   0xc   :  { %200 = vperm.xlu1 %4958, %v5178_v1   ;;  %112 = vperm.xlu2 %4960, %v5194_v6  }
  0x13   :  { %176 = vperm.xlu0 %4956, %v5204_v7  }
  0x14   :  { %196 = vperm.xlu1 %4958, %v5194_v6   ;;  %4961 = vset.pattern.permute.xlu2 %v8733_v2 }
  0x15   :  { %298 = vperm.xlu2 %4961, %v5178_v1  }
  0x1b   :  { %160 = vperm.xlu0 %4956, %v5213_v8  }
  0x1c   :  { %4962 = vset.pattern.permute.xlu1 %v8737_v4 }
  0x1d   :  { %4963 = vset.pattern.permute.xlu2 %v8723_v3  ;;  %107 = vperm.xlu1 %4962, %v5218_v9  }
  0x1e   :  { %192 = vperm.xlu2 %4963, %v5218_v9  }
  0x23   :  { %5020 = vset.pattern.permute.xlu0 %v8733_v2 }
  0x24   :  { %258 = vperm.xlu0 %5020, %v5213_v8  }
  0x25   :  { %4964 = vset.pattern.permute.xlu1 %v8733_v2 }
  0x26   :  { %4965 = vset.pattern.permute.xlu2 %v8731_v10  ;;  %294 = vperm.xlu1 %4964, %v5194_v6  }
  0x27   :  { %396 = vperm.xlu2 %4965, %v5178_v1  }
  0x2c   :  { %5021 = vset.pattern.permute.xlu0 %v8727_v11 }
  0x2d   :  { %498 = vperm.xlu0 %5021, %v5173_v0  }
  0x2e   :  { %4966 = vset.pattern.permute.xlu1 %v8737_v4 }
  0x2f   :  { %4967 = vset.pattern.permute.xlu2 %v8723_v3  ;;  %102 = vperm.xlu1 %4966, %v5235_v12  }
  0x30   :  { %188 = vperm.xlu2 %4967, %v5235_v12  }
  0x35   :  { %494 = vperm.xlu0 %5021, %v5178_v1  }
  0x37   :  { %4968 = vset.pattern.permute.xlu1 %v8733_v2 }
  0x38   :  { %4969 = vset.pattern.permute.xlu2 %v8731_v10  ;;  %290 = vperm.xlu1 %4968, %v5218_v9  }
  0x39   :  { %392 = vperm.xlu2 %4969, %v5194_v6  }
  0x3d   :  { %486 = vperm.xlu0 %5021, %v5218_v9  }
  0x40   :  { %4970 = vset.pattern.permute.xlu1 %v8725_v13 }
  0x41   :  { %4971 = vset.pattern.permute.xlu2 %v8737_v4  ;;  %596 = vperm.xlu1 %4970, %v5173_v0  }
  0x42   :  { %97 = vperm.xlu2 %4971, %v5189_v5  }
  0x45   :  { %474 = vperm.xlu0 %5021, %v5255_v14  }
  0x49   :  { %4972 = vset.pattern.permute.xlu1 %v8733_v2 }
  0x4a   :  { %286 = vperm.xlu1 %4972, %v5235_v12   ;;  %4973 = vset.pattern.permute.xlu2 %v8731_v10 }
  0x4b   :  { %388 = vperm.xlu2 %4973, %v5218_v9  }
  0x4d   :  { %454 = vperm.xlu0 %5021, %v5213_v8  }
  0x52   :  { %4974 = vset.pattern.permute.xlu1 %v8727_v11 }
  0x53   :  { %490 = vperm.xlu1 %4974, %v5194_v6   ;;  %4975 = vset.pattern.permute.xlu2 %v8725_v13 }
  0x54   :  { %592 = vperm.xlu2 %4975, %v5178_v1  }
  0x55   :  { %5038 = vset.pattern.permute.xlu0 %v8725_v13 }
  0x56   :  { %572 = vperm.xlu0 %5038, %v5255_v14  }
  0x5b   :  { %4976 = vset.pattern.permute.xlu1 %v8737_v4 }
  0x5c   :  { %4977 = vset.pattern.permute.xlu2 %v8723_v3  ;;  %92 = vperm.xlu1 %4976, %v5255_v14   ;;  %v5272_v15 = vpop.permute.xlu2 %302 }
  0x5d   :  { %180 = vperm.xlu2 %4977, %v5255_v14  }
  0x5e   :  { %552 = vperm.xlu0 %5038, %v5213_v8  }
  0x64   :  { %4978 = vset.pattern.permute.xlu1 %v8733_v2 }
  0x65   :  { %4979 = vset.pattern.permute.xlu2 %v8731_v10  ;;  %282 = vperm.xlu1 %4978, %v5189_v5  }
  0x66   :  { %384 = vperm.xlu2 %4979, %v5235_v12   ;;  %5047 = vset.pattern.permute.xlu0 %v8731_v10  ;;  %v5281_v16 = vpop.permute.xlu2 %112 }
  0x67   :  { %400 = vperm.xlu0 %5047, %v5173_v0  }
  0x6d   :  { %4980 = vset.pattern.permute.xlu1 %v8725_v13 }
  0x6e   :  { %4981 = vset.pattern.permute.xlu2 %v8729_v17  ;;  %588 = vperm.xlu1 %4980, %v5194_v6  }
  0x6f   :  { %690 = vperm.xlu2 %4981, %v5178_v1   ;;  %376 = vperm.xlu0 %5047, %v5255_v14   ;;  %v5289_v18 = vpop.permute.xlu2 %298 }
  0x75   :  { %v5291_v19 = vpop.permute.xlu1 %117  ;;  %v5293_v20 = vpop.permute.xlu0 %204 }
  0x76   :  { %4982 = vset.pattern.permute.xlu1 %v8735_v21 }
  0x77   :  { %4983 = vset.pattern.permute.xlu2 %v8737_v4  ;;  %792 = vperm.xlu1 %4982, %v5173_v0  }
  0x78   :  { %356 = vperm.xlu0 %5047, %v5213_v8   ;;  %87 = vperm.xlu2 %4983, %v5204_v7   ;;  %v5300_v22 = vpop.permute.xlu2 %192 }
  0x7d   :  { %v5302_v23 = vpop.permute.xlu0 %184 }
  0x7e   :  { %8752 = vst [vmem:[#allocation6_spill] sm:$0xff] %v5302_v23  ;;  %v5309_v25 = vpop.permute.xlu1 %200 }
  0x7f   :  { %4984 = vset.pattern.permute.xlu1 %v8733_v2 }
  0x80   :  { %344 = vperm.xlu0 %5047, %v5307_v24   ;;  %278 = vperm.xlu1 %4984, %v5255_v14  }
  0x81   :  { %4985 = vset.pattern.permute.xlu2 %v8731_v10  ;;  %v5316_v26 = vpop.permute.xlu2 %396 }
  0x82   :  { %380 = vperm.xlu2 %4985, %v5189_v5  }
  0x85   :  { %v5318_v27 = vpop.permute.xlu0 %176 }
  0x86   :  { %8753 = vst [vmem:[#allocation7_spill] sm:$0xff] %v5318_v27  ;;  %v5320_v28 = vpop.permute.xlu1 %196 }
  0x88   :  { %5052 = vset.pattern.permute.xlu0 %v8735_v21  ;;  %4986 = vset.pattern.permute.xlu1 %v8727_v11 }
  0x89   :  { %768 = vperm.xlu0 %5052, %v5255_v14   ;;  %482 = vperm.xlu1 %4986, %v5235_v12  }
  0x8a   :  { %4987 = vset.pattern.permute.xlu2 %v8725_v13  ;;  %v5327_v29 = vpop.permute.xlu2 %188 }
  0x8b   :  { %8754 = vst [vmem:[#allocation8_spill] sm:$0xff] %v5327_v29  ;;  %584 = vperm.xlu2 %4987, %v5218_v9  }
  0x8d   :  { %v5330_v30 = vpop.permute.xlu0 %160 }
  0x8f   :  { %v5332_v31 = vpop.permute.xlu1 %107 }
  0x91   :  { %748 = vperm.xlu0 %5052, %v5213_v8   ;;  %4988 = vset.pattern.permute.xlu1 %v8735_v21 }
  0x92   :  { %788 = vperm.xlu1 %4988, %v5178_v1  }
  0x93   :  { %4989 = vset.pattern.permute.xlu2 %v8737_v4  ;;  %v5343_v33 = vpop.permute.xlu2 %392 }
  0x94   :  { %82 = vperm.xlu2 %4989, %v5339_v32  }
  0x96   :  { %v5346_v34 = vpop.permute.xlu0 %258 }
  0x98   :  { %v5353_v36 = vpop.permute.xlu1 %294 }
  0x99   :  { %744 = vperm.xlu0 %5052, %v5351_v35  }
  0x9a   :  { %4990 = vset.pattern.permute.xlu1 %v8723_v3 }
  0x9b   :  { %172 = vperm.xlu1 %4990, %v5339_v32  }
  0x9c   :  { %4991 = vset.pattern.permute.xlu2 %v8733_v2  ;;  %v5359_v37 = vpop.permute.xlu2 %97 }
  0x9d   :  { %8755 = vst [vmem:[#allocation9_spill] sm:$0xff] %v5359_v37  ;;  %274 = vperm.xlu2 %4991, %v5204_v7  }
  0x9f   :  { %v5362_v38 = vpop.permute.xlu0 %498 }
  0xa1   :  { %5065 = vset.pattern.permute.xlu0 %v8729_v17  ;;  %v5365_v39 = vpop.permute.xlu1 %102 }
  0xa2   :  { %8756 = vst [vmem:[#allocation10_spill] sm:$0xff] %v5365_v39  ;;  %694 = vperm.xlu0 %5065, %v5173_v0  }
  0xa3   :  { %4992 = vset.pattern.permute.xlu1 %v8727_v11 }
  0xa4   :  { %478 = vperm.xlu1 %4992, %v5189_v5  }
  0xa5   :  { %4993 = vset.pattern.permute.xlu2 %v8725_v13  ;;  %v5371_v40 = vpop.permute.xlu2 %388 }
  0xa6   :  { %580 = vperm.xlu2 %4993, %v5235_v12  }
  0xa7   :  { %v5374_v41 = vpop.permute.xlu0 %494 }
  0xaa   :  { %686 = vperm.xlu0 %5065, %v5194_v6   ;;  %v5377_v42 = vpop.permute.xlu1 %290 }
  0xac   :  { %4994 = vset.pattern.permute.xlu1 %v8729_v17 }
  0xad   :  { %682 = vperm.xlu1 %4994, %v5218_v9  }
  0xae   :  { %4995 = vset.pattern.permute.xlu2 %v8735_v21  ;;  %v5382_v43 = vpop.permute.xlu2 %592 }
  0xaf   :  { %784 = vperm.xlu2 %4995, %v5194_v6   ;;  %v5385_v44 = vpop.permute.xlu0 %486  ;;  %v5461_v6 = vld [vmem:[%s8716_s1] sm:$0xff] }
  0xb0   :  { %8762 = vst [vmem:[#allocation16_spill] sm:$0xff] %v5461_v6 }
  0xb2   :  { %670 = vperm.xlu0 %5065, %v5255_v14  }
  0xb3   :  { %v5388_v45 = vpop.permute.xlu1 %596 }
  0xb5   :  { %4996 = vset.pattern.permute.xlu1 %v8737_v4 }
  0xb6   :  { %77 = vperm.xlu1 %4996, %v5393_v46  }
  0xb7   :  { %4997 = vset.pattern.permute.xlu2 %v8723_v3  ;;  %v181_v47 = vpop.permute.xlu2 %180  ;;  %v5398_v48 = vpop.permute.xlu0 %474 }
  0xb8   :  { %168 = vperm.xlu2 %4997, %v5393_v46  }
  0xba   :  { %638 = vperm.xlu0 %5065, %v5307_v24  }
  0xbc   :  { %v5402_v49 = vpop.permute.xlu1 %286 }
  0xbd   :  { %8757 = vst [vmem:[#allocation11_spill] sm:$0xff] %v5402_v49 }
  0xbe   :  { %4998 = vset.pattern.permute.xlu1 %v8733_v2 }
  0xbf   :  { %270 = vperm.xlu1 %4998, %v5339_v32   ;;  %v5406_v50 = vpop.permute.xlu0 %454 }
  0xc0   :  { %4999 = vset.pattern.permute.xlu2 %v8731_v10  ;;  %v5409_v51 = vpop.permute.xlu2 %384 }
  0xc1   :  { %8758 = vst [vmem:[#allocation12_spill] sm:$0xff] %v5409_v51  ;;  %372 = vperm.xlu2 %4999, %v5204_v7   ;;  %v8766_v51 = vmov 0  }
  0xc2   :  { %5068 = vset.pattern.permute.xlu0 %v8737_v4 }
  0xc3   :  { %122 = vperm.xlu0 %5068, %v5173_v0  }
  0xc5   :  { %v5414_v52 = vpop.permute.xlu1 %490 }
  0xc7   :  { %5000 = vset.pattern.permute.xlu1 %v8725_v13  ;;  %v5487_v13 = vld [vmem:[%s8715_s0 + $0x1] ss:$0 sm:$0xff] }
  0xc8   :  { %576 = vperm.xlu1 %5000, %v5189_v5   ;;  %v5421_v54 = vpop.permute.xlu0 %572 }
  0xc9   :  { %5001 = vset.pattern.permute.xlu2 %v8729_v17  ;;  %v5424_v55 = vpop.permute.xlu2 %690 }
  0xca   :  { %678 = vperm.xlu2 %5001, %v5235_v12  }
  0xcb   :  { %921 = vperm.xlu0 %5068, %v843_v53   ;;  %v835_v53 = vld [vmem:[%s8717_s2 + $0x38] sm:$0xff] }
  0xce   :  { %v93_v56 = vpop.permute.xlu1 %92 }
  0xd0   :  { %5002 = vset.pattern.permute.xlu1 %v8735_v21  ;;  %v5436_v59 = vpop.permute.xlu0 %552 }
  0xd1   :  { %780 = vperm.xlu1 %5002, %v5218_v9  }
  0xd2   :  { %5003 = vset.pattern.permute.xlu2 %v8737_v4  ;;  %v5440_v60 = vpop.permute.xlu2 %87 }
  0xd3   :  { %8759 = vst [vmem:[#allocation13_spill] sm:$0xff] %v5440_v60  ;;  %916 = vperm.xlu2 %5003, %v842_v57   ;;  %72 = vperm.xlu0 %5068, %v5434_v58  }
  0xd7   :  { %v5443_v61 = vpop.permute.xlu1 %282 }
  0xd8   :  { %8760 = vst [vmem:[#allocation14_spill] sm:$0xff] %v5443_v61 }
  0xd9   :  { %5004 = vset.pattern.permute.xlu1 %v8723_v3  ;;  %v5449_v63 = vpop.permute.xlu0 %400  ;;  %v5482_v3 = vld [vmem:[%s8715_s0] ss:$0 sm:$0xff] }
  0xda   :  { %164 = vperm.xlu1 %5004, %v5434_v58  }
  0xdb   :  { %5005 = vset.pattern.permute.xlu2 %v8733_v2  ;;  %896 = vperm.xlu0 %5068, %v838_v62   ;;  %v5501_v2 = vld [vmem:[%s8715_s0 + $0x2] ss:$0 sm:$0xff] }
  0xdc   :  { %v5453_v0 = vpop.permute.xlu2 %380  ;;  %266 = vperm.xlu2 %5005, %v5393_v46  }
  0xdd   :  { %8761 = vst [vmem:[#allocation15_spill] sm:$0xff] %v5453_v0 }
  0xe0   :  { %v5456_v1 = vpop.permute.xlu1 %588 }
  0xe1   :  { %v377_v9 = vpop.permute.xlu0 %376 }
  0xe2   :  { %5006 = vset.pattern.permute.xlu1 %v8731_v10  ;;  %v831_v10 = vld [vmem:[%s8717_s2 + $0x18] sm:$0xff] }
  0xe3   :  { %47 = vperm.xlu0 %5068, %v5461_v6   ;;  %368 = vperm.xlu1 %5006, %v5339_v32   ;;  %v222_v6 = vmul.f32 %v5487_v13, %v5309_v25 }
  0xe4   :  { %5007 = vset.pattern.permute.xlu2 %v8727_v11 }
  0xe5   :  { %470 = vperm.xlu2 %5007, %v5204_v7   ;;  %v5468_v14 = vpop.permute.xlu2 %584 }
  0xe6   :  { %8763 = vst [vmem:[#allocation17_spill] sm:$0xff] %v5468_v14  ;;  %v140_v14 = vmul.f32 %v5482_v3, %v5291_v19 }
  0xe9   :  { %v5473_v57 = vpop.permute.xlu1 %792 }
  0xea   :  { %v5475_v62 = vpop.permute.xlu0 %356 }
  0xeb   :  { %881 = vperm.xlu0 %5068, %v835_v53   ;;  %5008 = vset.pattern.permute.xlu1 %v8729_v17  ;;  %v217_v53 = vmul.f32 %v5487_v13, %v181_v47  ;;  %v135_v17 = vmul.f32 %v5482_v3, %v93_v56  ;;  %v841_v47 = vld [vmem:[%s8717_s2 + $0x68] sm:$0xff]  ;;  %v5516_v56 = vld [vmem:[%s8715_s0 + $0x4] ss:$0 sm:$0xff] }
  0xec   :  { %674 = vperm.xlu1 %5008, %v5189_v5   ;;  %v511_v49 = vmul.f32 %v5516_v56, %v5398_v48 }
  0xed   :  { %5009 = vset.pattern.permute.xlu2 %v8735_v21  ;;  %v5506_v21 = vld [vmem:[%s8715_s0 + $0x3] ss:$0 sm:$0xff]  ;;  %v233_v60 = vadd.f32 %v217_v53, %v135_v17 }
  0xee   :  { %776 = vperm.xlu2 %5009, %v5235_v12   ;;  %v5491_v11 = vpop.permute.xlu2 %82  ;;  %v413_v27 = vmul.f32 %v5506_v21, %v377_v9 }
  0xef   :  { %8764 = vst [vmem:[#allocation18_spill] sm:$0xff] %v5491_v11 }
  0xf2   :  { %v279_v12 = vpop.permute.xlu1 %278  ;;  %v5508_v4 = vpop.permute.xlu0 %344 }
  0xf3   :  { %8765 = vst [vmem:[#allocation19_spill] sm:$0xff] %v5508_v4  ;;  %v315_v11 = vmul.f32 %v5501_v2, %v279_v12  ;;  %861 = vperm.xlu0 %5068, %v831_v10   ;;  %v5524_v4 = vld [vmem:[%s8715_s0 + $0x5] ss:$0 sm:$0xff]  ;;  %v987_v10 = vld [vmem:[%s8719_s4 + $0x78] sm:$0xff] }
  0xf4   :  { %5010 = vset.pattern.permute.xlu1 %v8766_v51  ;;  %v609_v17 = vmul.f32 %v5524_v4, %v5421_v54  ;;  %v8770_v54 = vmov 3  }
  0xf5   :  { %v331_v39 = vadd.f32 %v315_v11, %v233_v60  ;;  %911 = vperm.xlu1 %5010, %v841_v47   ;;  %v8769_v60 = vmov 2   ;;  %v8773_v47 = vmov 4  }
  0xf6   :  { %5011 = vset.pattern.permute.xlu2 %v8766_v51 }
  0xf7   :  { %v429_v9 = vadd.f32 %v413_v27, %v331_v39  ;;  %v5531_v53 = vpop.permute.xlu2 %274  ;;  %67 = vperm.xlu2 %5011, %v5213_v8   ;;  %v984_v8 = vld [vmem:[%s8719_s4 + $0x60] sm:$0xff] }
  0xf8   :  { %8767 = vst [vmem:[#allocation20_spill] sm:$0xff] %v5531_v53  ;;  %v840_v53 = vld [vmem:[%s8717_s2 + $0x60] sm:$0xff] }
  0xf9   :  { %v527_v12 = vadd.f32 %v511_v49, %v429_v9  ;;  %v981_v9 = vld [vmem:[%s8719_s4 + $0x48] sm:$0xff] }
  0xfb   :  { %1065 = vperm.xlu0 %5068, %v987_v10   ;;  %v5537_v29 = vpop.permute.xlu1 %482  ;;  %v769_v11 = vpop.permute.xlu0 %768  ;;  %v625_v48 = vadd.f32 %v609_v17, %v527_v12  ;;  %v8774_v17 = vmov 5  }
  0xfc   :  { %8768 = vst [vmem:[#allocation21_spill] sm:$0xff] %v5537_v29  ;;  %v8781_v29 = vmov 1  }
  0xfd   :  { %5012 = vset.pattern.permute.xlu1 %v8769_v60 }
  0xfe   :  { %262 = vperm.xlu1 %5012, %v5434_v58  }
  0xff   :  { %5013 = vset.pattern.permute.xlu2 %v8770_v54 }
 0x100   :  { %364 = vperm.xlu2 %5013, %v5393_v46   ;;  %v5546_v27 = vpop.permute.xlu2 %580 }
 0x101   :  { %8771 = vst [vmem:[#allocation22_spill] sm:$0xff] %v5546_v27  ;;  %v978_v27 = vld [vmem:[%s8719_s4 + $0x30] sm:$0xff] }
 0x103   :  { %1050 = vperm.xlu0 %5068, %v984_v8   ;;  %v5548_v39 = vpop.permute.xlu0 %748 }
 0x104   :  { %8772 = vst [vmem:[#allocation23_spill] sm:$0xff] %v5548_v39  ;;  %v5550_v49 = vpop.permute.xlu1 %788  ;;  %v8778_v39 = vmov 7  }
 0x106   :  { %5014 = vset.pattern.permute.xlu1 %v8773_v47 }
 0x107   :  { %466 = vperm.xlu1 %5014, %v5339_v32  }
 0x108   :  { %5015 = vset.pattern.permute.xlu2 %v8774_v17 }
 0x109   :  { %568 = vperm.xlu2 %5015, %v5204_v7   ;;  %v5559_v10 = vpop.permute.xlu2 %784 }
 0x10a   :  { %8775 = vst [vmem:[#allocation24_spill] sm:$0xff] %v5559_v10  ;;  %v238_v10 = vadd.f32 %v222_v6, %v140_v14  ;;  %v4877_v6 = vld [vmem:[%s8719_s4 + $0xd0] sm:$0xff] }
 0x10b   :  { %1035 = vperm.xlu0 %5068, %v981_v9   ;;  %v5561_v12 = vpop.permute.xlu0 %744 }
 0x10c   :  { %8776 = vst [vmem:[#allocation25_spill] sm:$0xff] %v5561_v12 }
 0x10d   :  { %v5563_v8 = vpop.permute.xlu1 %172 }
 0x10e   :  { %8777 = vst [vmem:[#allocation26_spill] sm:$0xff] %v5563_v8 }
 0x10f   :  { %5016 = vset.pattern.permute.xlu1 %v8778_v39 }
 0x110   :  { %772 = vperm.xlu1 %5016, %v5189_v5   ;;  %v975_v5 = vld [vmem:[%s8719_s4 + $0x18] sm:$0xff] }
 0x111   :  { %5017 = vset.pattern.permute.xlu2 %v8766_v51 }
 0x112   :  { %906 = vperm.xlu2 %5017, %v840_v53   ;;  %v5574_v9 = vpop.permute.xlu2 %168 }
 0x113   :  { %8779 = vst [vmem:[#allocation27_spill] sm:$0xff] %v5574_v9  ;;  %1020 = vperm.xlu0 %5068, %v978_v27   ;;  %v972_v9 = vld [vmem:[%s8719_s4] sm:$0xff] }
 0x114   :  { %v5576_v12 = vpop.permute.xlu0 %694 }
 0x116   :  { %v5578_v8 = vpop.permute.xlu1 %478 }
 0x117   :  { %8780 = vst [vmem:[#allocation28_spill] sm:$0xff] %v5578_v8  ;;  %v5601_v8 = vld [vmem:[%s8715_s0 + $0x6] ss:$0 sm:$0xff] }
 0x118   :  { %5018 = vset.pattern.permute.xlu1 %v8766_v51 }
 0x119   :  { %62 = vperm.xlu1 %5018, %v5351_v35  }
 0x11a   :  { %5019 = vset.pattern.permute.xlu2 %v8781_v29 }
 0x11b   :  { %v5586_v0 = vpop.permute.xlu2 %372  ;;  %156 = vperm.xlu2 %5019, %v5351_v35   ;;  %1005 = vperm.xlu0 %5068, %v975_v5   ;;  %v5606_v5 = vld [vmem:[%s8715_s0 + $0x7] ss:$0 sm:$0xff] }
 0x11c   :  { %8782 = vst [vmem:[#allocation29_spill] sm:$0xff] %v5586_v0  ;;  %v5589_v53 = vpop.permute.xlu0 %686  ;;  %v805_v37 = vmul.f32 %v5606_v5, %v769_v11  ;;  %v320_v11 = vmul.f32 %v5501_v2, %v5289_v18  ;;  %v516_v18 = vmul.f32 %v5516_v56, %v5374_v41  ;;  %v223_v41 = vmul.f32 %v5487_v13, %v5293_v20 }
 0x11d   :  { %v321_v20 = vmul.f32 %v5501_v2, %v5272_v15  ;;  %v615_v15 = vmul.f32 %v5524_v4, %v5388_v45 }
 0x11f   :  { %v5591_v27 = vpop.permute.xlu1 %682 }
 0x120   :  { %8783 = vst [vmem:[#allocation30_spill] sm:$0xff] %v5591_v27 }
 0x121   :  { %5022 = vset.pattern.permute.xlu1 %v8770_v54 }
 0x122   :  { %360 = vperm.xlu1 %5022, %v5434_v58  }
 0x123   :  { %5023 = vset.pattern.permute.xlu2 %v8773_v47  ;;  %990 = vperm.xlu0 %5068, %v972_v9   ;;  %v4880_v9 = vld [vmem:[%s8719_s4 + $0xe8] sm:$0xff] }
 0x124   :  { %v5609_v0 = vpop.permute.xlu2 %678  ;;  %462 = vperm.xlu2 %5023, %v5393_v46   ;;  %v671_v61 = vpop.permute.xlu0 %670 }
 0x125   :  { %8784 = vst [vmem:[#allocation31_spill] sm:$0xff] %v5609_v0  ;;  %v707_v23 = vmul.f32 %v5601_v8, %v671_v61  ;;  %v336_v61 = vadd.f32 %v320_v11, %v238_v10  ;;  %v614_v10 = vmul.f32 %v5524_v4, %v5382_v43  ;;  %v712_v11 = vmul.f32 %v5601_v8, %v5424_v55 }
 0x126   :  { %v419_v55 = vmul.f32 %v5506_v21, %v5449_v63  ;;  %v713_v63 = vmul.f32 %v5601_v8, %v5576_v12 }
 0x127   :  { %v723_v27 = vadd.f32 %v707_v23, %v625_v48  ;;  %v8786_v23 = vmov 6   ;;  %v839_v48 = vld [vmem:[%s8717_s2 + $0x58] sm:$0xff] }
 0x128   :  { %v5618_v54 = vpop.permute.xlu1 %77 }
 0x129   :  { %v5623_v0 = vadd.f32 %v805_v37, %v723_v27  ;;  %v418_v37 = vmul.f32 %v5506_v21, %v5316_v26  ;;  %v5651_v26 = vld [vmem:[%s8716_s1 + $0x10] sm:$0xff] }
 0x12a   :  { %5024 = vset.pattern.permute.xlu1 %v8774_v17 }
 0x12b   :  { %8785 = vst [vmem:[#allocation32_spill] sm:$0xff] %v5623_v0  ;;  %1991 = vperm.xlu0 %5068, %v4880_v9   ;;  %564 = vperm.xlu1 %5024, %v5339_v32   ;;  %v434_v27 = vadd.f32 %v418_v37, %v336_v61  ;;  %v810_v37 = vmul.f32 %v5606_v5, %v5550_v49 }
 0x12c   :  { %5025 = vset.pattern.permute.xlu2 %v8786_v23  ;;  %v5630_v19 = vpop.permute.xlu0 %638  ;;  %v517_v49 = vmul.f32 %v5516_v56, %v5362_v38 }
 0x12d   :  { %8787 = vst [vmem:[#allocation33_spill] sm:$0xff] %v5630_v19  ;;  %v917_v25 = vpop.permute.xlu2 %916  ;;  %666 = vperm.xlu2 %5025, %v5204_v7   ;;  %v532_v9 = vadd.f32 %v516_v18, %v434_v27  ;;  %v4874_v27 = vld [vmem:[%s8719_s4 + $0xb8] sm:$0xff] }
 0x12f   :  { %v630_v43 = vadd.f32 %v614_v10, %v532_v9 }
 0x131   :  { %v5640_v14 = vpop.permute.xlu1 %270  ;;  %v728_v18 = vadd.f32 %v712_v11, %v630_v43  ;;  %v4871_v43 = vld [vmem:[%s8719_s4 + $0xa0] sm:$0xff] }
 0x132   :  { %8788 = vst [vmem:[#allocation34_spill] sm:$0xff] %v5640_v14 }
 0x133   :  { %1976 = vperm.xlu0 %5068, %v4877_v6   ;;  %5026 = vset.pattern.permute.xlu1 %v8766_v51  ;;  %v826_v10 = vadd.f32 %v810_v37, %v728_v18  ;;  %v811_v37 = vmul.f32 %v5606_v5, %v5473_v57  ;;  %v4868_v57 = vld [vmem:[%s8719_s4 + $0x88] sm:$0xff] }
 0x134   :  { %901 = vperm.xlu1 %5026, %v839_v48  }
 0x135   :  { %5027 = vset.pattern.permute.xlu2 %v8766_v51  ;;  %v123_v61 = vpop.permute.xlu0 %122  ;;  %v938_v14 = vadd.f32 %v917_v25, %v826_v10 }
 0x136   :  { %v141_v6 = vmul.f32 %v5482_v3, %v123_v61  ;;  %v5661_v19 = vpop.permute.xlu2 %266  ;;  %57 = vperm.xlu2 %5027, %v5651_v26  }
 0x137   :  { %v954_v11 = vmax.f32 %v938_v14, 0.0 }
 0x138   :  { %v239_v48 = vadd.f32 %v223_v41, %v141_v6 }
 0x13a   :  { %v337_v9 = vadd.f32 %v321_v20, %v239_v48  ;;  %v5673_v61 = vpop.permute.xlu1 %576 }
 0x13b   :  { %1961 = vperm.xlu0 %5068, %v4874_v27  }
 0x13c   :  { %v435_v0 = vadd.f32 %v419_v55, %v337_v9  ;;  %5028 = vset.pattern.permute.xlu1 %v8781_v29 }
 0x13d   :  { %152 = vperm.xlu1 %5028, %v5651_v26   ;;  %v922_v20 = vpop.permute.xlu0 %921 }
 0x13e   :  { %v533_v41 = vadd.f32 %v517_v49, %v435_v0  ;;  %5029 = vset.pattern.permute.xlu2 %v8769_v60  ;;  %v5692_v0 = vand.u32 4294901760, %v954_v11 }
 0x13f   :  { %v5682_v38 = vpop.permute.xlu2 %470  ;;  %254 = vperm.xlu2 %5029, %v5351_v35  }
 0x140   :  { %v631_v25 = vadd.f32 %v615_v15, %v533_v41  ;;  %v5702_v55 = vsub.f32 %v954_v11, %v5692_v0  ;;  %v4913_v41 = vld [vmem:[%s8719_s4 + $0x170] sm:$0xff] }
 0x142   :  { %v729_v45 = vadd.f32 %v713_v63, %v631_v25  ;;  %v8742_v9 = vand.u32 4294901760, %v5702_v55  ;;  %v212_v63 = vmul.f32 %v5487_v13, %v5330_v30 }
 0x143   :  { %1946 = vperm.xlu0 %5068, %v4871_v43   ;;  %v5690_v6 = vpop.permute.xlu1 %780  ;;  %v221_v43 = vmul.f32 %v5487_v13, %v5320_v28 }
 0x144   :  { %v827_v12 = vadd.f32 %v811_v37, %v729_v45  ;;  %v1238_v25 = vsub.f32 %v5702_v55, %v8742_v9  ;;  %v310_v37 = vmul.f32 %v5501_v2, %v5346_v34  ;;  %v506_v34 = vmul.f32 %v5516_v56, %v5406_v50  ;;  %v4910_v50 = vld [vmem:[%s8719_s4 + $0x158] sm:$0xff] }
 0x145   :  { %5030 = vset.pattern.permute.xlu1 %v8773_v47 }
 0x146   :  { %v939_v18 = vadd.f32 %v922_v20, %v827_v12  ;;  %458 = vperm.xlu1 %5030, %v5434_v58   ;;  %v139_v20 = vmul.f32 %v5482_v3, %v5281_v16  ;;  %v220_v16 = vmul.f32 %v5487_v13, %v5300_v22  ;;  %v318_v22 = vmul.f32 %v5501_v2, %v5377_v42 }
 0x147   :  { %5031 = vset.pattern.permute.xlu2 %v8774_v17  ;;  %v416_v42 = vmul.f32 %v5506_v21, %v5371_v40 }
 0x148   :  { %v955_v14 = vmax.f32 %v939_v18, 0.0  ;;  %560 = vperm.xlu2 %5031, %v5393_v46   ;;  %v5704_v48 = vpop.permute.xlu2 %776  ;;  %v319_v18 = vmul.f32 %v5501_v2, %v5353_v36  ;;  %v237_v9 = vadd.f32 %v221_v43, %v139_v20  ;;  %v138_v36 = vmul.f32 %v5482_v3, %v5332_v31 }
 0x149   :  { %v515_v31 = vmul.f32 %v5516_v56, %v5414_v52  ;;  %v613_v43 = vmul.f32 %v5524_v4, %v5456_v1  ;;  %v711_v52 = vmul.f32 %v5601_v8, %v5589_v53  ;;  %v514_v1 = vmul.f32 %v5516_v56, %v5385_v44  ;;  %v8791_v53 = vld [vmem:[#allocation17_spill] sm:$0xff]  ;;  %v8792_v44 = vld [vmem:[#allocation30_spill] sm:$0xff] }
 0x14a   :  { %v5706_v27 = vand.u32 4294901760, %v955_v14 }
 0x14b   :  { %1931 = vperm.xlu0 %5068, %v4868_v57   ;;  %v1239_v57 = vand.u32 4294901760, %v1238_v25 }
 0x14c   :  { %v5709_v49 = vsub.f32 %v955_v14, %v5706_v27  ;;  %1069 = vmatpush.msra.mxu0 %v5706_v27  ;;  %1520 = vmatpush.msra.mxu3 %v5706_v27  ;;  %v5713_v10 = vpop.permute.xlu1 %164 }
 0x14e   :  { %1071 = vmatpush.msra.mxu0 %v5692_v0  ;;  %1392 = vmatpush.msra.mxu2 %v5709_v49  ;;  %v8745_v15 = vand.u32 4294901760, %v5709_v49 }
 0x14f   :  { %1522 = vmatpush.msra.mxu3 %v5692_v0  ;;  %5032 = vset.pattern.permute.xlu1 %v8786_v23 }
 0x150   :  { %662 = vperm.xlu1 %5032, %v5339_v32   ;;  %5033 = vset.pattern.permute.xlu2 %v8778_v39  ;;  %v1232_v11 = vsub.f32 %v5709_v49, %v8745_v15 }
 0x151   :  { %1395 = vmatpush.msra.mxu2 %v5702_v55  ;;  %764 = vperm.xlu2 %5033, %v5204_v7   ;;  %v68_v30 = vpop.permute.xlu2 %67  ;;  %v408_v7 = vmul.f32 %v5506_v21, %v5475_v62  ;;  %v417_v62 = vmul.f32 %v5506_v21, %v5343_v33 }
 0x152   :  { %v130_v45 = vmul.f32 %v5482_v3, %v68_v30  ;;  %v1233_v12 = vand.u32 4294901760, %v1232_v11 }
 0x153   :  { %2932 = vperm.xlu0 %5068, %v4913_v41   ;;  %v604_v41 = vmul.f32 %v5524_v4, %v5436_v59 }
 0x154   :  { %v228_v14 = vadd.f32 %v212_v63, %v130_v45  ;;  %1234 = vmatpush.msra.mxu1 %v1233_v12  ;;  %v335_v63 = vadd.f32 %v319_v18, %v237_v9  ;;  %v236_v9 = vadd.f32 %v220_v16, %v138_v36  ;;  %v612_v16 = vmul.f32 %v5524_v4, %v8791_v53 }
 0x155   :  { %v5747_v28 = vpop.permute.xlu1 %368 }
 0x156   :  { %v326_v11 = vadd.f32 %v310_v37, %v228_v14  ;;  %1240 = vmatpush.msra.mxu1 %v1239_v57  ;;  %v433_v30 = vadd.f32 %v417_v62, %v335_v63  ;;  %v334_v45 = vadd.f32 %v318_v22, %v236_v9  ;;  %v8789_v57 = vld [vmem:[#allocation24_spill] sm:$0xff]  ;;  %v710_v63 = vmul.f32 %v5601_v8, %v8792_v44  ;;  %v4904_v9 = vld [vmem:[%s8719_s4 + $0x128] sm:$0xff] }
 0x157   :  { %v809_v40 = vmul.f32 %v5606_v5, %v8789_v57 }
 0x158   :  { %v424_v25 = vadd.f32 %v408_v7, %v326_v11  ;;  %5034 = vset.pattern.permute.xlu1 %v8766_v51  ;;  %v531_v12 = vadd.f32 %v515_v31, %v433_v30  ;;  %v4907_v7 = vld [vmem:[%s8719_s4 + $0x140] sm:$0xff]  ;;  %v432_v14 = vadd.f32 %v416_v42, %v334_v45  ;;  %v8790_v11 = vmov 3  }
 0x159   :  { %5035 = vset.pattern.permute.xlu2 %v8781_v29  ;;  %52 = vperm.xlu1 %5034, %v5307_v24  }
 0x15a   :  { %v5769_v33 = vpop.permute.xlu2 %364  ;;  %148 = vperm.xlu2 %5035, %v5307_v24   ;;  %v522_v59 = vadd.f32 %v506_v34, %v424_v25  ;;  %v629_v18 = vadd.f32 %v613_v43, %v531_v12  ;;  %v530_v62 = vadd.f32 %v514_v1, %v432_v14  ;;  %v4901_v1 = vld [vmem:[%s8719_s4 + $0x110] sm:$0xff] }
 0x15b   :  { %2917 = vperm.xlu0 %5068, %v4910_v50   ;;  %v808_v50 = vmul.f32 %v5606_v5, %v5690_v6 }
 0x15c   :  { %v5774_v37 = vadd.f32 %v604_v41, %v522_v59  ;;  %v727_v34 = vadd.f32 %v711_v52, %v629_v18  ;;  %v628_v25 = vadd.f32 %v612_v16, %v530_v62 }
 0x15e   :  { %v5780_v20 = vpop.permute.xlu1 %674  ;;  %v825_v41 = vadd.f32 %v809_v40, %v727_v34  ;;  %v726_v59 = vadd.f32 %v710_v63, %v628_v25  ;;  %v837_v34 = vld [vmem:[%s8717_s2 + $0x48] sm:$0xff]  ;;  %v4931_v25 = vld [vmem:[%s8719_s4 + $0x180] sm:$0xff] }
 0x160   :  { %v824_v43 = vadd.f32 %v808_v50, %v726_v59  ;;  %v8794_v59 = vld [vmem:[#allocation6_spill] sm:$0xff] }
 0x161   :  { %5036 = vset.pattern.permute.xlu1 %v8769_v60 }
 0x162   :  { %5037 = vset.pattern.permute.xlu2 %v8790_v11  ;;  %250 = vperm.xlu1 %5036, %v5651_v26  }
 0x163   :  { %v5794_v36 = vpop.permute.xlu2 %568  ;;  %352 = vperm.xlu2 %5037, %v5351_v35   ;;  %2902 = vperm.xlu0 %5068, %v4907_v7  }
 0x167   :  { %v912_v22 = vpop.permute.xlu1 %911 }
 0x168   :  { %v937_v31 = vadd.f32 %v912_v22, %v825_v41  ;;  %v4934_v22 = vld [vmem:[%s8719_s4 + $0x198] sm:$0xff] }
 0x16a   :  { %v953_v30 = vmax.f32 %v937_v31, 0.0  ;;  %5039 = vset.pattern.permute.xlu1 %v8774_v17 }
 0x16b   :  { %5040 = vset.pattern.permute.xlu2 %v8786_v23  ;;  %556 = vperm.xlu1 %5039, %v5434_v58  }
 0x16c   :  { %v5807_v42 = vand.u32 4294901760, %v953_v30  ;;  %2887 = vperm.xlu0 %5068, %v4904_v9   ;;  %v907_v45 = vpop.permute.xlu2 %906  ;;  %658 = vperm.xlu2 %5040, %v5393_v46   ;;  %v218_v9 = vmul.f32 %v5487_v13, %v8794_v59  ;;  %v610_v59 = vmul.f32 %v5524_v4, %v5673_v61  ;;  %v836_v61 = vld [vmem:[%s8717_s2 + $0x40] sm:$0xff] }
 0x16d   :  { %v936_v6 = vadd.f32 %v907_v45, %v824_v43 }
 0x16e   :  { %1073 = vmatpush.msra.mxu0 %v5807_v42  ;;  %1524 = vmatpush.msra.mxu3 %v5807_v42  ;;  %v5813_v12 = vsub.f32 %v953_v30, %v5807_v42  ;;  %v8795_v30 = vld [vmem:[#allocation9_spill] sm:$0xff] }
 0x16f   :  { %v952_v52 = vmax.f32 %v936_v6, 0.0  ;;  %v136_v43 = vmul.f32 %v5482_v3, %v8795_v30  ;;  %v8796_v6 = vld [vmem:[#allocation14_spill] sm:$0xff] }
 0x170   :  { %v5815_v18 = vpop.permute.xlu1 %262  ;;  %1398 = vmatpush.msra.mxu2 %v5813_v12  ;;  %v8744_v7 = vand.u32 4294901760, %v5813_v12 }
 0x171   :  { %v5819_v14 = vand.u32 4294901760, %v952_v52 }
 0x172   :  { %v1244_v57 = vsub.f32 %v5813_v12, %v8744_v7  ;;  %v8805_v7 = vld [vmem:[#allocation31_spill] sm:$0xff] }
 0x173   :  { %1075 = vmatpush.msra.mxu0 %v5819_v14  ;;  %1526 = vmatpush.msra.mxu3 %v5819_v14  ;;  %v5830_v40 = vsub.f32 %v952_v52, %v5819_v14  ;;  %v316_v52 = vmul.f32 %v5501_v2, %v8796_v6  ;;  %v709_v15 = vmul.f32 %v5601_v8, %v8805_v7 }
 0x174   :  { %5041 = vset.pattern.permute.xlu1 %v8778_v39  ;;  %2872 = vperm.xlu0 %5068, %v4901_v1   ;;  %v1245_v53 = vand.u32 4294901760, %v1244_v57  ;;  %v234_v1 = vadd.f32 %v218_v9, %v136_v43  ;;  %v8797_v57 = vld [vmem:[#allocation15_spill] sm:$0xff]  ;;  %v5891_v9 = vpop.permute.xlu0 %72  ;;  %v708_v43 = vmul.f32 %v5601_v8, %v5780_v20 }
 0x175   :  { %5042 = vset.pattern.permute.xlu2 %v8766_v51  ;;  %760 = vperm.xlu1 %5041, %v5339_v32   ;;  %v5838_v16 = vpop.permute.xlu2 %156  ;;  %v8743_v62 = vand.u32 4294901760, %v5830_v40  ;;  %v8793_v32 = vld [vmem:[#allocation16_spill] sm:$0xff] }
 0x176   :  { %1401 = vmatpush.msra.mxu2 %v5830_v40  ;;  %891 = vperm.xlu2 %5042, %v837_v34   ;;  %v414_v34 = vmul.f32 %v5506_v21, %v8797_v57 }
 0x177   :  { %1246 = vmatpush.msra.mxu1 %v1245_v53  ;;  %v1250_v44 = vsub.f32 %v5830_v40, %v8743_v62  ;;  %v332_v53 = vadd.f32 %v316_v52, %v234_v1  ;;  %v8799_v52 = vld [vmem:[#allocation8_spill] sm:$0xff]  ;;  %v8800_v1 = vld [vmem:[#allocation10_spill] sm:$0xff] }
 0x178   :  { %v137_v57 = vmul.f32 %v5482_v3, %v8800_v1 }
 0x179   :  { %v5845_v63 = vpop.permute.xlu1 %466  ;;  %v1251_v41 = vand.u32 4294901760, %v1250_v44  ;;  %v8798_v44 = vld [vmem:[#allocation28_spill] sm:$0xff] }
 0x17b   :  { %1252 = vmatpush.msra.mxu1 %v1251_v41  ;;  %v512_v41 = vmul.f32 %v5516_v56, %v8798_v44 }
 0x17c   :  { %3798 = vperm.xlu0 %5068, %v4931_v25  }
 0x17d   :  { %5043 = vset.pattern.permute.xlu1 %v8781_v29 }
 0x17e   :  { %5044 = vset.pattern.permute.xlu2 %v8769_v60  ;;  %144 = vperm.xlu1 %5043, %v8793_v32   ;;  %v5853_v50 = vpop.permute.xlu2 %462 }
 0x17f   :  { %246 = vperm.xlu2 %5044, %v5307_v24   ;;  %v4937_v24 = vld [vmem:[%s8719_s4 + $0x1b0] sm:$0xff] }
 0x182   :  { %v773_v31 = vpop.permute.xlu1 %772 }
 0x184   :  { %3813 = vperm.xlu0 %5068, %v4934_v22   ;;  %v4940_v22 = vld [vmem:[%s8719_s4 + $0x1c8] sm:$0xff] }
 0x186   :  { %5045 = vset.pattern.permute.xlu1 %v8790_v11 }
 0x187   :  { %5046 = vset.pattern.permute.xlu2 %v8773_v47  ;;  %348 = vperm.xlu1 %5045, %v5651_v26   ;;  %v5862_v29 = vpop.permute.xlu2 %666 }
 0x188   :  { %450 = vperm.xlu2 %5046, %v5351_v35  }
 0x18b   :  { %v5872_v45 = vpop.permute.xlu1 %62 }
 0x18c   :  { %3828 = vperm.xlu0 %5068, %v4937_v24   ;;  %v430_v24 = vadd.f32 %v414_v34, %v332_v53  ;;  %v806_v34 = vmul.f32 %v5606_v5, %v773_v31  ;;  %v8801_v53 = vld [vmem:[#allocation11_spill] sm:$0xff]  ;;  %v4943_v31 = vld [vmem:[%s8719_s4 + $0x1e0] sm:$0xff] }
 0x18e   :  { %v528_v30 = vadd.f32 %v512_v41, %v430_v24  ;;  %v317_v41 = vmul.f32 %v5501_v2, %v8801_v53  ;;  %v8802_v24 = vld [vmem:[#allocation12_spill] sm:$0xff] }
 0x18f   :  { %5048 = vset.pattern.permute.xlu1 %v8786_v23 }
 0x190   :  { %5049 = vset.pattern.permute.xlu2 %v8778_v39  ;;  %654 = vperm.xlu1 %5048, %v5434_v58   ;;  %v5883_v25 = vpop.permute.xlu2 %57  ;;  %v626_v44 = vadd.f32 %v610_v59, %v528_v30 }
 0x191   :  { %756 = vperm.xlu2 %5049, %v5393_v46   ;;  %v219_v46 = vmul.f32 %v5487_v13, %v8799_v52  ;;  %v415_v52 = vmul.f32 %v5506_v21, %v8802_v24 }
 0x192   :  { %v724_v20 = vadd.f32 %v708_v43, %v626_v44  ;;  %v8803_v43 = vld [vmem:[#allocation21_spill] sm:$0xff] }
 0x193   :  { %v513_v44 = vmul.f32 %v5516_v56, %v8803_v43  ;;  %v4700_v43 = vld [vmem:[%s8720_s5 + $0x10] sm:$0xff] }
 0x194   :  { %3843 = vperm.xlu0 %5068, %v4940_v22   ;;  %v5895_v6 = vpop.permute.xlu1 %360  ;;  %v235_v22 = vadd.f32 %v219_v46, %v137_v57  ;;  %v822_v30 = vadd.f32 %v806_v34, %v724_v20  ;;  %v8804_v57 = vld [vmem:[#allocation22_spill] sm:$0xff]  ;;  %v4946_v20 = vld [vmem:[%s8719_s4 + $0x1f8] sm:$0xff] }
 0x195   :  { %v611_v53 = vmul.f32 %v5524_v4, %v8804_v57 }
 0x196   :  { %v333_v1 = vadd.f32 %v317_v41, %v235_v22  ;;  %v807_v41 = vmul.f32 %v5606_v5, %v5704_v48 }
 0x198   :  { %5050 = vset.pattern.permute.xlu1 %v8766_v51  ;;  %v431_v46 = vadd.f32 %v415_v52, %v333_v1 }
 0x199   :  { %5051 = vset.pattern.permute.xlu2 %v8769_v60  ;;  %886 = vperm.xlu1 %5050, %v836_v61   ;;  %v5911_v59 = vpop.permute.xlu2 %254  ;;  %v897_v60 = vpop.permute.xlu0 %896 }
 0x19a   :  { %242 = vperm.xlu2 %5051, %v8793_v32   ;;  %v934_v24 = vadd.f32 %v897_v60, %v822_v30  ;;  %v529_v62 = vadd.f32 %v513_v44, %v431_v46 }
 0x19c   :  { %3858 = vperm.xlu0 %5068, %v4943_v31   ;;  %v627_v34 = vadd.f32 %v611_v53, %v529_v62  ;;  %v950_v22 = vmax.f32 %v934_v24, 0.0 }
 0x19d   :  { %v5921_v61 = vpop.permute.xlu1 %564 }
 0x19e   :  { %v725_v31 = vadd.f32 %v709_v15, %v627_v34  ;;  %v5936_v48 = vand.u32 4294901760, %v950_v22  ;;  %v5084_v15 = vld [vmem:[%s8716_s1 + $0x20] sm:$0xff] }
 0x1a0   :  { %v823_v7 = vadd.f32 %v807_v41, %v725_v31  ;;  %v5943_v44 = vsub.f32 %v950_v22, %v5936_v48  ;;  %v128_v41 = vmul.f32 %v5482_v3, %v5883_v25  ;;  %v213_v22 = vmul.f32 %v5487_v13, %v5713_v10  ;;  %v4703_v31 = vld [vmem:[%s8720_s5 + $0x28] sm:$0xff] }
 0x1a1   :  { %5053 = vset.pattern.permute.xlu1 %v8773_v47 }
 0x1a2   :  { %5054 = vset.pattern.permute.xlu2 %v8774_v17  ;;  %446 = vperm.xlu1 %5053, %v5651_v26   ;;  %v5933_v52 = vpop.permute.xlu2 %560  ;;  %v1261_v60 = vand.u32 4294901760, %v5943_v44 }
 0x1a3   :  { %548 = vperm.xlu2 %5054, %v5351_v35  }
 0x1a4   :  { %3873 = vperm.xlu0 %5068, %v4946_v20   ;;  %v131_v20 = vmul.f32 %v5482_v3, %v5891_v9  ;;  %v311_v9 = vmul.f32 %v5501_v2, %v5815_v18 }
 0x1a6   :  { %v902_v62 = vpop.permute.xlu1 %901 }
 0x1a7   :  { %v935_v30 = vadd.f32 %v902_v62, %v823_v7  ;;  %v1262_v62 = vsub.f32 %v5943_v44, %v1261_v60 }
 0x1a9   :  { %v951_v1 = vmax.f32 %v935_v30, 0.0 }
 0x1aa   :  { %5055 = vset.pattern.permute.xlu1 %v8786_v23 }
 0x1ab   :  { %v5945_v46 = vand.u32 4294901760, %v951_v1  ;;  %5056 = vset.pattern.permute.xlu2 %v8778_v39  ;;  %650 = vperm.xlu1 %5055, %v5084_v15   ;;  %v5951_v57 = vpop.permute.xlu2 %764  ;;  %v5993_v15 = vld [vmem:[%s8716_s1 + $0x8] sm:$0xff] }
 0x1ac   :  { %4726 = vperm.xlu0 %5068, %v4700_v43   ;;  %752 = vperm.xlu2 %5056, %v5434_v58   ;;  %v409_v43 = vmul.f32 %v5506_v21, %v5895_v6 }
 0x1ad   :  { %1077 = vmatpush.msra.mxu0 %v5945_v46  ;;  %1528 = vmatpush.msra.mxu3 %v5945_v46  ;;  %v5957_v53 = vsub.f32 %v951_v1, %v5945_v46  ;;  %v229_v1 = vadd.f32 %v213_v22, %v131_v20  ;;  %v4706_v22 = vld [vmem:[%s8720_s5 + $0x40] sm:$0xff] }
 0x1af   :  { %v153_v24 = vpop.permute.xlu1 %152  ;;  %1079 = vmatpush.msra.mxu0 %v5936_v48  ;;  %1404 = vmatpush.msra.mxu2 %v5957_v53  ;;  %v1255_v34 = vand.u32 4294901760, %v5957_v53  ;;  %v327_v18 = vadd.f32 %v311_v9, %v229_v1 }
 0x1b0   :  { %v210_v58 = vmul.f32 %v5487_v13, %v153_v24  ;;  %1530 = vmatpush.msra.mxu3 %v5936_v48  ;;  %v211_v24 = vmul.f32 %v5487_v13, %v5838_v16  ;;  %v132_v16 = vmul.f32 %v5482_v3, %v5618_v54 }
 0x1b1   :  { %1407 = vmatpush.msra.mxu2 %v5943_v44  ;;  %v1256_v25 = vsub.f32 %v5957_v53, %v1255_v34  ;;  %v4936_v44 = vld [vmem:[%s8719_s4 + $0x1a8] sm:$0xff] }
 0x1b2   :  { %v5978_v7 = vadd.f32 %v210_v58, %v128_v41  ;;  %v129_v41 = vmul.f32 %v5482_v3, %v5872_v45  ;;  %v425_v58 = vadd.f32 %v409_v43, %v327_v18 }
 0x1b3   :  { %5057 = vset.pattern.permute.xlu1 %v8790_v11  ;;  %v1257_v10 = vand.u32 4294901760, %v1256_v25  ;;  %v1263_v11 = vand.u32 4294901760, %v1262_v62  ;;  %v8806_v25 = vld [vmem:[#allocation27_spill] sm:$0xff] }
 0x1b4   :  { %4741 = vperm.xlu0 %5068, %v4703_v31   ;;  %5058 = vset.pattern.permute.xlu2 %v8773_v47  ;;  %v149_v30 = vpop.permute.xlu2 %148  ;;  %v309_v31 = vmul.f32 %v5501_v2, %v5911_v59  ;;  %v214_v62 = vmul.f32 %v5487_v13, %v8806_v25  ;;  %v227_v45 = vadd.f32 %v211_v24, %v129_v41  ;;  %v4709_v41 = vld [vmem:[%s8720_s5 + $0x58] sm:$0xff] }
 0x1b5   :  { %340 = vperm.xlu1 %5057, %v8793_v32   ;;  %442 = vperm.xlu2 %5058, %v5993_v15  }
 0x1b6   :  { %1258 = vmatpush.msra.mxu1 %v1257_v10  ;;  %v312_v10 = vmul.f32 %v5501_v2, %v5661_v19  ;;  %v325_v43 = vadd.f32 %v309_v31, %v227_v45  ;;  %v230_v54 = vadd.f32 %v214_v62, %v132_v16  ;;  %v508_v19 = vmul.f32 %v5516_v56, %v5853_v50 }
 0x1b7   :  { %v209_v62 = vmul.f32 %v5487_v13, %v149_v30 }
 0x1b8   :  { %1264 = vmatpush.msra.mxu1 %v1263_v11  ;;  %v459_v6 = vpop.permute.xlu1 %458  ;;  %v410_v11 = vmul.f32 %v5506_v21, %v5769_v33  ;;  %v328_v24 = vadd.f32 %v312_v10, %v230_v54  ;;  %v834_v33 = vld [vmem:[%s8717_s2 + $0x30] sm:$0xff] }
 0x1b9   :  { %v507_v20 = vmul.f32 %v5516_v56, %v459_v6 }
 0x1bb   :  { %v6010_v9 = vadd.f32 %v507_v20, %v425_v58  ;;  %v426_v58 = vadd.f32 %v410_v11, %v328_v24  ;;  %v833_v24 = vld [vmem:[%s8717_s2 + $0x28] sm:$0xff] }
 0x1bc   :  { %4756 = vperm.xlu0 %5068, %v4706_v22  }
 0x1bd   :  { %5059 = vset.pattern.permute.xlu1 %v8774_v17  ;;  %5060 = vset.pattern.permute.xlu2 %v8786_v23  ;;  %v353_v1 = vpop.permute.xlu2 %352  ;;  %v524_v20 = vadd.f32 %v508_v19, %v426_v58 }
 0x1be   :  { %544 = vperm.xlu1 %5059, %v5651_v26   ;;  %v407_v59 = vmul.f32 %v5506_v21, %v353_v1  ;;  %646 = vperm.xlu2 %5060, %v5351_v35   ;;  %v606_v35 = vmul.f32 %v5524_v4, %v5933_v52  ;;  %v4712_v52 = vld [vmem:[%s8720_s5 + $0x70] sm:$0xff] }
 0x1bf   :  { %v8807_v1 = vld [vmem:[#allocation32_spill] sm:$0xff] }
 0x1c0   :  { %v6021_v18 = vadd.f32 %v407_v59, %v325_v43  ;;  %v622_v22 = vadd.f32 %v606_v35, %v524_v20 }
 0x1c2   :  { %v6028_v6 = vpop.permute.xlu1 %662 }
 0x1c4   :  { %4771 = vperm.xlu0 %5068, %v4709_v41  }
 0x1c6   :  { %5061 = vset.pattern.permute.xlu1 %v8766_v51  ;;  %5062 = vset.pattern.permute.xlu2 %v8773_v47  ;;  %v659_v50 = vpop.permute.xlu2 %658 }
 0x1c7   :  { %876 = vperm.xlu1 %5061, %v834_v33   ;;  %v704_v31 = vmul.f32 %v5601_v8, %v659_v50  ;;  %438 = vperm.xlu2 %5062, %v8793_v32   ;;  %v8808_v33 = vld [vmem:[#allocation19_spill] sm:$0xff] }
 0x1c8   :  { %v405_v20 = vmul.f32 %v5506_v21, %v8808_v33 }
 0x1c9   :  { %v6039_v25 = vadd.f32 %v704_v31, %v622_v22 }
 0x1cb   :  { %v53_v16 = vpop.permute.xlu1 %52 }
 0x1cc   :  { %v127_v45 = vmul.f32 %v5482_v3, %v53_v16  ;;  %4786 = vperm.xlu0 %5068, %v4712_v52  }
 0x1ce   :  { %v225_v47 = vadd.f32 %v209_v62, %v127_v45  ;;  %v832_v45 = vld [vmem:[%s8717_s2 + $0x20] sm:$0xff] }
 0x1cf   :  { %5063 = vset.pattern.permute.xlu1 %v8774_v17  ;;  %5064 = vset.pattern.permute.xlu2 %v8786_v23 }
 0x1d0   :  { %540 = vperm.xlu1 %5063, %v5993_v15   ;;  %v892_v10 = vpop.permute.xlu2 %891  ;;  %642 = vperm.xlu2 %5064, %v5651_v26  }
 0x1d1   :  { %v933_v43 = vadd.f32 %v892_v10, %v8807_v1 }
 0x1d3   :  { %v949_v59 = vmax.f32 %v933_v43, 0.0 }
 0x1d4   :  { %v251_v54 = vpop.permute.xlu1 %250 }
 0x1d5   :  { %v6051_v11 = vand.u32 4294901760, %v949_v59  ;;  %v308_v30 = vmul.f32 %v5501_v2, %v251_v54  ;;  %v48_v54 = vpop.permute.xlu0 %47 }
 0x1d7   :  { %v6058_v19 = vsub.f32 %v949_v59, %v6051_v11  ;;  %v6061_v41 = vadd.f32 %v308_v30, %v5978_v7  ;;  %1081 = vmatpush.msra.mxu0 %v6051_v11  ;;  %1532 = vmatpush.msra.mxu3 %v6051_v11  ;;  %v8809_v59 = vld [vmem:[#allocation26_spill] sm:$0xff]  ;;  %v126_v30 = vmul.f32 %v5482_v3, %v48_v54 }
 0x1d8   :  { %5066 = vset.pattern.permute.xlu1 %v8766_v51  ;;  %5067 = vset.pattern.permute.xlu2 %v8774_v17 }
 0x1d9   :  { %871 = vperm.xlu1 %5066, %v833_v24   ;;  %1410 = vmatpush.msra.mxu2 %v6058_v19  ;;  %v247_v58 = vpop.permute.xlu2 %246  ;;  %v1267_v35 = vand.u32 4294901760, %v6058_v19  ;;  %v8810_v24 = vld [vmem:[#allocation18_spill] sm:$0xff] }
 0x1da   :  { %v307_v7 = vmul.f32 %v5501_v2, %v247_v58  ;;  %536 = vperm.xlu2 %5067, %v8793_v32   ;;  %v8811_v58 = vld [vmem:[#allocation34_spill] sm:$0xff] }
 0x1db   :  { %v1268_v50 = vsub.f32 %v6058_v19, %v1267_v35 }
 0x1dc   :  { %v323_v22 = vadd.f32 %v307_v7, %v225_v47  ;;  %v411_v7 = vmul.f32 %v5506_v21, %v5747_v28 }
 0x1dd   :  { %v557_v31 = vpop.permute.xlu1 %556  ;;  %v1269_v17 = vand.u32 4294901760, %v1268_v50 }
 0x1de   :  { %v605_v52 = vmul.f32 %v5524_v4, %v557_v31  ;;  %v6077_v62 = vadd.f32 %v405_v20, %v323_v22 }
 0x1df   :  { %1270 = vmatpush.msra.mxu1 %v1269_v17  ;;  %v607_v17 = vmul.f32 %v5524_v4, %v5921_v61 }
 0x1e0   :  { %v6080_v16 = vadd.f32 %v605_v52, %v6010_v9 }
 0x1e1   :  { %5069 = vset.pattern.permute.xlu1 %v8778_v39 }
 0x1e2   :  { %5070 = vset.pattern.permute.xlu2 %v8766_v51  ;;  %740 = vperm.xlu1 %5069, %v5651_v26   ;;  %v451_v47 = vpop.permute.xlu2 %450  ;;  %v215_v26 = vmul.f32 %v5487_v13, %v8809_v59  ;;  %v8813_v59 = vld [vmem:[#allocation13_spill] sm:$0xff] }
 0x1e3   :  { %v505_v10 = vmul.f32 %v5516_v56, %v451_v47  ;;  %866 = vperm.xlu2 %5070, %v832_v45   ;;  %v8812_v45 = vld [vmem:[#allocation7_spill] sm:$0xff] }
 0x1e5   :  { %v6090_v1 = vadd.f32 %v505_v10, %v6021_v18  ;;  %v133_v18 = vmul.f32 %v5482_v3, %v8810_v24  ;;  %v509_v3 = vmul.f32 %v5516_v56, %v5845_v63  ;;  %v705_v56 = vmul.f32 %v5601_v8, %v6028_v6  ;;  %v5087_v63 = vld [vmem:[%s8715_s0 + $0x1] ss:$0 sm:$0xff]  ;;  %v6137_v6 = vld [vmem:[%s8715_s0 + $0x3] ss:$0 sm:$0xff]  ;;  %v829_v24 = vld [vmem:[%s8717_s2 + $0x8] sm:$0xff] }
 0x1e6   :  { %v216_v47 = vmul.f32 %v5087_v63, %v8812_v45  ;;  %v706_v45 = vmul.f32 %v5601_v8, %v5862_v29  ;;  %v983_v29 = vld [vmem:[%s8719_s4 + $0x58] sm:$0xff] }
 0x1e7   :  { %v761_v43 = vpop.permute.xlu1 %760 }
 0x1e8   :  { %v803_v61 = vmul.f32 %v5606_v5, %v761_v43  ;;  %v8814_v43 = vld [vmem:[#allocation20_spill] sm:$0xff] }
 0x1ea   :  { %5071 = vset.pattern.permute.xlu1 %v8786_v23  ;;  %v313_v23 = vmul.f32 %v5501_v2, %v8811_v58 }
 0x1eb   :  { %5072 = vset.pattern.permute.xlu2 %v8778_v39  ;;  %634 = vperm.xlu1 %5071, %v8793_v32   ;;  %v6095_v9 = vpop.permute.xlu2 %756  ;;  %v231_v32 = vadd.f32 %v215_v26, %v133_v18  ;;  %v5090_v18 = vld [vmem:[%s8715_s0 + $0x2] ss:$0 sm:$0xff] }
 0x1ec   :  { %736 = vperm.xlu2 %5072, %v5993_v15   ;;  %v830_v15 = vld [vmem:[%s8717_s2 + $0x10] sm:$0xff]  ;;  %v314_v58 = vmul.f32 %v5090_v18, %v8814_v43 }
 0x1ed   :  { %v329_v22 = vadd.f32 %v313_v23, %v231_v32 }
 0x1ef   :  { %v427_v28 = vadd.f32 %v411_v7, %v329_v22  ;;  %v8815_v7 = vld [vmem:[#allocation29_spill] sm:$0xff] }
 0x1f0   :  { %v145_v33 = vpop.permute.xlu1 %144 }
 0x1f1   :  { %v208_v20 = vmul.f32 %v5487_v13, %v145_v33  ;;  %v5086_v13 = vld [vmem:[%s8716_s1] sm:$0xff]  ;;  %v525_v52 = vadd.f32 %v509_v3, %v427_v28 }
 0x1f2   :  { %v6159_v3 = vld [vmem:[%s8715_s0 + $0x4] ss:$0 sm:$0xff] }
 0x1f3   :  { %v224_v50 = vadd.f32 %v208_v20, %v126_v30  ;;  %5073 = vset.pattern.permute.xlu1 %v8778_v39  ;;  %v623_v4 = vadd.f32 %v607_v17, %v525_v52  ;;  %v828_v30 = vld [vmem:[%s8717_s2] sm:$0xff]  ;;  %v985_v52 = vld [vmem:[%s8719_s4 + $0x68] sm:$0xff]  ;;  %s5129_s2 = smov [#allocation3]  }
 0x1f4   :  { %5074 = vset.pattern.permute.xlu2 %v8766_v51  ;;  %732 = vperm.xlu1 %5073, %v5086_v13   ;;  %v243_v31 = vpop.permute.xlu2 %242  ;;  %v882_v13 = vpop.permute.xlu0 %881  ;;  %s4840_s10 = sshll.u32 %s5129_s2, 4  ;;  %s4841_s10 = int_to_ptr.vmem [resolvable:$true] %s4840_s10 }
 0x1f5   :  { %856 = vperm.xlu2 %5074, %v830_v15   ;;  %v306_v21 = vmul.f32 %v5501_v2, %v243_v31  ;;  %v5088_v2 = vld [vmem:[%s8715_s0] ss:$0 sm:$0xff]  ;;  %v721_v23 = vadd.f32 %v705_v56, %v623_v4  ;;  %v412_v15 = vmul.f32 %v6137_v6, %v8815_v7 }
 0x1f6   :  { %v134_v26 = vmul.f32 %v5088_v2, %v8813_v59 }
 0x1f7   :  { %v6121_v39 = vadd.f32 %v306_v21, %v224_v50  ;;  %v819_v50 = vadd.f32 %v803_v61, %v721_v23  ;;  %v979_v23 = vld [vmem:[%s8719_s4 + $0x38] sm:$0xff] }
 0x1f8   :  { %v232_v32 = vadd.f32 %v216_v47, %v134_v26 }
 0x1f9   :  { %v349_v10 = vpop.permute.xlu1 %348  ;;  %v931_v28 = vadd.f32 %v882_v13, %v819_v50 }
 0x1fa   :  { %v406_v54 = vmul.f32 %v6137_v6, %v349_v10  ;;  %v330_v22 = vadd.f32 %v314_v58, %v232_v32  ;;  %v804_v10 = vmul.f32 %v5606_v5, %v5951_v57  ;;  %v980_v32 = vld [vmem:[%s8719_s4 + $0x40] sm:$0xff] }
 0x1fb   :  { %v947_v2 = vmax.f32 %v931_v28, 0.0 }
 0x1fc   :  { %v6151_v33 = vadd.f32 %v406_v54, %v6061_v41  ;;  %5075 = vset.pattern.permute.xlu1 %v8766_v51  ;;  %v510_v41 = vmul.f32 %v6159_v3, %v5682_v38  ;;  %v428_v31 = vadd.f32 %v412_v15, %v330_v22  ;;  %v6166_v51 = vld [vmem:[%s8715_s0 + $0x5] ss:$0 sm:$0xff]  ;;  %v986_v38 = vld [vmem:[%s8719_s4 + $0x70] sm:$0xff] }
 0x1fd   :  { %846 = vperm.xlu2 %5074, %v828_v30   ;;  %851 = vperm.xlu1 %5075, %v829_v24   ;;  %v549_v20 = vpop.permute.xlu2 %548  ;;  %v608_v21 = vmul.f32 %v6166_v51, %v5794_v36  ;;  %v6186_v4 = vand.u32 4294901760, %v947_v2 }
 0x1fe   :  { %v526_v63 = vadd.f32 %v510_v41, %v428_v31  ;;  %v603_v50 = vmul.f32 %v6166_v51, %v549_v20  ;;  %v6233_v20 = vld [vmem:[%s8715_s0 + $0x6] ss:$0 sm:$0xff] }
 0x1ff   :  { %v6195_v57 = vsub.f32 %v947_v2, %v6186_v4 }
 0x200   :  { %v624_v36 = vadd.f32 %v608_v21, %v526_v63  ;;  %v619_v21 = vadd.f32 %v603_v50, %v6090_v1  ;;  %v6245_v1 = vld [vmem:[%s8715_s0 + $0x7] ss:$0 sm:$0xff]  ;;  %v4878_v50 = vld [vmem:[%s8719_s4 + $0xd8] sm:$0xff] }
 0x201   :  { %v1279_v7 = vand.u32 4294901760, %v6195_v57 }
 0x202   :  { %v655_v17 = vpop.permute.xlu1 %654  ;;  %v722_v26 = vadd.f32 %v706_v45, %v624_v36 }
 0x203   :  { %v703_v56 = vmul.f32 %v5601_v8, %v655_v17  ;;  %v982_v8 = vld [vmem:[%s8719_s4 + $0x50] sm:$0xff]  ;;  %v1280_v41 = vsub.f32 %v6195_v57, %v1279_v7  ;;  %v976_v17 = vld [vmem:[%s8719_s4 + $0x20] sm:$0xff] }
 0x204   :  { %v820_v61 = vadd.f32 %v804_v10, %v722_v26  ;;  %v8817_v26 = vld [vmem:[#allocation23_spill] sm:$0xff] }
 0x205   :  { %v6180_v47 = vadd.f32 %v703_v56, %v6080_v16  ;;  %1055 = vperm.xlu2 %5074, %v985_v52   ;;  %1060 = vperm.xlu1 %5075, %v986_v38   ;;  %v977_v52 = vld [vmem:[%s8719_s4 + $0x28] sm:$0xff]  ;;  %v1281_v38 = vand.u32 4294901760, %v1280_v41  ;;  %v8816_v56 = vld [vmem:[#allocation25_spill] sm:$0xff]  ;;  %v802_v41 = vmul.f32 %v6245_v1, %v6095_v9 }
 0x206   :  { %v6184_v59 = vpop.permute.xlu2 %752  ;;  %v799_v63 = vmul.f32 %v6245_v1, %v8816_v56 }
 0x20b   :  { %v887_v16 = vpop.permute.xlu1 %886 }
 0x20c   :  { %v932_v54 = vadd.f32 %v887_v16, %v820_v61  ;;  %v800_v61 = vmul.f32 %v6245_v1, %v8817_v26  ;;  %v973_v16 = vld [vmem:[%s8719_s4 + $0x8] sm:$0xff] }
 0x20d   :  { %1040 = vperm.xlu2 %5074, %v982_v8   ;;  %1045 = vperm.xlu1 %5075, %v983_v29  }
 0x20e   :  { %v948_v5 = vmax.f32 %v932_v54, 0.0  ;;  %v974_v54 = vld [vmem:[%s8719_s4 + $0x10] sm:$0xff] }
 0x20f   :  { %v443_v30 = vpop.permute.xlu2 %442 }
 0x210   :  { %v6197_v24 = vand.u32 4294901760, %v948_v5  ;;  %v503_v18 = vmul.f32 %v6159_v3, %v443_v30 }
 0x212   :  { %v6201_v43 = vsub.f32 %v948_v5, %v6197_v24  ;;  %v6204_v58 = vadd.f32 %v503_v18, %v6077_v62  ;;  %1083 = vmatpush.msra.mxu0 %v6197_v24  ;;  %1534 = vmatpush.msra.mxu3 %v6197_v24  ;;  %v4881_v18 = vld [vmem:[%s8719_s4 + $0xf0] sm:$0xff] }
 0x214   :  { %1085 = vmatpush.msra.mxu0 %v6186_v4  ;;  %1413 = vmatpush.msra.mxu2 %v6201_v43  ;;  %v6217_v62 = vpop.permute.xlu1 %446  ;;  %v1273_v15 = vand.u32 4294901760, %v6201_v43 }
 0x215   :  { %1025 = vperm.xlu2 %5074, %v979_v23   ;;  %1030 = vperm.xlu1 %5075, %v980_v32  }
 0x216   :  { %1536 = vmatpush.msra.mxu3 %v6186_v4  ;;  %1416 = vmatpush.msra.mxu2 %v6195_v57  ;;  %v1274_v22 = vsub.f32 %v6201_v43, %v1273_v15  ;;  %v4939_v57 = vld [vmem:[%s8719_s4 + $0x1c0] sm:$0xff] }
 0x218   :  { %v647_v13 = vpop.permute.xlu2 %646  ;;  %v1275_v31 = vand.u32 4294901760, %v1274_v22  ;;  %v4879_v22 = vld [vmem:[%s8719_s4 + $0xe0] sm:$0xff] }
 0x219   :  { %v701_v28 = vmul.f32 %v6233_v20, %v647_v13 }
 0x21a   :  { %1276 = vmatpush.msra.mxu1 %v1275_v31  ;;  %v818_v31 = vadd.f32 %v802_v41, %v6039_v25 }
 0x21b   :  { %v717_v45 = vadd.f32 %v701_v28, %v619_v21 }
 0x21c   :  { %1282 = vmatpush.msra.mxu1 %v1281_v38 }
 0x21d   :  { %v815_v36 = vadd.f32 %v799_v63, %v717_v45  ;;  %1010 = vperm.xlu2 %5074, %v976_v17   ;;  %1015 = vperm.xlu1 %5075, %v977_v52   ;;  %v651_v10 = vpop.permute.xlu1 %650  ;;  %v4875_v17 = vld [vmem:[%s8719_s4 + $0xc0] sm:$0xff]  ;;  %v4876_v52 = vld [vmem:[%s8719_s4 + $0xc8] sm:$0xff] }
 0x21e   :  { %v702_v2 = vmul.f32 %v6233_v20, %v651_v10  ;;  %v4872_v10 = vld [vmem:[%s8719_s4 + $0xa8] sm:$0xff] }
 0x220   :  { %v718_v8 = vadd.f32 %v702_v2, %v5774_v37  ;;  %v4882_v37 = vld [vmem:[%s8719_s4 + $0xf8] sm:$0xff]  ;;  %v4873_v2 = vld [vmem:[%s8719_s4 + $0xb0] sm:$0xff] }
 0x221   :  { %v6253_v29 = vpop.permute.xlu2 %438 }
 0x222   :  { %v816_v5 = vadd.f32 %v800_v61, %v718_v8  ;;  %v862_v61 = vpop.permute.xlu0 %861 }
 0x225   :  { %995 = vperm.xlu2 %5074, %v973_v16   ;;  %1000 = vperm.xlu1 %5075, %v974_v54   ;;  %v927_v16 = vadd.f32 %v862_v61, %v815_v36 }
 0x227   :  { %v6261_v30 = vpop.permute.xlu1 %340 }
 0x22a   :  { %v643_v23 = vpop.permute.xlu2 %642 }
 0x22d   :  { %1996 = vperm.xlu2 %5074, %v4881_v18   ;;  %2001 = vperm.xlu1 %5075, %v4882_v37  }
 0x230   :  { %v545_v32 = vpop.permute.xlu1 %544 }
 0x234   :  { %v6277_v13 = vpop.permute.xlu2 %536 }
 0x235   :  { %1981 = vperm.xlu2 %5074, %v4878_v50   ;;  %1986 = vperm.xlu1 %5075, %v4879_v22   ;;  %v801_v50 = vmul.f32 %v6245_v1, %v6184_v59  ;;  %v504_v59 = vmul.f32 %v6159_v3, %v6217_v62 }
 0x239   :  { %v877_v21 = vpop.permute.xlu1 %876 }
 0x23a   :  { %v930_v28 = vadd.f32 %v877_v21, %v818_v31  ;;  %v943_v21 = vmax.f32 %v927_v16, 0.0 }
 0x23c   :  { %v946_v38 = vmax.f32 %v930_v28, 0.0  ;;  %v817_v28 = vadd.f32 %v801_v50, %v6180_v47 }
 0x23d   :  { %1966 = vperm.xlu2 %5074, %v4875_v17   ;;  %1971 = vperm.xlu1 %5075, %v4876_v52   ;;  %v867_v56 = vpop.permute.xlu2 %866  ;;  %v4869_v17 = vld [vmem:[%s8719_s4 + $0x90] sm:$0xff] }
 0x23e   :  { %v6286_v9 = vand.u32 4294901760, %v946_v38  ;;  %v928_v25 = vadd.f32 %v867_v56, %v816_v5  ;;  %v8818_v5 = vld [vmem:[#allocation33_spill] sm:$0xff]  ;;  %v6323_v56 = vand.u32 4294901760, %v943_v21 }
 0x23f   :  { %v699_v18 = vmul.f32 %v6233_v20, %v8818_v5  ;;  %v4867_v5 = vld [vmem:[%s8719_s4 + $0x80] sm:$0xff] }
 0x240   :  { %v6289_v63 = vsub.f32 %v946_v38, %v6286_v9  ;;  %1087 = vmatpush.msra.mxu0 %v6286_v9  ;;  %1538 = vmatpush.msra.mxu3 %v6286_v9  ;;  %v944_v22 = vmax.f32 %v928_v25, 0.0  ;;  %v602_v25 = vmul.f32 %v6166_v51, %v545_v32  ;;  %v6335_v62 = vsub.f32 %v943_v21, %v6323_v56 }
 0x242   :  { %1419 = vmatpush.msra.mxu2 %v6289_v63  ;;  %v541_v45 = vpop.permute.xlu1 %540  ;;  %v1285_v26 = vand.u32 4294901760, %v6289_v63  ;;  %v6312_v36 = vand.u32 4294901760, %v944_v22 }
 0x243   :  { %v601_v8 = vmul.f32 %v6166_v51, %v541_v45 }
 0x244   :  { %v1286_v54 = vsub.f32 %v6289_v63, %v1285_v26  ;;  %v6327_v47 = vsub.f32 %v944_v22, %v6312_v36  ;;  %v4942_v63 = vld [vmem:[%s8719_s4 + $0x1d8] sm:$0xff] }
 0x245   :  { %v617_v37 = vadd.f32 %v601_v8, %v6204_v58  ;;  %1951 = vperm.xlu2 %5074, %v4872_v10   ;;  %1956 = vperm.xlu1 %5075, %v4873_v2   ;;  %v4870_v58 = vld [vmem:[%s8719_s4 + $0x98] sm:$0xff]  ;;  %v520_v2 = vadd.f32 %v504_v59, %v6151_v33  ;;  %v700_v8 = vmul.f32 %v6233_v20, %v643_v23 }
 0x246   :  { %v1287_v41 = vand.u32 4294901760, %v1286_v54  ;;  %v6329_v45 = vpop.permute.xlu2 %736  ;;  %v4914_v54 = vld [vmem:[%s8719_s4 + $0x178] sm:$0xff]  ;;  %v1297_v33 = vand.u32 4294901760, %v6327_v47 }
 0x247   :  { %v6310_v31 = vadd.f32 %v699_v18, %v617_v37  ;;  %v618_v16 = vadd.f32 %v602_v25, %v520_v2  ;;  %v1303_v37 = vand.u32 4294901760, %v6335_v62  ;;  %v4911_v25 = vld [vmem:[%s8719_s4 + $0x160] sm:$0xff] }
 0x248   :  { %1288 = vmatpush.msra.mxu1 %v1287_v41  ;;  %v1298_v21 = vsub.f32 %v6327_v47, %v1297_v33 }
 0x249   :  { %v716_v50 = vadd.f32 %v700_v8, %v618_v16  ;;  %v1304_v59 = vsub.f32 %v6335_v62, %v1303_v37  ;;  %v4912_v8 = vld [vmem:[%s8719_s4 + $0x168] sm:$0xff] }
 0x24b   :  { %v872_v52 = vpop.permute.xlu1 %871  ;;  %v1305_v16 = vand.u32 4294901760, %v1304_v59 }
 0x24c   :  { %v929_v38 = vadd.f32 %v872_v52, %v817_v28 }
 0x24d   :  { %1936 = vperm.xlu2 %5074, %v4869_v17   ;;  %1941 = vperm.xlu1 %5075, %v4870_v58  }
 0x24e   :  { %v945_v10 = vmax.f32 %v929_v38, 0.0  ;;  %v1299_v38 = vand.u32 4294901760, %v1298_v21  ;;  %v4909_v21 = vld [vmem:[%s8719_s4 + $0x150] sm:$0xff] }
 0x24f   :  { %v857_v17 = vpop.permute.xlu2 %856 }
 0x250   :  { %v6332_v61 = vand.u32 4294901760, %v945_v10 }
 0x252   :  { %v6339_v32 = vsub.f32 %v945_v10, %v6332_v61  ;;  %1089 = vmatpush.msra.mxu0 %v6332_v61  ;;  %1540 = vmatpush.msra.mxu3 %v6332_v61  ;;  %v404_v10 = vmul.f32 %v6137_v6, %v6261_v30  ;;  %v600_v30 = vmul.f32 %v6166_v51, %v6277_v13 }
 0x254   :  { %1091 = vmatpush.msra.mxu0 %v6312_v36  ;;  %1422 = vmatpush.msra.mxu2 %v6339_v32  ;;  %v741_v23 = vpop.permute.xlu1 %740  ;;  %v1291_v18 = vand.u32 4294901760, %v6339_v32 }
 0x255   :  { %1542 = vmatpush.msra.mxu3 %v6312_v36  ;;  %v798_v22 = vmul.f32 %v6245_v1, %v741_v23  ;;  %2937 = vperm.xlu2 %5074, %v4914_v54   ;;  %v502_v23 = vmul.f32 %v6159_v3, %v6253_v29  ;;  %v4908_v3 = vld [vmem:[%s8719_s4 + $0x148] sm:$0xff] }
 0x256   :  { %1926 = vperm.xlu1 %5075, %v4867_v5   ;;  %1093 = vmatpush.msra.mxu0 %v6323_v56  ;;  %v1292_v41 = vsub.f32 %v6339_v32, %v1291_v18 }
 0x257   :  { %v814_v28 = vadd.f32 %v798_v22, %v716_v50  ;;  %1425 = vmatpush.msra.mxu2 %v6327_v47  ;;  %1544 = vmatpush.msra.mxu3 %v6323_v56  ;;  %v420_v50 = vadd.f32 %v404_v10, %v6121_v39  ;;  %v956_v39 = vld [vmem:[%s8718_s3] sm:$0xff]  ;;  %v847_v10 = vpop.permute.xlu2 %846 }
 0x258   :  { %v1293_v58 = vand.u32 4294901760, %v1292_v41 }
 0x259   :  { %v926_v52 = vadd.f32 %v857_v17, %v814_v28  ;;  %1428 = vmatpush.msra.mxu2 %v6335_v62  ;;  %v518_v29 = vadd.f32 %v502_v23, %v420_v50  ;;  %v6404_v17 = vand.u32 4294901760, %v956_v39 }
 0x25a   :  { %1294 = vmatpush.msra.mxu1 %v1293_v58 }
 0x25b   :  { %v942_v2 = vmax.f32 %v926_v52, 0.0  ;;  %v616_v13 = vadd.f32 %v600_v30, %v518_v29 }
 0x25c   :  { %1300 = vmatpush.msra.mxu1 %v1299_v38  ;;  %v1101_v38 = vsub.f32 %v956_v39, %v6404_v17 }
 0x25d   :  { %v6377_v54 = vand.u32 4294901760, %v942_v2  ;;  %2922 = vperm.xlu2 %5074, %v4911_v25   ;;  %v635_v5 = vpop.permute.xlu1 %634  ;;  %v797_v25 = vmul.f32 %v6245_v1, %v6329_v45 }
 0x25e   :  { %2927 = vperm.xlu1 %5075, %v4912_v8   ;;  %1306 = vmatpush.msra.mxu1 %v1305_v16  ;;  %v698_v41 = vmul.f32 %v6233_v20, %v635_v5  ;;  %v957_v8 = vld [vmem:[%s8718_s3 + $0x8] sm:$0xff]  ;;  %v4906_v5 = vld [vmem:[%s8719_s4 + $0x138] sm:$0xff]  ;;  %v1102_v50 = vand.u32 4294901760, %v1101_v38 }
 0x25f   :  { %1095 = vmatpush.msra.mxu0 %v6377_v54  ;;  %1546 = vmatpush.msra.mxu3 %v6377_v54  ;;  %v6385_v6 = vsub.f32 %v942_v2, %v6377_v54  ;;  %v4905_v2 = vld [vmem:[%s8719_s4 + $0x130] sm:$0xff]  ;;  %v6419_v30 = vand.u32 4294901760, %v957_v8 }
 0x260   :  { %v714_v59 = vadd.f32 %v698_v41, %v616_v13  ;;  %v1103_v29 = vsub.f32 %v1101_v38, %v1102_v50  ;;  %v958_v13 = vld [vmem:[%s8718_s3 + $0x10] sm:$0xff] }
 0x261   :  { %1431 = vmatpush.msra.mxu2 %v6385_v6  ;;  %v1309_v22 = vand.u32 4294901760, %v6385_v6  ;;  %v1109_v41 = vsub.f32 %v957_v8, %v6419_v30 }
 0x263   :  { %v1310_v51 = vsub.f32 %v6385_v6, %v1309_v22 }
 0x265   :  { %2907 = vperm.xlu2 %5074, %v4908_v3   ;;  %v1311_v28 = vand.u32 4294901760, %v1310_v51  ;;  %v4902_v51 = vld [vmem:[%s8719_s4 + $0x118] sm:$0xff] }
 0x266   :  { %2912 = vperm.xlu1 %5075, %v4909_v21   ;;  %v733_v58 = vpop.permute.xlu1 %732 }
 0x267   :  { %v796_v52 = vmul.f32 %v6245_v1, %v733_v58  ;;  %1312 = vmatpush.msra.mxu1 %v1311_v28  ;;  %v813_v1 = vadd.f32 %v797_v25, %v6310_v31  ;;  %v4903_v31 = vld [vmem:[%s8719_s4 + $0x120] sm:$0xff] }
 0x269   :  { %v812_v20 = vadd.f32 %v796_v52, %v714_v59  ;;  %v1104_v59 = vand.u32 4294901760, %v1103_v29  ;;  %v1110_v52 = vand.u32 4294901760, %v1109_v41  ;;  %v8820_v29 = vand.u32 4294901760, %v5702_v55 }
 0x26b   :  { %v924_v16 = vadd.f32 %v847_v10, %v812_v20  ;;  %v6439_v20 = vand.u32 4294901760, %v958_v13  ;;  %v1111_v8 = vsub.f32 %v1109_v41, %v1110_v52 }
 0x26d   :  { %v940_v23 = vmax.f32 %v924_v16, 0.0  ;;  %2892 = vperm.xlu2 %5074, %v4905_v2   ;;  %v1117_v16 = vsub.f32 %v958_v13, %v6439_v20 }
 0x26e   :  { %2897 = vperm.xlu1 %5075, %v4906_v5   ;;  %v8819_v5 = vand.u32 4294901760, %v5709_v49 }
 0x26f   :  { %v6422_v45 = vand.u32 4294901760, %v940_v23  ;;  %v852_v3 = vpop.permute.xlu1 %851  ;;  %v1118_v13 = vand.u32 4294901760, %v1117_v16 }
 0x270   :  { %v925_v39 = vadd.f32 %v852_v3, %v813_v1  ;;  %v959_v3 = vld [vmem:[%s8718_s3 + $0x18] sm:$0xff] }
 0x271   :  { %v6435_v28 = vsub.f32 %v940_v23, %v6422_v45  ;;  %v4899_v23 = vld [vmem:[%s8719_s4 + $0x100] sm:$0xff] }
 0x272   :  { %v941_v21 = vmax.f32 %v925_v39, 0.0  ;;  %v4900_v39 = vld [vmem:[%s8719_s4 + $0x108] sm:$0xff] }
 0x273   :  { %v1321_v10 = vand.u32 4294901760, %v6435_v28 }
 0x274   :  { %v6437_v58 = vand.u32 4294901760, %v941_v21 }
 0x275   :  { %2877 = vperm.xlu2 %5074, %v4902_v51   ;;  %v1322_v49 = vsub.f32 %v6435_v28, %v1321_v10  ;;  %v1112_v51 = vand.u32 4294901760, %v1111_v8  ;;  %v960_v8 = vld [vmem:[%s8718_s3 + $0x20] sm:$0xff] }
 0x276   :  { %v6442_v25 = vsub.f32 %v941_v21, %v6437_v58  ;;  %2882 = vperm.xlu1 %5075, %v4903_v31   ;;  %1097 = vmatpush.msra.mxu0 %v6437_v58  ;;  %v6472_v31 = vand.u32 4294901760, %v959_v3 }
 0x277   :  { %1548 = vmatpush.msra.mxu3 %v6437_v58 }
 0x278   :  { %1099 = vmatpush.msra.mxu0 %v6422_v45  ;;  %1434 = vmatpush.msra.mxu2 %v6442_v25  ;;  %v1315_v2 = vand.u32 4294901760, %v6442_v25  ;;  %v1125_v55 = vsub.f32 %v959_v3, %v6472_v31  ;;  %v4702_v3 = vld [vmem:[%s8720_s5 + $0x20] sm:$0xff] }
 0x279   :  { %1550 = vmatpush.msra.mxu3 %v6422_v45  ;;  %1105 = vmatmul.f32.vlgmr.msra.gmra.mxu0 %v1104_v59  ;;  %v8821_v59 = vand.u32 4294901760, %v5813_v12  ;;  %v4933_v12 = vld [vmem:[%s8719_s4 + $0x190] sm:$0xff] }
 0x27a   :  { %1651 = vmatpush.msrb.mxu0 %v8819_v5  ;;  %1437 = vmatpush.msra.mxu2 %v6435_v28  ;;  %v1316_v1 = vsub.f32 %v6442_v25, %v1315_v2  ;;  %v1119_v5 = vsub.f32 %v1117_v16, %v1118_v13  ;;  %v4699_v28 = vld [vmem:[%s8720_s5 + $0x8] sm:$0xff] }
 0x27b   :  { %1440 = vmatmul.f32.vlgmr.msra.gmra.mxu2 %v1101_v38  ;;  %1554 = vmatmul.f32.vlgmr.msra.gmra.mxu3 %v1102_v50  ;;  %v1323_v38 = vand.u32 4294901760, %v1322_v49  ;;  %v8822_v50 = vand.u32 4294901760, %v5830_v40  ;;  %v4932_v40 = vld [vmem:[%s8719_s4 + $0x188] sm:$0xff]  ;;  %v4701_v49 = vld [vmem:[%s8720_s5 + $0x18] sm:$0xff] }
 0x27c   :  { %1655 = vmatpush.msrb.mxu0 %v8820_v29  ;;  %v1317_v21 = vand.u32 4294901760, %v1316_v1  ;;  %v1120_v53 = vand.u32 4294901760, %v1119_v5  ;;  %v4704_v5 = vld [vmem:[%s8720_s5 + $0x30] sm:$0xff] }
 0x27d   :  { %2862 = vperm.xlu2 %5074, %v4899_v23   ;;  %v6495_v23 = vand.u32 4294901760, %v960_v8 }
 0x27e   :  { %2867 = vperm.xlu1 %5075, %v4900_v39   ;;  %1659 = vmatpush.msrb.mxu0 %v8821_v59  ;;  %v966_v39 = vld [vmem:[%s8718_s3 + $0x50] sm:$0xff] }
 0x27f   :  { %1318 = vmatpush.msra.mxu1 %v1317_v21 }
 0x280   :  { %1663 = vmatpush.msrb.mxu0 %v8822_v50  ;;  %v967_v50 = vld [vmem:[%s8718_s3 + $0x58] sm:$0xff] }
 0x281   :  { %1324 = vmatpush.msra.mxu1 %v1323_v38  ;;  %1113 = vmatmul.f32.gmra.mxu0 %v1112_v51  ;;  %v6607_v51 = vand.u32 4294901760, %v966_v39  ;;  %v4705_v38 = vld [vmem:[%s8720_s5 + $0x38] sm:$0xff] }
 0x282   :  { %1326 = vmatmul.f32.vlgmr.msra.gmra.mxu1 %v6404_v17  ;;  %1667 = vmatpush.msrb.mxu0 %v1255_v34  ;;  %v1126_v34 = vand.u32 4294901760, %v1125_v55 }
 0x283   :  { %1778 = vmatpush.msrb.mxu1 %v5706_v27  ;;  %1445 = vmatmul.f32.gmra.mxu2 %v1109_v41  ;;  %v1181_v59 = vsub.f32 %v966_v39, %v6607_v51 }
 0x284   :  { %1671 = vmatpush.msrb.mxu0 %v1261_v60  ;;  %1560 = vmatmul.f32.gmra.mxu3 %v1110_v52  ;;  %v1127_v27 = vsub.f32 %v1125_v55, %v1126_v34  ;;  %v4698_v52 = vld [vmem:[%s8720_s5] sm:$0xff] }
 0x285   :  { %1780 = vmatpush.msrb.mxu1 %v5692_v0  ;;  %3808 = vperm.xlu2 %5074, %v4933_v12   ;;  %v1133_v0 = vsub.f32 %v960_v8, %v6495_v23  ;;  %v1182_v12 = vand.u32 4294901760, %v1181_v59  ;;  %v6620_v8 = vand.u32 4294901760, %v967_v50 }
 0x286   :  { %3803 = vperm.xlu1 %5075, %v4932_v40   ;;  %1675 = vmatpush.msrb.mxu0 %v1267_v35  ;;  %v1128_v60 = vand.u32 4294901760, %v1127_v27  ;;  %v968_v27 = vld [vmem:[%s8718_s3 + $0x60] sm:$0xff] }
 0x287   :  { %1782 = vmatpush.msrb.mxu1 %v5807_v42  ;;  %v961_v42 = vld [vmem:[%s8718_s3 + $0x28] sm:$0xff]  ;;  %v1134_v19 = vand.u32 4294901760, %v1133_v0  ;;  %v1183_v40 = vsub.f32 %v1181_v59, %v1182_v12 }
 0x288   :  { %1679 = vmatpush.msrb.mxu0 %v1273_v15  ;;  %v6520_v35 = vand.u32 4294901760, %v961_v42 }
 0x289   :  { %1784 = vmatpush.msrb.mxu1 %v5819_v14  ;;  %1121 = vmatmul.f32.gmra.mxu0 %v1120_v53  ;;  %v4935_v14 = vld [vmem:[%s8719_s4 + $0x1a0] sm:$0xff]  ;;  %v1189_v53 = vsub.f32 %v967_v50, %v6620_v8 }
 0x28a   :  { %1330 = vmatmul.f32.gmra.mxu1 %v6419_v30  ;;  %1683 = vmatpush.msrb.mxu0 %v1279_v7 }
 0x28b   :  { %1786 = vmatpush.msrb.mxu1 %v5945_v46  ;;  %1450 = vmatmul.f32.gmra.mxu2 %v1117_v16  ;;  %v1135_v46 = vsub.f32 %v1133_v0, %v1134_v19 }
 0x28c   :  { %1687 = vmatpush.msrb.mxu0 %v1285_v26  ;;  %1566 = vmatmul.f32.gmra.mxu3 %v1118_v13  ;;  %v963_v26 = vld [vmem:[%s8718_s3 + $0x38] sm:$0xff] }
 0x28d   :  { %1788 = vmatpush.msrb.mxu1 %v5936_v48  ;;  %3823 = vperm.xlu2 %5074, %v4936_v44   ;;  %v1141_v48 = vsub.f32 %v961_v42, %v6520_v35  ;;  %v1136_v43 = vand.u32 4294901760, %v1135_v46  ;;  %v6566_v62 = vand.u32 4294901760, %v963_v26  ;;  %v1184_v44 = vand.u32 4294901760, %v1183_v40  ;;  %v4711_v46 = vld [vmem:[%s8720_s5 + $0x68] sm:$0xff] }
 0x28e   :  { %3818 = vperm.xlu1 %5075, %v4935_v14   ;;  %1691 = vmatpush.msrb.mxu0 %v1291_v18  ;;  %v964_v18 = vld [vmem:[%s8718_s3 + $0x40] sm:$0xff]  ;;  %v1190_v42 = vand.u32 4294901760, %v1189_v53  ;;  %v6633_v14 = vand.u32 4294901760, %v968_v27 }
 0x28f   :  { %1790 = vmatpush.msrb.mxu1 %v6051_v11  ;;  %v962_v11 = vld [vmem:[%s8718_s3 + $0x30] sm:$0xff]  ;;  %v1142_v7 = vand.u32 4294901760, %v1141_v48  ;;  %v1157_v32 = vsub.f32 %v963_v26, %v6566_v62 }
 0x290   :  { %1695 = vmatpush.msrb.mxu0 %v1297_v33  ;;  %v6545_v15 = vand.u32 4294901760, %v962_v11  ;;  %v4945_v33 = vld [vmem:[%s8719_s4 + $0x1f0] sm:$0xff] }
 0x291   :  { %1792 = vmatpush.msrb.mxu1 %v6197_v24  ;;  %1129 = vmatmul.f32.gmra.mxu0 %v1128_v60  ;;  %v4938_v24 = vld [vmem:[%s8719_s4 + $0x1b8] sm:$0xff]  ;;  %v1158_v6 = vand.u32 4294901760, %v1157_v32  ;;  %v1191_v60 = vsub.f32 %v1189_v53, %v1190_v42 }
 0x292   :  { %1334 = vmatmul.f32.gmra.mxu1 %v6439_v20  ;;  %1699 = vmatpush.msrb.mxu0 %v1303_v37  ;;  %v4944_v37 = vld [vmem:[%s8719_s4 + $0x1e8] sm:$0xff] }
 0x293   :  { %1794 = vmatpush.msrb.mxu1 %v6186_v4  ;;  %1455 = vmatmul.f32.gmra.mxu2 %v1125_v55  ;;  %v1143_v4 = vsub.f32 %v1141_v48, %v1142_v7 }
 0x294   :  { %1703 = vmatpush.msrb.mxu0 %v1309_v22  ;;  %1572 = vmatmul.f32.gmra.mxu3 %v1126_v34  ;;  %v6581_v22 = vand.u32 4294901760, %v964_v18  ;;  %v4708_v34 = vld [vmem:[%s8720_s5 + $0x50] sm:$0xff] }
 0x295   :  { %1796 = vmatpush.msrb.mxu1 %v6286_v9  ;;  %3838 = vperm.xlu2 %5074, %v4939_v57   ;;  %v1149_v9 = vsub.f32 %v962_v11, %v6545_v15  ;;  %v1144_v47 = vand.u32 4294901760, %v1143_v4  ;;  %v4710_v57 = vld [vmem:[%s8720_s5 + $0x60] sm:$0xff]  ;;  %v1192_v11 = vand.u32 4294901760, %v1191_v60 }
 0x296   :  { %3833 = vperm.xlu1 %5075, %v4938_v24   ;;  %1707 = vmatpush.msrb.mxu0 %v1315_v2  ;;  %v1165_v41 = vsub.f32 %v964_v18, %v6581_v22 }
 0x297   :  { %1798 = vmatpush.msrb.mxu1 %v6332_v61  ;;  %v1150_v61 = vand.u32 4294901760, %v1149_v9 }
 0x298   :  { %1711 = vmatpush.msrb.mxu0 %v1321_v10  ;;  %v1166_v10 = vand.u32 4294901760, %v1165_v41 }
 0x299   :  { %1800 = vmatpush.msrb.mxu1 %v6312_v36  ;;  %1137 = vmatmul.f32.gmra.mxu0 %v1136_v43  ;;  %v4941_v36 = vld [vmem:[%s8719_s4 + $0x1d0] sm:$0xff] }
 0x29a   :  { %1338 = vmatmul.f32.gmra.mxu1 %v6472_v31  ;;  %v1167_v16 = vsub.f32 %v1165_v41, %v1166_v10 }
 0x29b   :  { %1802 = vmatpush.msrb.mxu1 %v6323_v56  ;;  %1460 = vmatmul.f32.gmra.mxu2 %v1133_v0  ;;  %v1151_v56 = vsub.f32 %v1149_v9, %v1150_v61  ;;  %v4707_v0 = vld [vmem:[%s8720_s5 + $0x48] sm:$0xff] }
 0x29c   :  { %1578 = vmatmul.f32.gmra.mxu3 %v1134_v19  ;;  %v1168_v29 = vand.u32 4294901760, %v1167_v16  ;;  %v1197_v19 = vsub.f32 %v968_v27, %v6633_v14 }
 0x29d   :  { %1804 = vmatpush.msrb.mxu1 %v6377_v54  ;;  %3853 = vperm.xlu2 %5074, %v4942_v63   ;;  %v1152_v54 = vand.u32 4294901760, %v1151_v56  ;;  %v4713_v63 = vld [vmem:[%s8720_s5 + $0x78] sm:$0xff] }
 0x29e   :  { %3848 = vperm.xlu1 %5075, %v4941_v36   ;;  %v1198_v24 = vand.u32 4294901760, %v1197_v19 }
 0x29f   :  { %1806 = vmatpush.msrb.mxu1 %v6437_v58  ;;  %v965_v58 = vld [vmem:[%s8718_s3 + $0x48] sm:$0xff] }
 0x2a0   :  { %v6594_v2 = vand.u32 4294901760, %v965_v58 }
 0x2a1   :  { %1808 = vmatpush.msrb.mxu1 %v6422_v45  ;;  %1145 = vmatmul.f32.gmra.mxu0 %v1144_v47  ;;  %v1159_v45 = vsub.f32 %v1157_v32, %v1158_v6 }
 0x2a2   :  { %1342 = vmatmul.f32.gmra.mxu1 %v6495_v23  ;;  %v1173_v1 = vsub.f32 %v965_v58, %v6594_v2 }
 0x2a3   :  { %1465 = vmatmul.f32.gmra.mxu2 %v1141_v48  ;;  %v1160_v25 = vand.u32 4294901760, %v1159_v45  ;;  %v969_v48 = vld [vmem:[%s8718_s3 + $0x68] sm:$0xff] }
 0x2a4   :  { %1584 = vmatmul.f32.gmra.mxu3 %v1142_v7  ;;  %v1174_v21 = vand.u32 4294901760, %v1173_v1  ;;  %v6646_v43 = vand.u32 4294901760, %v969_v48  ;;  %v1199_v7 = vsub.f32 %v1197_v19, %v1198_v24 }
 0x2a5   :  { %3868 = vperm.xlu2 %5074, %v4945_v33  }
 0x2a6   :  { %3863 = vperm.xlu1 %5075, %v4944_v37   ;;  %v1175_v13 = vsub.f32 %v1173_v1, %v1174_v21  ;;  %v1205_v4 = vsub.f32 %v969_v48, %v6646_v43  ;;  %v1200_v26 = vand.u32 4294901760, %v1199_v7 }
 0x2a8   :  { %v1176_v55 = vand.u32 4294901760, %v1175_v13  ;;  %v1206_v36 = vand.u32 4294901760, %v1205_v4 }
 0x2a9   :  { %1153 = vmatmul.f32.gmra.mxu0 %v1152_v54 }
 0x2aa   :  { %1346 = vmatmul.f32.gmra.mxu1 %v6520_v35 }
 0x2ab   :  { %1470 = vmatmul.f32.gmra.mxu2 %v1149_v9  ;;  %v970_v9 = vld [vmem:[%s8718_s3 + $0x70] sm:$0xff] }
 0x2ac   :  { %1590 = vmatmul.f32.gmra.mxu3 %v1150_v61  ;;  %v6656_v47 = vand.u32 4294901760, %v970_v9  ;;  %v1207_v61 = vsub.f32 %v1205_v4, %v1206_v36 }
 0x2ad   :  { %4721 = vperm.xlu2 %5074, %v4699_v28  }
 0x2ae   :  { %4716 = vperm.xlu1 %5075, %v4698_v52   ;;  %v1213_v56 = vsub.f32 %v970_v9, %v6656_v47  ;;  %v1208_v33 = vand.u32 4294901760, %v1207_v61 }
 0x2b0   :  { %v1214_v18 = vand.u32 4294901760, %v1213_v56 }
 0x2b1   :  { %1161 = vmatmul.f32.gmra.mxu0 %v1160_v25 }
 0x2b2   :  { %1350 = vmatmul.f32.gmra.mxu1 %v6545_v15  ;;  %v1215_v54 = vsub.f32 %v1213_v56, %v1214_v18 }
 0x2b3   :  { %1475 = vmatmul.f32.gmra.mxu2 %v1157_v32  ;;  %v971_v32 = vld [vmem:[%s8718_s3 + $0x78] sm:$0xff] }
 0x2b4   :  { %1596 = vmatmul.f32.gmra.mxu3 %v1158_v6  ;;  %v6663_v37 = vand.u32 4294901760, %v971_v32  ;;  %v1216_v45 = vand.u32 4294901760, %v1215_v54 }
 0x2b5   :  { %4736 = vperm.xlu2 %5074, %v4702_v3  }
 0x2b6   :  { %4731 = vperm.xlu1 %5075, %v4701_v49   ;;  %v1221_v6 = vsub.f32 %v971_v32, %v6663_v37 }
 0x2b9   :  { %1169 = vmatmul.f32.gmra.mxu0 %v1168_v29 }
 0x2ba   :  { %1354 = vmatmul.f32.gmra.mxu1 %v6566_v62 }
 0x2bb   :  { %1480 = vmatmul.f32.gmra.mxu2 %v1165_v41  ;;  %v1222_v41 = vand.u32 4294901760, %v1221_v6 }
 0x2bc   :  { %1602 = vmatmul.f32.gmra.mxu3 %v1166_v10 }
 0x2bd   :  { %4751 = vperm.xlu2 %5074, %v4705_v38   ;;  %v1223_v28 = vsub.f32 %v1221_v6, %v1222_v41 }
 0x2be   :  { %4746 = vperm.xlu1 %5075, %v4704_v5  }
 0x2bf   :  { %v1224_v58 = vand.u32 4294901760, %v1223_v28 }
 0x2c1   :  { %1177 = vmatmul.f32.gmra.mxu0 %v1176_v55 }
 0x2c2   :  { %1358 = vmatmul.f32.gmra.mxu1 %v6581_v22 }
 0x2c3   :  { %1485 = vmatmul.f32.gmra.mxu2 %v1173_v1 }
 0x2c4   :  { %1608 = vmatmul.f32.gmra.mxu3 %v1174_v21 }
 0x2c5   :  { %4766 = vperm.xlu2 %5074, %v4708_v34  }
 0x2c6   :  { %4761 = vperm.xlu1 %5075, %v4707_v0  }
 0x2c9   :  { %1185 = vmatmul.f32.gmra.mxu0 %v1184_v44 }
 0x2ca   :  { %1362 = vmatmul.f32.gmra.mxu1 %v6594_v2 }
 0x2cb   :  { %1490 = vmatmul.f32.gmra.mxu2 %v1181_v59 }
 0x2cc   :  { %1614 = vmatmul.f32.gmra.mxu3 %v1182_v12 }
 0x2cd   :  { %4781 = vperm.xlu2 %5074, %v4711_v46  }
 0x2ce   :  { %4776 = vperm.xlu1 %5075, %v4710_v57  }
 0x2d1   :  { %1193 = vmatmul.f32.gmra.mxu0 %v1192_v11 }
 0x2d2   :  { %1366 = vmatmul.f32.gmra.mxu1 %v6607_v51 }
 0x2d3   :  { %1495 = vmatmul.f32.gmra.mxu2 %v1189_v53 }
 0x2d4   :  { %1620 = vmatmul.f32.gmra.mxu3 %v1190_v42 }
 0x2d6   :  { %4791 = vperm.xlu1 %5075, %v4713_v63  }
 0x2d9   :  { %1201 = vmatmul.f32.gmra.mxu0 %v1200_v26 }
 0x2da   :  { %1370 = vmatmul.f32.gmra.mxu1 %v6620_v8 }
 0x2db   :  { %1500 = vmatmul.f32.gmra.mxu2 %v1197_v19 }
 0x2dc   :  { %1626 = vmatmul.f32.gmra.mxu3 %v1198_v24 }
 0x2e1   :  { %1209 = vmatmul.f32.gmra.mxu0 %v1208_v33 }
 0x2e2   :  { %1374 = vmatmul.f32.gmra.mxu1 %v6633_v14 }
 0x2e3   :  { %1505 = vmatmul.f32.gmra.mxu2 %v1205_v4 }
 0x2e4   :  { %1632 = vmatmul.f32.gmra.mxu3 %v1206_v36 }
 0x2e9   :  { %1217 = vmatmul.f32.gmra.mxu0 %v1216_v45 }
 0x2ea   :  { %1378 = vmatmul.f32.gmra.mxu1 %v6646_v43 }
 0x2eb   :  { %1510 = vmatmul.f32.gmra.mxu2 %v1213_v56 }
 0x2ec   :  { %1638 = vmatmul.f32.gmra.mxu3 %v1214_v18 }
 0x2f1   :  { %1225 = vmatmul.f32.gmra.mxu0 %v1224_v58  ;;  %v6828_v58 = vpop.permute.xlu0 %1065 }
 0x2f2   :  { %1382 = vmatmul.f32.gmra.mxu1 %v6656_v47 }
 0x2f3   :  { %1515 = vmatmul.f32.gmra.mxu2 %v1221_v6 }
 0x2f4   :  { %1644 = vmatmul.f32.gmra.mxu3 %v1222_v41 }
 0x2f6   :  { %v6669_v52 = vpop.f32.mrf.mxu0 }
 0x2f9   :  { %1713 = vmatmul.f32.vlgmr.msrb.gmra.mxu0 %v6404_v17 }
 0x2fa   :  { %1386 = vmatmul.f32.gmra.mxu1 %v6663_v37 }
 0x2fe   :  { %v6673_v25 = vpop.f32.mrf.mxu0  ;;  %v6741_v12 = vpop.f32.mrf.mxu2 }
 0x2ff   :  { %v6675_v10 = vpop.f32.mrf.mxu1  ;;  %v6747_v40 = vpop.f32.mrf.mxu3 }
 0x301   :  { %1717 = vmatmul.f32.gmra.mxu0 %v6419_v30 }
 0x302   :  { %1810 = vmatmul.f32.vlgmr.msrb.gmra.mxu1 %v6404_v17 }
 0x306   :  { %v6679_v16 = vpop.f32.mrf.mxu0  ;;  %v6753_v34 = vpop.f32.mrf.mxu2 }
 0x307   :  { %v6681_v1 = vpop.f32.mrf.mxu1 }
 0x309   :  { %1721 = vmatmul.f32.gmra.mxu0 %v6439_v20 }
 0x30a   :  { %1814 = vmatmul.f32.gmra.mxu1 %v6419_v30 }
 0x30e   :  { %v6685_v3 = vpop.f32.mrf.mxu0 }
 0x30f   :  { %v6687_v39 = vpop.f32.mrf.mxu1 }
 0x311   :  { %1725 = vmatmul.f32.gmra.mxu0 %v6472_v31 }
 0x312   :  { %1818 = vmatmul.f32.gmra.mxu1 %v6439_v20 }
 0x316   :  { %v6691_v49 = vpop.f32.mrf.mxu0 }
 0x317   :  { %8823 = vst [vmem:[#allocation24_spill] sm:$0xff] %v6691_v49  ;;  %v6693_v29 = vpop.f32.mrf.mxu1 }
 0x318   :  { %8824 = vst [vmem:[#allocation17_spill] sm:$0xff] %v6693_v29 }
 0x319   :  { %1729 = vmatmul.f32.gmra.mxu0 %v6495_v23 }
 0x31a   :  { %1822 = vmatmul.f32.gmra.mxu1 %v6472_v31 }
 0x31e   :  { %v6697_v17 = vpop.f32.mrf.mxu0 }
 0x31f   :  { %8825 = vst [vmem:[#allocation30_spill] sm:$0xff] %v6697_v17  ;;  %v6699_v21 = vpop.f32.mrf.mxu1 }
 0x320   :  { %8826 = vst [vmem:[#allocation16_spill] sm:$0xff] %v6699_v21 }
 0x321   :  { %1733 = vmatmul.f32.gmra.mxu0 %v6520_v35 }
 0x322   :  { %1826 = vmatmul.f32.gmra.mxu1 %v6495_v23 }
 0x326   :  { %v6703_v30 = vpop.f32.mrf.mxu0 }
 0x327   :  { %v6705_v13 = vpop.f32.mrf.mxu1 }
 0x328   :  { %8827 = vst [vmem:[#allocation6_spill] sm:$0xff] %v6705_v13 }
 0x329   :  { %1737 = vmatmul.f32.gmra.mxu0 %v6545_v15 }
 0x32a   :  { %1830 = vmatmul.f32.gmra.mxu1 %v6520_v35 }
 0x32e   :  { %v6709_v20 = vpop.f32.mrf.mxu0 }
 0x32f   :  { %v6711_v59 = vpop.f32.mrf.mxu1 }
 0x330   :  { %8828 = vst [vmem:[#allocation9_spill] sm:$0xff] %v6711_v59 }
 0x331   :  { %1741 = vmatmul.f32.gmra.mxu0 %v6566_v62 }
 0x332   :  { %1834 = vmatmul.f32.gmra.mxu1 %v6545_v15 }
 0x336   :  { %v6715_v31 = vpop.f32.mrf.mxu0 }
 0x337   :  { %v6717_v38 = vpop.f32.mrf.mxu1 }
 0x339   :  { %1745 = vmatmul.f32.gmra.mxu0 %v6581_v22 }
 0x33a   :  { %1838 = vmatmul.f32.gmra.mxu1 %v6566_v62 }
 0x33e   :  { %v6721_v23 = vpop.f32.mrf.mxu0 }
 0x33f   :  { %v6723_v50 = vpop.f32.mrf.mxu1 }
 0x341   :  { %1749 = vmatmul.f32.gmra.mxu0 %v6594_v2 }
 0x342   :  { %1842 = vmatmul.f32.gmra.mxu1 %v6581_v22 }
 0x346   :  { %v6727_v35 = vpop.f32.mrf.mxu0 }
 0x347   :  { %v6729_v5 = vpop.f32.mrf.mxu1 }
 0x349   :  { %1753 = vmatmul.f32.gmra.mxu0 %v6607_v51 }
 0x34a   :  { %1846 = vmatmul.f32.gmra.mxu1 %v6594_v2 }
 0x34e   :  { %v6733_v15 = vpop.f32.mrf.mxu0 }
 0x34f   :  { %v6735_v55 = vpop.f32.mrf.mxu1 }
 0x351   :  { %1757 = vmatmul.f32.gmra.mxu0 %v6620_v8 }
 0x352   :  { %1850 = vmatmul.f32.gmra.mxu1 %v6607_v51  ;;  %v6757_v51 = vpop.f32.mrf.mxu3 }
 0x356   :  { %v6739_v62 = vpop.f32.mrf.mxu0 }
 0x357   :  { %v6743_v22 = vpop.f32.mrf.mxu1 }
 0x359   :  { %1761 = vmatmul.f32.gmra.mxu0 %v6633_v14 }
 0x35a   :  { %1854 = vmatmul.f32.gmra.mxu1 %v6620_v8  ;;  %v6765_v8 = vpop.f32.mrf.mxu2  ;;  %v6769_v42 = vpop.f32.mrf.mxu3 }
 0x35b   :  { %8829 = vst [vmem:[#allocation14_spill] sm:$0xff] %v6769_v42 }
 0x35e   :  { %v6749_v2 = vpop.f32.mrf.mxu0 }
 0x35f   :  { %v6751_v53 = vpop.f32.mrf.mxu1 }
 0x361   :  { %1765 = vmatmul.f32.gmra.mxu0 %v6646_v43 }
 0x362   :  { %1858 = vmatmul.f32.gmra.mxu1 %v6633_v14  ;;  %v6775_v14 = vpop.f32.mrf.mxu2  ;;  %v6781_v48 = vpop.f32.mrf.mxu3 }
 0x363   :  { %8830 = vst [vmem:[#allocation15_spill] sm:$0xff] %v6775_v14 }
 0x364   :  { %8832 = vst [vmem:[#allocation8_spill] sm:$0xff] %v6781_v48 }
 0x366   :  { %v6759_v27 = vpop.f32.mrf.mxu0 }
 0x367   :  { %v6761_v0 = vpop.f32.mrf.mxu1 }
 0x369   :  { %1769 = vmatmul.f32.gmra.mxu0 %v6656_v47 }
 0x36a   :  { %1862 = vmatmul.f32.gmra.mxu1 %v6646_v43  ;;  %v6786_v11 = vpop.f32.mrf.mxu2  ;;  %v6790_v43 = vpop.f32.mrf.mxu3 }
 0x36b   :  { %8834 = vst [vmem:[#allocation11_spill] sm:$0xff] %v6786_v11 }
 0x36c   :  { %8836 = vst [vmem:[#allocation21_spill] sm:$0xff] %v6790_v43 }
 0x36e   :  { %v6767_v44 = vpop.f32.mrf.mxu0 }
 0x36f   :  { %v6771_v60 = vpop.f32.mrf.mxu1 }
 0x371   :  { %1773 = vmatmul.f32.gmra.mxu0 %v6663_v37 }
 0x372   :  { %1866 = vmatmul.f32.gmra.mxu1 %v6656_v47  ;;  %v6796_v9 = vpop.f32.mrf.mxu2  ;;  %v6798_v63 = vpop.f32.mrf.mxu3 }
 0x373   :  { %8839 = vst [vmem:[#allocation27_spill] sm:$0xff] %v6796_v9 }
 0x374   :  { %8840 = vst [vmem:[#allocation32_spill] sm:$0xff] %v6798_v63 }
 0x376   :  { %v6777_v19 = vpop.f32.mrf.mxu0 }
 0x377   :  { %8831 = vst [vmem:[#allocation28_spill] sm:$0xff] %v6777_v19  ;;  %v6779_v46 = vpop.f32.mrf.mxu1 }
 0x37a   :  { %1870 = vmatmul.f32.gmra.mxu1 %v6663_v37  ;;  %v6804_v47 = vpop.f32.mrf.mxu2  ;;  %v6808_v56 = vpop.f32.mrf.mxu3 }
 0x37b   :  { %8843 = vst [vmem:[#allocation18_spill] sm:$0xff] %v6804_v47 }
 0x37c   :  { %8845 = vst [vmem:[#allocation7_spill] sm:$0xff] %v6808_v56 }
 0x37e   :  { %v6784_v57 = vpop.f32.mrf.mxu0 }
 0x37f   :  { %8833 = vst [vmem:[#allocation10_spill] sm:$0xff] %v6784_v57  ;;  %v6788_v24 = vpop.f32.mrf.mxu1 }
 0x380   :  { %8835 = vst [vmem:[#allocation12_spill] sm:$0xff] %v6788_v24 }
 0x382   :  { %v6812_v33 = vpop.f32.mrf.mxu2  ;;  %v6818_v54 = vpop.f32.mrf.mxu3 }
 0x383   :  { %8847 = vst [vmem:[#allocation20_spill] sm:$0xff] %v6812_v33 }
 0x384   :  { %8850 = vst [vmem:[#allocation23_spill] sm:$0xff] %v6818_v54 }
 0x386   :  { %v6792_v7 = vpop.f32.mrf.mxu0 }
 0x387   :  { %8837 = vst [vmem:[#allocation22_spill] sm:$0xff] %v6792_v7  ;;  %v6794_v4 = vpop.f32.mrf.mxu1  ;;  %v1051_v7 = vpop.permute.xlu0 %1050 }
 0x388   :  { %8838 = vst [vmem:[#allocation31_spill] sm:$0xff] %v6794_v4  ;;  %v1203_v42 = vadd.f32 %v6739_v62, %v1051_v7 }
 0x38a   :  { %v6822_v45 = vpop.f32.mrf.mxu2  ;;  %v6826_v28 = vpop.f32.mrf.mxu3 }
 0x38b   :  { %8852 = vst [vmem:[#allocation35_spill] sm:$0xff] %v6822_v45 }
 0x38c   :  { %8854 = vst [vmem:[#allocation37_spill] sm:$0xff] %v6826_v28 }
 0x38e   :  { %v6800_v26 = vpop.f32.mrf.mxu0 }
 0x38f   :  { %8841 = vst [vmem:[#allocation19_spill] sm:$0xff] %v6800_v26  ;;  %v6802_v36 = vpop.f32.mrf.mxu1 }
 0x390   :  { %8842 = vst [vmem:[#allocation26_spill] sm:$0xff] %v6802_v36 }
 0x392   :  { %v6834_v19 = vpop.f32.mrf.mxu2  ;;  %v6836_v36 = vpop.f32.mrf.mxu3 }
 0x393   :  { %8857 = vst [vmem:[#allocation40_spill] sm:$0xff] %v6834_v19 }
 0x394   :  { %8858 = vst [vmem:[#allocation41_spill] sm:$0xff] %v6836_v36 }
 0x396   :  { %v6806_v61 = vpop.f32.mrf.mxu0 }
 0x397   :  { %8844 = vst [vmem:[#allocation34_spill] sm:$0xff] %v6806_v61  ;;  %v6810_v32 = vpop.f32.mrf.mxu1 }
 0x398   :  { %8846 = vst [vmem:[#allocation13_spill] sm:$0xff] %v6810_v32 }
 0x39a   :  { %v6842_v26 = vpop.f32.mrf.mxu2  ;;  %v6846_v48 = vpop.f32.mrf.mxu3 }
 0x39b   :  { %8862 = vst [vmem:[#allocation45_spill] sm:$0xff] %v6846_v48 }
 0x39e   :  { %v6814_v18 = vpop.f32.mrf.mxu0 }
 0x39f   :  { %8848 = vst [vmem:[#allocation29_spill] sm:$0xff] %v6814_v18  ;;  %v6816_v37 = vpop.f32.mrf.mxu1 }
 0x3a0   :  { %8849 = vst [vmem:[#allocation25_spill] sm:$0xff] %v6816_v37  ;;  %v1056_v37 = vpop.permute.xlu2 %1055 }
 0x3a1   :  { %v1211_v45 = vadd.f32 %v6749_v2, %v1056_v37 }
 0x3a6   :  { %v6820_v6 = vpop.f32.mrf.mxu0 }
 0x3a7   :  { %8851 = vst [vmem:[#allocation33_spill] sm:$0xff] %v6820_v6  ;;  %v6824_v41 = vpop.f32.mrf.mxu1  ;;  %v1496_v6 = vpop.f32.mrf.mxu2 }
 0x3a8   :  { %8853 = vst [vmem:[#allocation36_spill] sm:$0xff] %v6824_v41  ;;  %v1061_v41 = vpop.permute.xlu1 %1060  ;;  %v1041_v43 = vpop.permute.xlu2 %1040 }
 0x3a9   :  { %v1219_v59 = vadd.f32 %v6759_v27, %v1061_v41  ;;  %v1187_v62 = vadd.f32 %v6727_v35, %v1041_v43 }
 0x3ae   :  { %v6830_v24 = vpop.f32.mrf.mxu0 }
 0x3af   :  { %8855 = vst [vmem:[#allocation38_spill] sm:$0xff] %v6830_v24  ;;  %v6832_v4 = vpop.f32.mrf.mxu1  ;;  %v1501_v54 = vpop.f32.mrf.mxu2 }
 0x3b0   :  { %8856 = vst [vmem:[#allocation39_spill] sm:$0xff] %v6832_v4  ;;  %v1036_v4 = vpop.permute.xlu0 %1035  ;;  %v1046_v24 = vpop.permute.xlu1 %1045 }
 0x3b1   :  { %v1026_v11 = vpop.permute.xlu2 %1025  ;;  %v1195_v19 = vadd.f32 %v6733_v15, %v1046_v24  ;;  %v1179_v15 = vadd.f32 %v6721_v23, %v1036_v4 }
 0x3b3   :  { %v1364_v35 = vadd.f32 %v6729_v5, %v1179_v15 }
 0x3b6   :  { %v6838_v57 = vpop.f32.mrf.mxu0 }
 0x3b7   :  { %8859 = vst [vmem:[#allocation42_spill] sm:$0xff] %v6838_v57  ;;  %v6840_v32 = vpop.f32.mrf.mxu1 }
 0x3b8   :  { %8860 = vst [vmem:[#allocation43_spill] sm:$0xff] %v6840_v32  ;;  %v6854_v32 = vpop.f32.mrf.mxu3  ;;  %v6856_v56 = vpop.permute.xlu0 %1020 }
 0x3b9   :  { %8866 = vst [vmem:[#allocation49_spill] sm:$0xff] %v6854_v32  ;;  %v1031_v29 = vpop.permute.xlu1 %1030  ;;  %v6862_v47 = vpop.permute.xlu2 %1010  ;;  %v1380_v32 = vadd.f32 %v6761_v0, %v1211_v45 }
 0x3ba   :  { %8869 = vst [vmem:[#allocation52_spill] sm:$0xff] %v6862_v47 }
 0x3be   :  { %v6844_v61 = vpop.f32.mrf.mxu0 }
 0x3bf   :  { %8861 = vst [vmem:[#allocation44_spill] sm:$0xff] %v6844_v61  ;;  %v6848_v18 = vpop.f32.mrf.mxu1 }
 0x3c0   :  { %8863 = vst [vmem:[#allocation46_spill] sm:$0xff] %v6848_v18  ;;  %v1627_v18 = vpop.f32.mrf.mxu3  ;;  %v1006_v61 = vpop.permute.xlu0 %1005 }
 0x3c1   :  { %v996_v48 = vpop.permute.xlu2 %995 }
 0x3c6   :  { %v6850_v63 = vpop.f32.mrf.mxu0 }
 0x3c7   :  { %8864 = vst [vmem:[#allocation47_spill] sm:$0xff] %v6850_v63  ;;  %v6852_v14 = vpop.f32.mrf.mxu1  ;;  %v1016_v63 = vpop.permute.xlu1 %1015 }
 0x3c8   :  { %8865 = vst [vmem:[#allocation48_spill] sm:$0xff] %v6852_v14  ;;  %v1506_v14 = vpop.f32.mrf.mxu2  ;;  %v1633_v36 = vpop.f32.mrf.mxu3 }
 0x3c9   :  { %v991_v49 = vpop.permute.xlu0 %990  ;;  %v1507_v0 = vadd.f32 %v1506_v14, %v1380_v32 }
 0x3ce   :  { %v6858_v57 = vpop.f32.mrf.mxu0 }
 0x3cf   :  { %8867 = vst [vmem:[#allocation50_spill] sm:$0xff] %v6858_v57  ;;  %v6860_v9 = vpop.f32.mrf.mxu1  ;;  %v1107_v57 = vadd.f32 %v6669_v52, %v991_v49  ;;  %v1001_v52 = vpop.permute.xlu1 %1000 }
 0x3d0   :  { %8868 = vst [vmem:[#allocation51_spill] sm:$0xff] %v6860_v9  ;;  %v1115_v9 = vadd.f32 %v6673_v25, %v996_v48  ;;  %v1511_v17 = vpop.f32.mrf.mxu2  ;;  %v1376_v25 = vadd.f32 %v6751_v53, %v1203_v42  ;;  %v1123_v2 = vadd.f32 %v6679_v16, %v1001_v52  ;;  %v1639_v27 = vpop.f32.mrf.mxu3  ;;  %v1368_v53 = vadd.f32 %v6735_v55, %v1187_v62  ;;  %v8886_v62 = vld [vmem:[#allocation47_spill] sm:$0xff] }
 0x3d1   :  { %v1328_v47 = vadd.f32 %v6675_v10, %v1107_v57  ;;  %v1372_v10 = vadd.f32 %v6743_v22, %v1195_v19  ;;  %v1227_v16 = vadd.f32 %v6767_v44, %v6828_v58  ;;  %v1131_v55 = vadd.f32 %v6685_v3, %v1006_v61  ;;  %v8873_v3 = vld [vmem:[#allocation49_spill] sm:$0xff]  ;;  %v8882_v58 = vld [vmem:[#allocation24_spill] sm:$0xff] }
 0x3d2   :  { %v1163_v44 = vadd.f32 %v6709_v20, %v1026_v11  ;;  %v8876_v61 = vld [vmem:[#allocation9_spill] sm:$0xff] }
 0x3d3   :  { %v1442_v49 = vadd.f32 %v6741_v12, %v1328_v47  ;;  %v1502_v12 = vadd.f32 %v1501_v54, %v1376_v25  ;;  %v1388_v23 = vadd.f32 %v6779_v46, %v1227_v16  ;;  %v8872_v46 = vld [vmem:[#allocation40_spill] sm:$0xff]  ;;  %v8883_v25 = vld [vmem:[#allocation6_spill] sm:$0xff] }
 0x3d4   :  { %v1356_v24 = vadd.f32 %v6717_v38, %v1163_v44  ;;  %v1487_v43 = vadd.f32 %v8872_v46, %v1364_v35  ;;  %v8878_v38 = vld [vmem:[#allocation45_spill] sm:$0xff] }
 0x3d5   :  { %v6890_v22 = vadd.f32 %v6747_v40, %v1442_v49 }
 0x3d6   :  { %v1762_v28 = vpop.f32.mrf.mxu0  ;;  %v8879_v37 = vld [vmem:[#allocation50_spill] sm:$0xff] }
 0x3d7   :  { %v6864_v21 = vpop.f32.mrf.mxu1 }
 0x3d8   :  { %8870 = vst [vmem:[#allocation53_spill] sm:$0xff] %v6864_v21  ;;  %v1332_v21 = vadd.f32 %v6681_v1, %v1115_v9  ;;  %v1516_v14 = vpop.f32.mrf.mxu2  ;;  %v8874_v9 = vld [vmem:[#allocation14_spill] sm:$0xff] }
 0x3d9   :  { %v1517_v4 = vadd.f32 %v1516_v14, %v1388_v23  ;;  %v8893_v14 = vld [vmem:[#allocation17_spill] sm:$0xff] }
 0x3da   :  { %v1447_v1 = vadd.f32 %v6753_v34, %v1332_v21  ;;  %v1171_v21 = vadd.f32 %v6715_v31, %v1031_v29  ;;  %v1497_v34 = vadd.f32 %v1496_v6, %v1372_v10  ;;  %v1492_v29 = vadd.f32 %v6842_v26, %v1368_v53  ;;  %v8875_v26 = vld [vmem:[#allocation30_spill] sm:$0xff] }
 0x3db   :  { %v1628_v31 = vadd.f32 %v1627_v18, %v1502_v12  ;;  %v1147_v47 = vadd.f32 %v8875_v26, %v1016_v63  ;;  %v8885_v63 = vld [vmem:[#allocation41_spill] sm:$0xff]  ;;  %v8889_v12 = vld [vmem:[#allocation18_spill] sm:$0xff] }
 0x3dc   :  { %v1360_v40 = vadd.f32 %v6723_v50, %v1171_v21  ;;  %v1622_v7 = vadd.f32 %v8873_v3, %v1497_v34  ;;  %v1616_v18 = vadd.f32 %v8878_v38, %v1492_v29  ;;  %v8890_v21 = vld [vmem:[#allocation37_spill] sm:$0xff]  ;;  %v8891_v34 = vld [vmem:[#allocation44_spill] sm:$0xff]  ;;  %v1340_v29 = vadd.f32 %v8893_v14, %v1131_v55  ;;  %v8901_v55 = vld [vmem:[#allocation46_spill] sm:$0xff] }
 0x3dd   :  { %v1763_v20 = vadd.f32 %v1762_v28, %v1628_v31  ;;  %v8881_v28 = vld [vmem:[#allocation52_spill] sm:$0xff]  ;;  %v1348_v49 = vadd.f32 %v8883_v25, %v1147_v47  ;;  %v8894_v31 = vld [vmem:[#allocation27_spill] sm:$0xff]  ;;  %v8900_v47 = vld [vmem:[#allocation38_spill] sm:$0xff] }
 0x3de   :  { %v1766_v33 = vpop.f32.mrf.mxu0  ;;  %v1759_v54 = vadd.f32 %v8879_v37, %v1622_v7  ;;  %v1139_v52 = vadd.f32 %v8882_v58, %v8881_v28  ;;  %v8897_v3 = vld [vmem:[#allocation48_spill] sm:$0xff]  ;;  %v8905_v58 = vld [vmem:[#allocation43_spill] sm:$0xff] }
 0x3df   :  { %v6866_v13 = vpop.f32.mrf.mxu1  ;;  %v8912_v14 = vld [vmem:[#allocation19_spill] sm:$0xff] }
 0x3e0   :  { %8871 = vst [vmem:[#allocation54_spill] sm:$0xff] %v6866_v13  ;;  %v1384_v13 = vadd.f32 %v6771_v60, %v1219_v59  ;;  %v1336_v59 = vadd.f32 %v6687_v39, %v1123_v2  ;;  %v1634_v39 = vadd.f32 %v1633_v36, %v1507_v0  ;;  %v8884_v2 = vld [vmem:[#allocation20_spill] sm:$0xff]  ;;  %v1755_v0 = vadd.f32 %v8886_v62, %v1616_v18  ;;  %v8902_v18 = vld [vmem:[#allocation15_spill] sm:$0xff] }
 0x3e1   :  { %v1477_v10 = vadd.f32 %v8884_v2, %v1356_v24  ;;  %v8896_v24 = vld [vmem:[#allocation42_spill] sm:$0xff]  ;;  %v1457_v37 = vadd.f32 %v8902_v18, %v1340_v29 }
 0x3e2   :  { %v1512_v57 = vadd.f32 %v1511_v17, %v1384_v13  ;;  %v6895_v17 = vadd.f32 %v6757_v51, %v1447_v1  ;;  %v1452_v42 = vadd.f32 %v6765_v8, %v1336_v59  ;;  %v1767_v5 = vadd.f32 %v1766_v33, %v1634_v39  ;;  %v8877_v33 = vld [vmem:[#allocation35_spill] sm:$0xff] }
 0x3e3   :  { %v1155_v51 = vadd.f32 %v6703_v30, %v6856_v56  ;;  %v1482_v30 = vadd.f32 %v8877_v33, %v1360_v40  ;;  %v1645_v56 = vpop.f32.mrf.mxu3 }
 0x3e4   :  { %v1640_v13 = vadd.f32 %v1639_v27, %v1512_v57  ;;  %v6909_v36 = vadd.f32 %v8874_v9, %v1452_v42  ;;  %v1610_v27 = vadd.f32 %v8885_v63, %v1487_v43  ;;  %v1646_v1 = vadd.f32 %v1645_v56, %v1517_v4  ;;  %v8887_v57 = vld [vmem:[#allocation53_spill] sm:$0xff]  ;;  %v8899_v9 = vld [vmem:[#allocation7_spill] sm:$0xff] }
 0x3e5   :  { %v1352_v32 = vadd.f32 %v8876_v61, %v1155_v51  ;;  %v1856_v59 = vadd.f32 %v8887_v57, %v1759_v54  ;;  %v1604_v35 = vadd.f32 %v8890_v21, %v1482_v30  ;;  %v8903_v54 = vld [vmem:[#allocation32_spill] sm:$0xff]  ;;  %v8906_v63 = vld [vmem:[#allocation21_spill] sm:$0xff] }
 0x3e6   :  { %v1770_v60 = vpop.f32.mrf.mxu0  ;;  %v1751_v39 = vadd.f32 %v8891_v34, %v1610_v27  ;;  %v8907_v27 = vld [vmem:[#allocation29_spill] sm:$0xff] }
 0x3e7   :  { %v1863_v48 = vpop.f32.mrf.mxu1  ;;  %v1771_v19 = vadd.f32 %v1770_v60, %v1640_v13  ;;  %v8880_v6 = vld [vmem:[#allocation54_spill] sm:$0xff]  ;;  %v8888_v60 = vld [vmem:[#allocation16_spill] sm:$0xff]  ;;  %v1472_v16 = vadd.f32 %v8889_v12, %v1352_v32  ;;  %v8892_v13 = vld [vmem:[#allocation51_spill] sm:$0xff]  ;;  %v1747_v46 = vadd.f32 %v8896_v24, %v1604_v35 }
 0x3e8   :  { %v1864_v11 = vadd.f32 %v1863_v48, %v1767_v5  ;;  %v1860_v45 = vadd.f32 %v8880_v6, %v1763_v20  ;;  %v1344_v53 = vadd.f32 %v8888_v60, %v1139_v52  ;;  %v1852_v23 = vadd.f32 %v8892_v13, %v1755_v0  ;;  %v8911_v35 = vld [vmem:[#allocation36_spill] sm:$0xff] }
 0x3e9   :  { %v1467_v5 = vadd.f32 %v8894_v31, %v1348_v49  ;;  %v1848_v7 = vadd.f32 %v8897_v3, %v1751_v39  ;;  %v1592_v26 = vadd.f32 %v8899_v9, %v1472_v16  ;;  %v6942_v32 = vadd.f32 %v8901_v55, %v1747_v46  ;;  %v8910_v16 = vld [vmem:[#allocation34_spill] sm:$0xff]  ;;  %v8913_v31 = vld [vmem:[#allocation25_spill] sm:$0xff] }
 0x3ea   :  { %v1887_v15 = vmax.f32 %v1864_v11, 0.0  ;;  %v1886_v42 = vmax.f32 %v1860_v45, 0.0  ;;  %v8898_v11 = vld [vmem:[#allocation11_spill] sm:$0xff]  ;;  %v1884_v33 = vmax.f32 %v1852_v23, 0.0  ;;  %v8904_v45 = vld [vmem:[#allocation33_spill] sm:$0xff]  ;;  %v8916_v55 = vld [vmem:[#allocation10_spill] sm:$0xff] }
 0x3eb   :  { %v1586_v6 = vadd.f32 %v8903_v54, %v1467_v5  ;;  %v1739_v28 = vadd.f32 %v8904_v45, %v1592_v26  ;;  %v1883_v25 = vmax.f32 %v1848_v7, 0.0  ;;  %v1882_v0 = vmax.f32 %v6942_v32, 0.0  ;;  %v8914_v7 = vld [vmem:[#allocation22_spill] sm:$0xff] }
 0x3ec   :  { %v6936_v4 = vand.u32 4294901760, %v1887_v15  ;;  %v6944_v30 = vand.u32 4294901760, %v1886_v42  ;;  %v6968_v57 = vand.u32 4294901760, %v1884_v33  ;;  %v1719_v32 = vadd.f32 %v8916_v55, %v6895_v17 }
 0x3ed   :  { %v6985_v13 = vand.u32 4294901760, %v1883_v25 }
 0x3ee   :  { %v1774_v48 = vpop.f32.mrf.mxu0 }
 0x3ef   :  { %v1867_v8 = vpop.f32.mrf.mxu1  ;;  %v1775_v44 = vadd.f32 %v1774_v48, %v1646_v1  ;;  %v1735_v48 = vadd.f32 %v8907_v27, %v1586_v6  ;;  %v8908_v1 = vld [vmem:[#allocation39_spill] sm:$0xff]  ;;  %v4851_v27 = vld [vmem:[%s8718_s3 + $0x80] sm:$0xff] }
 0x3f0   :  { %v1868_v50 = vadd.f32 %v1867_v8, %v1771_v19  ;;  %v8895_v19 = vld [vmem:[#allocation23_spill] sm:$0xff]  ;;  %v1885_v8 = vmax.f32 %v1856_v59, 0.0  ;;  %v6965_v62 = vadd.f32 %v8908_v1, %v1739_v28  ;;  %v8918_v28 = vld [vmem:[#allocation28_spill] sm:$0xff] }
 0x3f1   :  { %v1598_v51 = vadd.f32 %v8895_v19, %v1477_v10  ;;  %v6960_v10 = vsub.f32 %v1887_v15, %v6936_v4  ;;  %v6976_v15 = vsub.f32 %v1886_v42, %v6944_v30  ;;  %v6982_v34 = vadd.f32 %v8911_v35, %v1735_v48 }
 0x3f2   :  { %v1888_v41 = vmax.f32 %v1868_v50, 0.0  ;;  %v1462_v50 = vadd.f32 %v8898_v11, %v1344_v53  ;;  %v6955_v49 = vand.u32 4294901760, %v1885_v8  ;;  %v8909_v53 = vld [vmem:[#allocation8_spill] sm:$0xff]  ;;  %v1880_v19 = vmax.f32 %v6965_v62, 0.0 }
 0x3f3   :  { %v1743_v61 = vadd.f32 %v8900_v47, %v1598_v51  ;;  %v1574_v12 = vadd.f32 %v8909_v53, %v1457_v37  ;;  %v6999_v51 = vand.u32 4294901760, %v1882_v0  ;;  %v2185_v3 = vand.u32 4294901760, %v6976_v15 }
 0x3f4   :  { %v6929_v40 = vand.u32 4294901760, %v1888_v41  ;;  %v6991_v42 = vsub.f32 %v1885_v8, %v6955_v49  ;;  %v1723_v8 = vadd.f32 %v8914_v7, %v6909_v36  ;;  %v7029_v36 = vsub.f32 %v1883_v25, %v6985_v13 }
 0x3f5   :  { %v6953_v52 = vadd.f32 %v8905_v58, %v1743_v61  ;;  %v1727_v29 = vadd.f32 %v8912_v14, %v1574_v12  ;;  %v7038_v37 = vand.u32 4294901760, %v1880_v19  ;;  %v2186_v6 = vsub.f32 %v6976_v15, %v2185_v3 }
 0x3f6   :  { %v6947_v38 = vsub.f32 %v1888_v41, %v6929_v40  ;;  %v1580_v41 = vadd.f32 %v8906_v63, %v1462_v50  ;;  %v1879_v50 = vmax.f32 %v6982_v34, 0.0  ;;  %v2191_v61 = vand.u32 4294901760, %v6991_v42 }
 0x3f7   :  { %v1871_v43 = vpop.f32.mrf.mxu1  ;;  %v1881_v39 = vmax.f32 %v6953_v52, 0.0  ;;  %v7046_v45 = vsub.f32 %v1882_v0, %v6999_v51  ;;  %v1715_v58 = vadd.f32 %v8918_v28, %v6890_v22  ;;  %v8919_v52 = vld [vmem:[#allocation31_spill] sm:$0xff]  ;;  %v2203_v62 = vand.u32 4294901760, %v7029_v36  ;;  %v8920_v0 = vld [vmem:[#allocation12_spill] sm:$0xff] }
 0x3f8   :  { %v1872_v20 = vadd.f32 %v1871_v43, %v1775_v44  ;;  %v2173_v60 = vand.u32 4294901760, %v6947_v38  ;;  %v1731_v21 = vadd.f32 %v8910_v16, %v1580_v41  ;;  %v2179_v44 = vand.u32 4294901760, %v6960_v10 }
 0x3f9   :  { %v7011_v43 = vsub.f32 %v1884_v33, %v6968_v57  ;;  %v7020_v9 = vand.u32 4294901760, %v1881_v39  ;;  %v8917_v33 = vld [vmem:[#allocation26_spill] sm:$0xff]  ;;  %v7052_v25 = vadd.f32 %v8919_v52, %v1719_v32  ;;  %v7055_v41 = vand.u32 4294901760, %v1879_v50 }
 0x3fa   :  { %v1889_v56 = vmax.f32 %v1872_v20, 0.0  ;;  %v6996_v5 = vadd.f32 %v8913_v31, %v1731_v21  ;;  %v2174_v46 = vsub.f32 %v6947_v38, %v2173_v60  ;;  %v8915_v20 = vld [vmem:[#allocation13_spill] sm:$0xff]  ;;  %v2180_v47 = vsub.f32 %v6960_v10, %v2179_v44  ;;  %v4852_v32 = vld [vmem:[%s8718_s3 + $0x88] sm:$0xff] }
 0x3fb   :  { %v7017_v11 = vadd.f32 %v8915_v20, %v1727_v29  ;;  %v2197_v17 = vand.u32 4294901760, %v7011_v43  ;;  %v2192_v22 = vsub.f32 %v6991_v42, %v2191_v61  ;;  %v7067_v1 = vsub.f32 %v1881_v39, %v7020_v9 }
 0x3fc   :  { %v6957_v2 = vand.u32 4294901760, %v1889_v56  ;;  %v1878_v18 = vmax.f32 %v6996_v5, 0.0  ;;  %v2175_v54 = vand.u32 4294901760, %v2174_v46  ;;  %v2181_v48 = vand.u32 4294901760, %v2180_v47 }
 0x3fd   :  { %v1877_v63 = vmax.f32 %v7017_v11, 0.0  ;;  %v7071_v53 = vadd.f32 %v8920_v0, %v1715_v58  ;;  %v7079_v21 = vsub.f32 %v1880_v19, %v7038_v37  ;;  %v2187_v35 = vand.u32 4294901760, %v2186_v6 }
 0x3fe   :  { %v6971_v59 = vsub.f32 %v1889_v56, %v6957_v2  ;;  %2005 = vmatpush.msrb.mxu2 %v6957_v2  ;;  %2456 = vmatpush.msra.mxu1 %v6957_v2  ;;  %v7035_v56 = vadd.f32 %v8917_v33, %v1723_v8  ;;  %v7074_v16 = vand.u32 4294901760, %v1878_v18  ;;  %v2198_v34 = vsub.f32 %v7011_v43, %v2197_v17 }
 0x3ff   :  { %v2209_v39 = vand.u32 4294901760, %v7046_v45  ;;  %v7086_v14 = vand.u32 4294901760, %v4851_v27  ;;  %v1875_v29 = vmax.f32 %v7052_v25, 0.0  ;;  %v7089_v31 = vand.u32 4294901760, %v1877_v63 }
 0x400   :  { %2007 = vmatpush.msrb.mxu2 %v6929_v40  ;;  %2328 = vmatpush.msra.mxu0 %v6971_v59  ;;  %v2167_v23 = vand.u32 4294901760, %v6971_v59  ;;  %v1876_v12 = vmax.f32 %v7035_v56, 0.0  ;;  %v2193_v5 = vand.u32 4294901760, %v2192_v22  ;;  %v2204_v19 = vsub.f32 %v7029_v36, %v2203_v62 }
 0x401   :  { %2458 = vmatpush.msra.mxu1 %v6929_v40  ;;  %v2215_v46 = vand.u32 4294901760, %v7067_v1  ;;  %v1874_v7 = vmax.f32 %v7071_v53, 0.0  ;;  %v7107_v20 = vsub.f32 %v1878_v18, %v7074_v16  ;;  %v2199_v11 = vand.u32 4294901760, %v2198_v34 }
 0x402   :  { %2009 = vmatpush.msrb.mxu2 %v6936_v4  ;;  %2331 = vmatpush.msra.mxu0 %v6947_v38  ;;  %v2168_v24 = vsub.f32 %v6971_v59, %v2167_v23  ;;  %v7102_v8 = vand.u32 4294901760, %v1876_v12  ;;  %v7115_v47 = vsub.f32 %v4851_v27, %v7086_v14  ;;  %v7117_v55 = vand.u32 4294901760, %v1875_v29 }
 0x403   :  { %2460 = vmatpush.msra.mxu1 %v6936_v4  ;;  %v2205_v33 = vand.u32 4294901760, %v2204_v19  ;;  %v2216_v56 = vsub.f32 %v7067_v1, %v2215_v46  ;;  %v7129_v18 = vsub.f32 %v1877_v63, %v7089_v31  ;;  %v7132_v6 = vand.u32 4294901760, %v1874_v7 }
 0x404   :  { %2011 = vmatpush.msrb.mxu2 %v6944_v30  ;;  %2334 = vmatpush.msra.mxu0 %v6960_v10  ;;  %v2169_v26 = vand.u32 4294901760, %v2168_v24  ;;  %v7098_v24 = vsub.f32 %v1879_v50, %v7055_v41  ;;  %v2210_v50 = vsub.f32 %v7046_v45, %v2209_v39  ;;  %v7137_v28 = vsub.f32 %v1876_v12, %v7102_v8  ;;  %v4855_v10 = vld [vmem:[%s8718_s3 + $0xa0] sm:$0xff] }
 0x405   :  { %2462 = vmatpush.msra.mxu1 %v6944_v30  ;;  %v2233_v58 = vand.u32 4294901760, %v7107_v20  ;;  %v2038_v63 = vand.u32 4294901760, %v7115_v47  ;;  %v7145_v27 = vand.u32 4294901760, %v4852_v32  ;;  %v7154_v0 = vsub.f32 %v1875_v29, %v7117_v55 }
 0x406   :  { %2013 = vmatpush.msrb.mxu2 %v6955_v49  ;;  %2170 = vmatpush.msrb.mxu3 %v2169_v26  ;;  %v2221_v26 = vand.u32 4294901760, %v7079_v21  ;;  %v2211_v52 = vand.u32 4294901760, %v2210_v50  ;;  %v8747_v53 = vand.u32 4294901760, %v7129_v18  ;;  %v7160_v12 = vsub.f32 %v1874_v7, %v7132_v6  ;;  %v4853_v7 = vld [vmem:[%s8718_s3 + $0x90] sm:$0xff] }
 0x407   :  { %2337 = vmatpush.msra.mxu0 %v6976_v15  ;;  %2464 = vmatpush.msra.mxu1 %v6955_v49  ;;  %v2234_v29 = vsub.f32 %v7107_v20, %v2233_v58  ;;  %v2045_v19 = vsub.f32 %v4852_v32, %v7145_v27 }
 0x408   :  { %2015 = vmatpush.msrb.mxu2 %v6968_v57  ;;  %2176 = vmatpush.msrb.mxu3 %v2175_v54  ;;  %v2227_v54 = vand.u32 4294901760, %v7098_v24  ;;  %v2222_v25 = vsub.f32 %v7079_v21, %v2221_v26  ;;  %v2240_v50 = vsub.f32 %v7129_v18, %v8747_v53 }
 0x409   :  { %2340 = vmatpush.msra.mxu0 %v6991_v42  ;;  %2466 = vmatpush.msra.mxu1 %v6968_v57  ;;  %v4856_v42 = vld [vmem:[%s8718_s3 + $0xa8] sm:$0xff] }
 0x40a   :  { %2017 = vmatpush.msrb.mxu2 %v6985_v13  ;;  %2182 = vmatpush.msrb.mxu3 %v2181_v48  ;;  %v2217_v48 = vand.u32 4294901760, %v2216_v56  ;;  %v2228_v22 = vsub.f32 %v7098_v24, %v2227_v54  ;;  %v2223_v34 = vand.u32 4294901760, %v2222_v25  ;;  %v2257_v56 = vand.u32 4294901760, %v7160_v12 }
 0x40b   :  { %2343 = vmatpush.msra.mxu0 %v7011_v43  ;;  %2468 = vmatpush.msra.mxu1 %v6985_v13  ;;  %v8921_v43 = vand.u32 4294901760, %v7129_v18 }
 0x40c   :  { %2019 = vmatpush.msrb.mxu2 %v6999_v51  ;;  %2188 = vmatpush.msrb.mxu3 %v2187_v35  ;;  %v8746_v35 = vand.u32 4294901760, %v7137_v28 }
 0x40d   :  { %2346 = vmatpush.msra.mxu0 %v7029_v36  ;;  %2470 = vmatpush.msra.mxu1 %v6999_v51 }
 0x40e   :  { %2021 = vmatpush.msrb.mxu2 %v7020_v9  ;;  %2194 = vmatpush.msrb.mxu3 %v2193_v5  ;;  %v2039_v5 = vsub.f32 %v7115_v47, %v2038_v63  ;;  %v2246_v32 = vsub.f32 %v7137_v28, %v8746_v35 }
 0x40f   :  { %2349 = vmatpush.msra.mxu0 %v7046_v45  ;;  %2472 = vmatpush.msra.mxu1 %v7020_v9 }
 0x410   :  { %2023 = vmatpush.msrb.mxu2 %v7038_v37  ;;  %2200 = vmatpush.msrb.mxu3 %v2199_v11  ;;  %v2229_v11 = vand.u32 4294901760, %v2228_v22  ;;  %v2040_v25 = vand.u32 4294901760, %v2039_v5  ;;  %v7186_v22 = vand.u32 4294901760, %v4853_v7  ;;  %v2258_v5 = vsub.f32 %v7160_v12, %v2257_v56 }
 0x411   :  { %2352 = vmatpush.msra.mxu0 %v7067_v1  ;;  %2474 = vmatpush.msra.mxu1 %v7038_v37 }
 0x412   :  { %2025 = vmatpush.msrb.mxu2 %v7055_v41  ;;  %2206 = vmatpush.msrb.mxu3 %v2205_v33  ;;  %v2251_v33 = vand.u32 4294901760, %v7154_v0  ;;  %v2053_v53 = vsub.f32 %v4853_v7, %v7186_v22 }
 0x413   :  { %2355 = vmatpush.msra.mxu0 %v7079_v21  ;;  %2476 = vmatpush.msra.mxu1 %v7055_v41 }
 0x414   :  { %2027 = vmatpush.msrb.mxu2 %v7074_v16  ;;  %2212 = vmatpush.msrb.mxu3 %v2211_v52  ;;  %v2235_v52 = vand.u32 4294901760, %v2234_v29  ;;  %v2252_v35 = vsub.f32 %v7154_v0, %v2251_v33  ;;  %v2247_v29 = vand.u32 4294901760, %v2246_v32  ;;  %v2259_v32 = vand.u32 4294901760, %v2258_v5 }
 0x415   :  { %2358 = vmatpush.msra.mxu0 %v7098_v24  ;;  %2478 = vmatpush.msra.mxu1 %v7074_v16 }
 0x416   :  { %2029 = vmatpush.msrb.mxu2 %v7089_v31  ;;  %2218 = vmatpush.msrb.mxu3 %v2217_v48  ;;  %v2046_v48 = vand.u32 4294901760, %v2045_v19 }
 0x417   :  { %2361 = vmatpush.msra.mxu0 %v7107_v20  ;;  %2480 = vmatpush.msra.mxu1 %v7089_v31 }
 0x418   :  { %2031 = vmatpush.msrb.mxu2 %v7102_v8  ;;  %2224 = vmatpush.msrb.mxu3 %v2223_v34  ;;  %v2241_v34 = vand.u32 4294901760, %v2240_v50  ;;  %v4854_v50 = vld [vmem:[%s8718_s3 + $0x98] sm:$0xff] }
 0x419   :  { %2364 = vmatpush.msra.mxu0 %v7129_v18  ;;  %2482 = vmatpush.msra.mxu1 %v7102_v8  ;;  %v7209_v59 = vand.u32 4294901760, %v4854_v50 }
 0x41a   :  { %2033 = vmatpush.msrb.mxu2 %v7117_v55  ;;  %2230 = vmatpush.msrb.mxu3 %v2229_v11  ;;  %v2047_v11 = vsub.f32 %v2045_v19, %v2046_v48 }
 0x41b   :  { %2367 = vmatpush.msra.mxu0 %v7137_v28  ;;  %2484 = vmatpush.msra.mxu1 %v7117_v55 }
 0x41c   :  { %2035 = vmatpush.msrb.mxu2 %v7132_v6  ;;  %2236 = vmatpush.msrb.mxu3 %v2235_v52  ;;  %v2253_v52 = vand.u32 4294901760, %v2252_v35  ;;  %v2048_v7 = vand.u32 4294901760, %v2047_v11  ;;  %v4862_v35 = vld [vmem:[%s8718_s3 + $0xd8] sm:$0xff] }
 0x41d   :  { %2370 = vmatpush.msra.mxu0 %v7154_v0  ;;  %2486 = vmatpush.msra.mxu1 %v7132_v6 }
 0x41e   :  { %2041 = vmatmul.f32.vlgmr.msrb.gmra.mxu2 %v2040_v25  ;;  %2242 = vmatpush.msrb.mxu3 %v2241_v34  ;;  %v2054_v25 = vand.u32 4294901760, %v2053_v53 }
 0x41f   :  { %2587 = vmatpush.msra.mxu2 %v2167_v23  ;;  %2373 = vmatpush.msra.mxu0 %v7160_v12  ;;  %v7227_v23 = vand.u32 4294901760, %v4855_v10 }
 0x420   :  { %2248 = vmatpush.msrb.mxu3 %v2247_v29  ;;  %2376 = vmatmul.f32.vlgmr.msra.gmra.mxu0 %v7115_v47  ;;  %v2055_v38 = vsub.f32 %v2053_v53, %v2054_v25  ;;  %v4863_v29 = vld [vmem:[%s8718_s3 + $0xe0] sm:$0xff] }
 0x421   :  { %2591 = vmatpush.msra.mxu2 %v2173_v60  ;;  %2490 = vmatmul.f32.vlgmr.msra.gmra.mxu1 %v2038_v63  ;;  %v2061_v60 = vsub.f32 %v4854_v50, %v7209_v59  ;;  %v7316_v50 = vand.u32 4294901760, %v4863_v29 }
 0x422   :  { %2254 = vmatpush.msrb.mxu3 %v2253_v52 }
 0x423   :  { %2595 = vmatpush.msra.mxu2 %v2179_v44  ;;  %v2062_v15 = vand.u32 4294901760, %v2061_v60  ;;  %v7246_v44 = vand.u32 4294901760, %v4856_v42 }
 0x424   :  { %2260 = vmatpush.msrb.mxu3 %v2259_v32  ;;  %v2133_v32 = vsub.f32 %v4863_v29, %v7316_v50 }
 0x425   :  { %2599 = vmatpush.msra.mxu2 %v2185_v3  ;;  %2262 = vmatmul.f32.vlgmr.msrb.gmra.mxu3 %v7086_v14  ;;  %v4857_v3 = vld [vmem:[%s8718_s3 + $0xb0] sm:$0xff] }
 0x426   :  { %2049 = vmatmul.f32.gmra.mxu2 %v2048_v7  ;;  %2714 = vmatpush.msra.mxu3 %v6957_v2  ;;  %v2056_v2 = vand.u32 4294901760, %v2055_v38  ;;  %v4864_v7 = vld [vmem:[%s8718_s3 + $0xe8] sm:$0xff]  ;;  %v2134_v38 = vand.u32 4294901760, %v2133_v32 }
 0x427   :  { %2603 = vmatpush.msra.mxu2 %v2191_v61  ;;  %v7265_v61 = vand.u32 4294901760, %v4857_v3 }
 0x428   :  { %2716 = vmatpush.msra.mxu3 %v6929_v40  ;;  %2381 = vmatmul.f32.gmra.mxu0 %v2045_v19  ;;  %v2063_v40 = vsub.f32 %v2061_v60, %v2062_v15 }
 0x429   :  { %2607 = vmatpush.msra.mxu2 %v2197_v17  ;;  %2496 = vmatmul.f32.gmra.mxu1 %v2046_v48  ;;  %v2085_v45 = vsub.f32 %v4857_v3, %v7265_v61  ;;  %v4858_v17 = vld [vmem:[%s8718_s3 + $0xb8] sm:$0xff] }
 0x42a   :  { %2718 = vmatpush.msra.mxu3 %v6936_v4  ;;  %v2069_v4 = vsub.f32 %v4855_v10, %v7227_v23  ;;  %v7325_v10 = vpop.permute.xlu1 %2001 }
 0x42b   :  { %2611 = vmatpush.msra.mxu2 %v2203_v62  ;;  %v2086_v1 = vand.u32 4294901760, %v2085_v45  ;;  %v7280_v62 = vand.u32 4294901760, %v4858_v17 }
 0x42c   :  { %2720 = vmatpush.msra.mxu3 %v6944_v30  ;;  %v2064_v30 = vand.u32 4294901760, %v2063_v40  ;;  %v4865_v40 = vld [vmem:[%s8718_s3 + $0xf0] sm:$0xff] }
 0x42d   :  { %2615 = vmatpush.msra.mxu2 %v2209_v39  ;;  %2266 = vmatmul.f32.gmra.mxu3 %v7145_v27  ;;  %v2093_v21 = vsub.f32 %v4858_v17, %v7280_v62  ;;  %v4859_v39 = vld [vmem:[%s8718_s3 + $0xc0] sm:$0xff] }
 0x42e   :  { %2057 = vmatmul.f32.gmra.mxu2 %v2056_v2  ;;  %2722 = vmatpush.msra.mxu3 %v6955_v49  ;;  %v2070_v49 = vand.u32 4294901760, %v2069_v4  ;;  %v2135_v2 = vsub.f32 %v2133_v32, %v2134_v38 }
 0x42f   :  { %2619 = vmatpush.msra.mxu2 %v2215_v46  ;;  %v2094_v24 = vand.u32 4294901760, %v2093_v21  ;;  %v7288_v46 = vand.u32 4294901760, %v4859_v39 }
 0x430   :  { %2724 = vmatpush.msra.mxu3 %v6968_v57  ;;  %2386 = vmatmul.f32.gmra.mxu0 %v2053_v53  ;;  %v2071_v57 = vsub.f32 %v2069_v4, %v2070_v49 }
 0x431   :  { %2623 = vmatpush.msra.mxu2 %v2221_v26  ;;  %2502 = vmatmul.f32.gmra.mxu1 %v2054_v25  ;;  %v2101_v20 = vsub.f32 %v4859_v39, %v7288_v46  ;;  %v4860_v26 = vld [vmem:[%s8718_s3 + $0xc8] sm:$0xff] }
 0x432   :  { %2726 = vmatpush.msra.mxu3 %v6985_v13  ;;  %v2077_v13 = vsub.f32 %v4856_v42, %v7246_v44  ;;  %v7295_v18 = vand.u32 4294901760, %v4860_v26 }
 0x433   :  { %2627 = vmatpush.msra.mxu2 %v2227_v54 }
 0x434   :  { %2728 = vmatpush.msra.mxu3 %v6999_v51  ;;  %v8922_v51 = vand.u32 4294901760, %v7137_v28  ;;  %v2078_v36 = vand.u32 4294901760, %v2077_v13  ;;  %v4861_v28 = vld [vmem:[%s8718_s3 + $0xd0] sm:$0xff] }
 0x435   :  { %2631 = vmatpush.msra.mxu2 %v2233_v58  ;;  %2270 = vmatmul.f32.gmra.mxu3 %v7186_v22  ;;  %v7302_v0 = vand.u32 4294901760, %v4861_v28 }
 0x436   :  { %2065 = vmatmul.f32.gmra.mxu2 %v2064_v30  ;;  %2730 = vmatpush.msra.mxu3 %v7020_v9  ;;  %v2072_v9 = vand.u32 4294901760, %v2071_v57  ;;  %v7332_v30 = vand.u32 4294901760, %v4865_v40 }
 0x437   :  { %2635 = vmatpush.msra.mxu2 %v8921_v43  ;;  %v2117_v12 = vsub.f32 %v4861_v28, %v7302_v0  ;;  %v4866_v43 = vld [vmem:[%s8718_s3 + $0xf8] sm:$0xff] }
 0x438   :  { %2732 = vmatpush.msra.mxu3 %v7038_v37  ;;  %2391 = vmatmul.f32.gmra.mxu0 %v2061_v60  ;;  %v2079_v37 = vsub.f32 %v2077_v13, %v2078_v36  ;;  %v7323_v60 = vand.u32 4294901760, %v4864_v7 }
 0x439   :  { %2639 = vmatpush.msra.mxu2 %v8922_v51  ;;  %2508 = vmatmul.f32.gmra.mxu1 %v2062_v15 }
 0x43a   :  { %2734 = vmatpush.msra.mxu3 %v7055_v41  ;;  %v2080_v41 = vand.u32 4294901760, %v2079_v37  ;;  %v2141_v15 = vsub.f32 %v4864_v7, %v7323_v60 }
 0x43b   :  { %2643 = vmatpush.msra.mxu2 %v2251_v33  ;;  %v2118_v33 = vand.u32 4294901760, %v2117_v12 }
 0x43c   :  { %2736 = vmatpush.msra.mxu3 %v7074_v16  ;;  %v2087_v16 = vsub.f32 %v2085_v45, %v2086_v1  ;;  %v2142_v42 = vand.u32 4294901760, %v2141_v15 }
 0x43d   :  { %2647 = vmatpush.msra.mxu2 %v2257_v56  ;;  %2274 = vmatmul.f32.gmra.mxu3 %v7209_v59  ;;  %v7309_v56 = vand.u32 4294901760, %v4862_v35  ;;  %v2119_v48 = vsub.f32 %v2117_v12, %v2118_v33 }
 0x43e   :  { %2073 = vmatmul.f32.gmra.mxu2 %v2072_v9  ;;  %2738 = vmatpush.msra.mxu3 %v7089_v31  ;;  %v2088_v31 = vand.u32 4294901760, %v2087_v16  ;;  %v2143_v57 = vsub.f32 %v2141_v15, %v2142_v42  ;;  %v7341_v9 = vand.u32 4294901760, %v4866_v43  ;;  %v7350_v16 = vpop.permute.xlu2 %1996 }
 0x43f   :  { %v2125_v34 = vsub.f32 %v4862_v35, %v7309_v56  ;;  %v2120_v5 = vand.u32 4294901760, %v2119_v48 }
 0x440   :  { %2740 = vmatpush.msra.mxu3 %v7102_v8  ;;  %2396 = vmatmul.f32.gmra.mxu0 %v2069_v4  ;;  %v2095_v8 = vsub.f32 %v2093_v21, %v2094_v24  ;;  %v2136_v4 = vand.u32 4294901760, %v2135_v2  ;;  %v2144_v3 = vand.u32 4294901760, %v2143_v57 }
 0x441   :  { %2514 = vmatmul.f32.gmra.mxu1 %v2070_v49  ;;  %v2126_v11 = vand.u32 4294901760, %v2125_v34  ;;  %v7335_v49 = vpop.permute.xlu1 %1986 }
 0x442   :  { %2742 = vmatpush.msra.mxu3 %v7117_v55  ;;  %v2096_v47 = vand.u32 4294901760, %v2095_v8  ;;  %v2102_v55 = vand.u32 4294901760, %v2101_v20 }
 0x443   :  { %v2127_v52 = vsub.f32 %v2125_v34, %v2126_v11 }
 0x444   :  { %2744 = vmatpush.msra.mxu3 %v7132_v6  ;;  %v2103_v54 = vsub.f32 %v2101_v20, %v2102_v55  ;;  %v2109_v6 = vsub.f32 %v4860_v26, %v7295_v18 }
 0x445   :  { %2278 = vmatmul.f32.gmra.mxu3 %v7227_v23  ;;  %v2128_v25 = vand.u32 4294901760, %v2127_v52 }
 0x446   :  { %2081 = vmatmul.f32.gmra.mxu2 %v2080_v41  ;;  %v2104_v58 = vand.u32 4294901760, %v2103_v54  ;;  %v2110_v63 = vand.u32 4294901760, %v2109_v6  ;;  %v7355_v8 = vpop.permute.xlu2 %1981 }
 0x448   :  { %2401 = vmatmul.f32.gmra.mxu0 %v2077_v13  ;;  %v2111_v53 = vsub.f32 %v2109_v6, %v2110_v63  ;;  %v2149_v13 = vsub.f32 %v4865_v40, %v7332_v30 }
 0x449   :  { %2520 = vmatmul.f32.gmra.mxu1 %v2078_v36  ;;  %v7344_v36 = vpop.permute.xlu0 %1991  ;;  %v7347_v17 = vpop.permute.xlu1 %1971 }
 0x44a   :  { %v2112_v19 = vand.u32 4294901760, %v2111_v53  ;;  %v2150_v51 = vand.u32 4294901760, %v2149_v13 }
 0x44c   :  { %v2151_v37 = vsub.f32 %v2149_v13, %v2150_v51 }
 0x44d   :  { %2282 = vmatmul.f32.gmra.mxu3 %v7246_v44 }
 0x44e   :  { %2089 = vmatmul.f32.gmra.mxu2 %v2088_v31  ;;  %v2152_v41 = vand.u32 4294901760, %v2151_v37 }
 0x450   :  { %2406 = vmatmul.f32.gmra.mxu0 %v2085_v45  ;;  %v2157_v45 = vsub.f32 %v4866_v43, %v7341_v9 }
 0x451   :  { %2526 = vmatmul.f32.gmra.mxu1 %v2086_v1  ;;  %v7352_v39 = vpop.permute.xlu0 %1976  ;;  %v1957_v31 = vpop.permute.xlu1 %1956 }
 0x452   :  { %v2158_v1 = vand.u32 4294901760, %v2157_v45 }
 0x455   :  { %2286 = vmatmul.f32.gmra.mxu3 %v7265_v61 }
 0x456   :  { %2097 = vmatmul.f32.gmra.mxu2 %v2096_v47 }
 0x458   :  { %2411 = vmatmul.f32.gmra.mxu0 %v2093_v21  ;;  %v2159_v21 = vsub.f32 %v2157_v45, %v2158_v1 }
 0x459   :  { %2532 = vmatmul.f32.gmra.mxu1 %v2094_v24  ;;  %v1942_v26 = vpop.permute.xlu1 %1941 }
 0x45a   :  { %v2160_v24 = vand.u32 4294901760, %v2159_v21 }
 0x45d   :  { %2290 = vmatmul.f32.gmra.mxu3 %v7280_v62 }
 0x45e   :  { %2105 = vmatmul.f32.gmra.mxu2 %v2104_v58 }
 0x460   :  { %2416 = vmatmul.f32.gmra.mxu0 %v2101_v20  ;;  %v1962_v20 = vpop.permute.xlu0 %1961 }
 0x461   :  { %2538 = vmatmul.f32.gmra.mxu1 %v2102_v55  ;;  %v7359_v55 = vpop.permute.xlu2 %1966 }
 0x465   :  { %2294 = vmatmul.f32.gmra.mxu3 %v7288_v46 }
 0x466   :  { %2113 = vmatmul.f32.gmra.mxu2 %v2112_v19 }
 0x468   :  { %2421 = vmatmul.f32.gmra.mxu0 %v2109_v6  ;;  %v1947_v54 = vpop.permute.xlu0 %1946  ;;  %v1927_v6 = vpop.permute.xlu1 %1926 }
 0x469   :  { %2544 = vmatmul.f32.gmra.mxu1 %v2110_v63 }
 0x46d   :  { %2298 = vmatmul.f32.gmra.mxu3 %v7295_v18 }
 0x46e   :  { %2121 = vmatmul.f32.gmra.mxu2 %v2120_v5 }
 0x470   :  { %2426 = vmatmul.f32.gmra.mxu0 %v2117_v12  ;;  %v1952_v12 = vpop.permute.xlu2 %1951  ;;  %v1932_v35 = vpop.permute.xlu0 %1931 }
 0x471   :  { %2550 = vmatmul.f32.gmra.mxu1 %v2118_v33 }
 0x475   :  { %2302 = vmatmul.f32.gmra.mxu3 %v7302_v0 }
 0x476   :  { %2129 = vmatmul.f32.gmra.mxu2 %v2128_v25 }
 0x478   :  { %2431 = vmatmul.f32.gmra.mxu0 %v2125_v34 }
 0x479   :  { %2556 = vmatmul.f32.gmra.mxu1 %v2126_v11 }
 0x47d   :  { %2306 = vmatmul.f32.gmra.mxu3 %v7309_v56 }
 0x47e   :  { %2137 = vmatmul.f32.gmra.mxu2 %v2136_v4 }
 0x480   :  { %2436 = vmatmul.f32.gmra.mxu0 %v2133_v32 }
 0x481   :  { %2562 = vmatmul.f32.gmra.mxu1 %v2134_v38 }
 0x485   :  { %2310 = vmatmul.f32.gmra.mxu3 %v7316_v50 }
 0x486   :  { %2145 = vmatmul.f32.gmra.mxu2 %v2144_v3 }
 0x488   :  { %2441 = vmatmul.f32.gmra.mxu0 %v2141_v15 }
 0x489   :  { %2568 = vmatmul.f32.gmra.mxu1 %v2142_v42 }
 0x48d   :  { %2314 = vmatmul.f32.gmra.mxu3 %v7323_v60 }
 0x48e   :  { %2153 = vmatmul.f32.gmra.mxu2 %v2152_v41 }
 0x490   :  { %2446 = vmatmul.f32.gmra.mxu0 %v2149_v13 }
 0x491   :  { %2574 = vmatmul.f32.gmra.mxu1 %v2150_v51 }
 0x495   :  { %2318 = vmatmul.f32.gmra.mxu3 %v7332_v30 }
 0x496   :  { %2161 = vmatmul.f32.gmra.mxu2 %v2160_v24 }
 0x498   :  { %2451 = vmatmul.f32.gmra.mxu0 %v2157_v45 }
 0x499   :  { %2580 = vmatmul.f32.gmra.mxu1 %v2158_v1 }
 0x49d   :  { %2322 = vmatmul.f32.gmra.mxu3 %v7341_v9  ;;  %v7415_v21 = vpop.f32.mrf.mxu0 }
 0x49e   :  { %2649 = vmatmul.f32.vlgmr.msra.gmra.mxu2 %v7086_v14  ;;  %v7421_v24 = vpop.f32.mrf.mxu1 }
 0x4a1   :  { %v2042_v47 = vpop.f32.mrf.mxu2 }
 0x4a2   :  { %v2043_v28 = vadd.f32 %v2042_v47, %v1927_v6 }
 0x4a5   :  { %2746 = vmatmul.f32.vlgmr.msra.gmra.mxu3 %v7086_v14  ;;  %v1937_v14 = vpop.permute.xlu2 %1936 }
 0x4a6   :  { %2653 = vmatmul.f32.gmra.mxu2 %v7145_v27 }
 0x4a8   :  { %v2263_v58 = vpop.f32.mrf.mxu3 }
 0x4a9   :  { %v2050_v63 = vpop.f32.mrf.mxu2  ;;  %v7363_v53 = vadd.f32 %v2263_v58, %v2043_v28 }
 0x4aa   :  { %v2051_v19 = vadd.f32 %v2050_v63, %v1932_v35 }
 0x4ad   :  { %2750 = vmatmul.f32.gmra.mxu3 %v7145_v27 }
 0x4ae   :  { %2657 = vmatmul.f32.gmra.mxu2 %v7186_v22 }
 0x4b0   :  { %v2267_v33 = vpop.f32.mrf.mxu3 }
 0x4b1   :  { %v2058_v48 = vpop.f32.mrf.mxu2  ;;  %v7367_v34 = vadd.f32 %v2267_v33, %v2051_v19 }
 0x4b2   :  { %v2059_v29 = vadd.f32 %v2058_v48, %v1937_v14 }
 0x4b5   :  { %2754 = vmatmul.f32.gmra.mxu3 %v7186_v22 }
 0x4b6   :  { %2661 = vmatmul.f32.gmra.mxu2 %v7209_v59 }
 0x4b8   :  { %v2271_v5 = vpop.f32.mrf.mxu3 }
 0x4b9   :  { %v2066_v11 = vpop.f32.mrf.mxu2  ;;  %v7371_v52 = vadd.f32 %v2271_v5, %v2059_v29 }
 0x4ba   :  { %v2067_v27 = vadd.f32 %v2066_v11, %v1942_v26  ;;  %v7429_v26 = vpop.f32.mrf.mxu0 }
 0x4bd   :  { %2758 = vmatmul.f32.gmra.mxu3 %v7209_v59 }
 0x4be   :  { %2665 = vmatmul.f32.gmra.mxu2 %v7227_v23 }
 0x4c0   :  { %v2275_v32 = vpop.f32.mrf.mxu3 }
 0x4c1   :  { %v2074_v7 = vpop.f32.mrf.mxu2  ;;  %v7375_v25 = vadd.f32 %v2275_v32, %v2067_v27 }
 0x4c2   :  { %v2075_v22 = vadd.f32 %v2074_v7, %v1947_v54  ;;  %v7437_v6 = vpop.f32.mrf.mxu0 }
 0x4c3   :  { %8923 = vst [vmem:[#allocation40_spill] sm:$0xff] %v7375_v25 }
 0x4c5   :  { %2762 = vmatmul.f32.gmra.mxu3 %v7227_v23 }
 0x4c6   :  { %2669 = vmatmul.f32.gmra.mxu2 %v7246_v44 }
 0x4c8   :  { %v2279_v38 = vpop.f32.mrf.mxu3 }
 0x4c9   :  { %v2082_v2 = vpop.f32.mrf.mxu2  ;;  %v7379_v15 = vadd.f32 %v2279_v38, %v2075_v22 }
 0x4ca   :  { %v2083_v59 = vadd.f32 %v2082_v2, %v1952_v12 }
 0x4cb   :  { %8924 = vst [vmem:[#allocation49_spill] sm:$0xff] %v7379_v15 }
 0x4cd   :  { %2766 = vmatmul.f32.gmra.mxu3 %v7246_v44 }
 0x4ce   :  { %2673 = vmatmul.f32.gmra.mxu2 %v7265_v61 }
 0x4d0   :  { %v2283_v40 = vpop.f32.mrf.mxu3 }
 0x4d1   :  { %v2090_v4 = vpop.f32.mrf.mxu2  ;;  %v7383_v42 = vadd.f32 %v2283_v40, %v2083_v59 }
 0x4d2   :  { %v2091_v23 = vadd.f32 %v2090_v4, %v1957_v31 }
 0x4d3   :  { %8925 = vst [vmem:[#allocation14_spill] sm:$0xff] %v7383_v42 }
 0x4d5   :  { %2770 = vmatmul.f32.gmra.mxu3 %v7265_v61 }
 0x4d6   :  { %2677 = vmatmul.f32.gmra.mxu2 %v7280_v62 }
 0x4d8   :  { %v2287_v57 = vpop.f32.mrf.mxu3 }
 0x4d9   :  { %v2098_v13 = vpop.f32.mrf.mxu2  ;;  %v7387_v43 = vadd.f32 %v2287_v57, %v2091_v23 }
 0x4da   :  { %v2099_v44 = vadd.f32 %v2098_v13, %v1962_v20 }
 0x4dd   :  { %2774 = vmatmul.f32.gmra.mxu3 %v7280_v62 }
 0x4de   :  { %2681 = vmatmul.f32.gmra.mxu2 %v7288_v46 }
 0x4e0   :  { %v2291_v3 = vpop.f32.mrf.mxu3 }
 0x4e1   :  { %v7391_v51 = vpop.f32.mrf.mxu2  ;;  %v7393_v37 = vadd.f32 %v2291_v3, %v2099_v44 }
 0x4e5   :  { %2778 = vmatmul.f32.gmra.mxu3 %v7288_v46 }
 0x4e6   :  { %2685 = vmatmul.f32.gmra.mxu2 %v7295_v18 }
 0x4e8   :  { %v7397_v61 = vpop.f32.mrf.mxu3 }
 0x4e9   :  { %v7399_v45 = vpop.f32.mrf.mxu2 }
 0x4ed   :  { %2782 = vmatmul.f32.gmra.mxu3 %v7295_v18 }
 0x4ee   :  { %2689 = vmatmul.f32.gmra.mxu2 %v7302_v0 }
 0x4f0   :  { %v7403_v62 = vpop.f32.mrf.mxu3 }
 0x4f1   :  { %v7405_v41 = vpop.f32.mrf.mxu2 }
 0x4f5   :  { %2786 = vmatmul.f32.gmra.mxu3 %v7302_v0 }
 0x4f6   :  { %2693 = vmatmul.f32.gmra.mxu2 %v7309_v56 }
 0x4f8   :  { %v7409_v1 = vpop.f32.mrf.mxu3 }
 0x4f9   :  { %v7411_v46 = vpop.f32.mrf.mxu2 }
 0x4fa   :  { %v2131_v42 = vadd.f32 %v7411_v46, %v7355_v8 }
 0x4fd   :  { %2790 = vmatmul.f32.gmra.mxu3 %v7309_v56  ;;  %v7432_v56 = vpop.f32.mrf.mxu1 }
 0x4fe   :  { %2697 = vmatmul.f32.gmra.mxu2 %v7316_v50 }
 0x500   :  { %v7417_v18 = vpop.f32.mrf.mxu3 }
 0x501   :  { %v7419_v31 = vpop.f32.mrf.mxu2 }
 0x505   :  { %2794 = vmatmul.f32.gmra.mxu3 %v7316_v50  ;;  %v7441_v50 = vpop.f32.mrf.mxu1 }
 0x506   :  { %2701 = vmatmul.f32.gmra.mxu2 %v7323_v60  ;;  %8926 = vst [vmem:[#allocation30_spill] sm:$0xff] %v7441_v50 }
 0x508   :  { %v7425_v0 = vpop.f32.mrf.mxu3 }
 0x509   :  { %v7427_v20 = vpop.f32.mrf.mxu2 }
 0x50d   :  { %2798 = vmatmul.f32.gmra.mxu3 %v7323_v60  ;;  %v7446_v60 = vpop.f32.mrf.mxu0  ;;  %v7452_v35 = vpop.f32.mrf.mxu1 }
 0x50e   :  { %2705 = vmatmul.f32.gmra.mxu2 %v7332_v30  ;;  %8927 = vst [vmem:[#allocation9_spill] sm:$0xff] %v7446_v60 }
 0x50f   :  { %8929 = vst [vmem:[#allocation45_spill] sm:$0xff] %v7452_v35 }
 0x510   :  { %v7435_v47 = vpop.f32.mrf.mxu3 }
 0x511   :  { %v2154_v54 = vpop.f32.mrf.mxu2 }
 0x512   :  { %v2155_v15 = vadd.f32 %v2154_v54, %v7350_v16 }
 0x515   :  { %2802 = vmatmul.f32.gmra.mxu3 %v7332_v30  ;;  %v7454_v19 = vpop.f32.mrf.mxu0  ;;  %v7460_v48 = vpop.f32.mrf.mxu1 }
 0x516   :  { %2709 = vmatmul.f32.gmra.mxu2 %v7341_v9  ;;  %8930 = vst [vmem:[#allocation50_spill] sm:$0xff] %v7454_v19 }
 0x517   :  { %8933 = vst [vmem:[#allocation24_spill] sm:$0xff] %v7460_v48 }
 0x518   :  { %v2319_v28 = vpop.f32.mrf.mxu3 }
 0x519   :  { %v7443_v58 = vpop.f32.mrf.mxu2 }
 0x51a   :  { %v2163_v8 = vadd.f32 %v7443_v58, %v7325_v10  ;;  %v2378_v10 = vadd.f32 %v7415_v21, %v7363_v53  ;;  %v2388_v53 = vadd.f32 %v7437_v6, %v7371_v52 }
 0x51d   :  { %2806 = vmatmul.f32.gmra.mxu3 %v7341_v9  ;;  %v7466_v9 = vpop.f32.mrf.mxu0  ;;  %v7468_v5 = vpop.f32.mrf.mxu1 }
 0x51e   :  { %8936 = vst [vmem:[#allocation41_spill] sm:$0xff] %v7466_v9  ;;  %v2320_v9 = vadd.f32 %v2319_v28, %v2155_v15 }
 0x51f   :  { %8937 = vst [vmem:[#allocation47_spill] sm:$0xff] %v7468_v5 }
 0x520   :  { %v7448_v63 = vpop.f32.mrf.mxu3 }
 0x521   :  { %v7450_v12 = vpop.f32.mrf.mxu2 }
 0x522   :  { %8928 = vst [vmem:[#allocation35_spill] sm:$0xff] %v7450_v12 }
 0x525   :  { %v7474_v32 = vpop.f32.mrf.mxu0  ;;  %v7476_v7 = vpop.f32.mrf.mxu1 }
 0x526   :  { %8940 = vst [vmem:[#allocation18_spill] sm:$0xff] %v7476_v7 }
 0x528   :  { %v7456_v30 = vpop.f32.mrf.mxu3 }
 0x529   :  { %8931 = vst [vmem:[#allocation54_spill] sm:$0xff] %v7456_v30  ;;  %v7458_v33 = vpop.f32.mrf.mxu2 }
 0x52a   :  { %8932 = vst [vmem:[#allocation52_spill] sm:$0xff] %v7458_v33 }
 0x52d   :  { %v7482_v2 = vpop.f32.mrf.mxu0  ;;  %v7488_v4 = vpop.f32.mrf.mxu1 }
 0x52e   :  { %8945 = vst [vmem:[#allocation27_spill] sm:$0xff] %v7488_v4  ;;  %v2413_v21 = vadd.f32 %v7482_v2, %v7393_v37 }
 0x530   :  { %v7462_v14 = vpop.f32.mrf.mxu3 }
 0x531   :  { %8934 = vst [vmem:[#allocation6_spill] sm:$0xff] %v7462_v14  ;;  %v7464_v29 = vpop.f32.mrf.mxu2 }
 0x532   :  { %8935 = vst [vmem:[#allocation20_spill] sm:$0xff] %v7464_v29 }
 0x535   :  { %v7490_v23 = vpop.f32.mrf.mxu0  ;;  %v7496_v44 = vpop.f32.mrf.mxu1 }
 0x536   :  { %8948 = vst [vmem:[#allocation48_spill] sm:$0xff] %v7496_v44 }
 0x538   :  { %v7470_v11 = vpop.f32.mrf.mxu3 }
 0x539   :  { %8938 = vst [vmem:[#allocation53_spill] sm:$0xff] %v7470_v11  ;;  %v7472_v27 = vpop.f32.mrf.mxu2 }
 0x53a   :  { %8939 = vst [vmem:[#allocation16_spill] sm:$0xff] %v7472_v27 }
 0x53d   :  { %v2422_v14 = vpop.f32.mrf.mxu0  ;;  %v7502_v12 = vpop.f32.mrf.mxu1 }
 0x540   :  { %v7478_v22 = vpop.f32.mrf.mxu3 }
 0x541   :  { %8941 = vst [vmem:[#allocation37_spill] sm:$0xff] %v7478_v22  ;;  %v7480_v38 = vpop.f32.mrf.mxu2 }
 0x542   :  { %8942 = vst [vmem:[#allocation44_spill] sm:$0xff] %v7480_v38 }
 0x545   :  { %v2427_v22 = vpop.f32.mrf.mxu0  ;;  %v2551_v29 = vpop.f32.mrf.mxu1 }
 0x548   :  { %v7484_v59 = vpop.f32.mrf.mxu3 }
 0x549   :  { %8943 = vst [vmem:[#allocation51_spill] sm:$0xff] %v7484_v59  ;;  %v7486_v40 = vpop.f32.mrf.mxu2 }
 0x54a   :  { %8944 = vst [vmem:[#allocation17_spill] sm:$0xff] %v7486_v40 }
 0x550   :  { %v7492_v57 = vpop.f32.mrf.mxu3 }
 0x551   :  { %8946 = vst [vmem:[#allocation23_spill] sm:$0xff] %v7492_v57  ;;  %v7494_v13 = vpop.f32.mrf.mxu2  ;;  %v2432_v57 = vpop.f32.mrf.mxu0 }
 0x552   :  { %8947 = vst [vmem:[#allocation42_spill] sm:$0xff] %v7494_v13 }
 0x558   :  { %v7498_v3 = vpop.f32.mrf.mxu3 }
 0x559   :  { %8949 = vst [vmem:[#allocation11_spill] sm:$0xff] %v7498_v3  ;;  %v7500_v30 = vpop.f32.mrf.mxu2  ;;  %v2557_v3 = vpop.f32.mrf.mxu1 }
 0x55a   :  { %8950 = vst [vmem:[#allocation7_spill] sm:$0xff] %v7500_v30  ;;  %v2437_v40 = vpop.f32.mrf.mxu0 }
 0x560   :  { %v7504_v11 = vpop.f32.mrf.mxu3 }
 0x561   :  { %8951 = vst [vmem:[#allocation38_spill] sm:$0xff] %v7504_v11  ;;  %v7506_v33 = vpop.f32.mrf.mxu2  ;;  %v2563_v5 = vpop.f32.mrf.mxu1 }
 0x562   :  { %8952 = vst [vmem:[#allocation46_spill] sm:$0xff] %v7506_v33  ;;  %v2442_v25 = vpop.f32.mrf.mxu0  ;;  %v2139_v33 = vadd.f32 %v7419_v31, %v7335_v49  ;;  %v2115_v49 = vadd.f32 %v7399_v45, %v7347_v17 }
 0x564   :  { %v2312_v50 = vadd.f32 %v7425_v0, %v2139_v33  ;;  %v2300_v46 = vadd.f32 %v7403_v62, %v2115_v49 }
 0x566   :  { %v2423_v28 = vadd.f32 %v2422_v14, %v2300_v46  ;;  %v8968_v46 = vld [vmem:[#allocation18_spill] sm:$0xff] }
 0x568   :  { %v7508_v59 = vpop.f32.mrf.mxu3 }
 0x569   :  { %8953 = vst [vmem:[#allocation15_spill] sm:$0xff] %v7508_v59  ;;  %v7510_v27 = vpop.f32.mrf.mxu2  ;;  %v2569_v30 = vpop.f32.mrf.mxu1  ;;  %v2147_v59 = vadd.f32 %v7427_v20, %v7344_v36  ;;  %v2123_v36 = vadd.f32 %v7405_v41, %v7352_v39 }
 0x56a   :  { %8954 = vst [vmem:[#allocation32_spill] sm:$0xff] %v7510_v27 }
 0x56b   :  { %v2316_v4 = vadd.f32 %v7435_v47, %v2147_v59  ;;  %v2304_v15 = vadd.f32 %v7409_v1, %v2123_v36  ;;  %v2438_v47 = vadd.f32 %v2437_v40, %v2312_v50  ;;  %v8957_v59 = vld [vmem:[#allocation48_spill] sm:$0xff]  ;;  %v8964_v36 = vld [vmem:[#allocation46_spill] sm:$0xff] }
 0x56d   :  { %v2443_v16 = vadd.f32 %v2442_v25, %v2316_v4  ;;  %v2324_v25 = vadd.f32 %v7448_v63, %v2163_v8  ;;  %v2428_v45 = vadd.f32 %v2427_v22, %v2304_v15  ;;  %v2564_v54 = vadd.f32 %v2563_v5, %v2438_v47  ;;  %v8966_v47 = vld [vmem:[#allocation49_spill] sm:$0xff]  ;;  %v8967_v8 = vld [vmem:[#allocation50_spill] sm:$0xff] }
 0x56e   :  { %v2383_v63 = vadd.f32 %v7429_v26, %v7367_v34  ;;  %v7546_v22 = vadd.f32 %v7421_v24, %v2378_v10  ;;  %v2408_v24 = vadd.f32 %v7474_v32, %v7387_v43  ;;  %v8972_v10 = vld [vmem:[#allocation9_spill] sm:$0xff] }
 0x56f   :  { %v2570_v0 = vadd.f32 %v2569_v30, %v2443_v16 }
 0x570   :  { %v7512_v38 = vpop.f32.mrf.mxu3 }
 0x571   :  { %8955 = vst [vmem:[#allocation33_spill] sm:$0xff] %v7512_v38  ;;  %v7514_v35 = vpop.f32.mrf.mxu2  ;;  %v2447_v38 = vpop.f32.mrf.mxu0  ;;  %v8958_v52 = vld [vmem:[#allocation32_spill] sm:$0xff] }
 0x572   :  { %v2575_v27 = vpop.f32.mrf.mxu1  ;;  %v2448_v20 = vadd.f32 %v2447_v38, %v2320_v9  ;;  %v2552_v9 = vadd.f32 %v2551_v29, %v2428_v45 }
 0x574   :  { %v2576_v39 = vadd.f32 %v2575_v27, %v2448_v20  ;;  %v2691_v26 = vadd.f32 %v7514_v35, %v2552_v9 }
 0x578   :  { %v7516_v48 = vpop.f32.mrf.mxu3  ;;  %v8965_v32 = vld [vmem:[#allocation33_spill] sm:$0xff] }
 0x579   :  { %8956 = vst [vmem:[#allocation43_spill] sm:$0xff] %v7516_v48  ;;  %v2694_v13 = vpop.f32.mrf.mxu2  ;;  %v2308_v48 = vadd.f32 %v7417_v18, %v2131_v42  ;;  %v2107_v42 = vadd.f32 %v7391_v51, %v7359_v55  ;;  %v2452_v17 = vpop.f32.mrf.mxu0 }
 0x57a   :  { %v2453_v51 = vadd.f32 %v2452_v17, %v2324_v25  ;;  %v8970_v25 = vld [vmem:[#allocation15_spill] sm:$0xff] }
 0x57b   :  { %v2433_v18 = vadd.f32 %v2432_v57, %v2308_v48  ;;  %v2296_v41 = vadd.f32 %v7397_v61, %v2107_v42  ;;  %v2581_v48 = vpop.f32.mrf.mxu1  ;;  %v8960_v57 = vld [vmem:[#allocation30_spill] sm:$0xff]  ;;  %v2398_v42 = vadd.f32 %v8967_v8, %v8966_v47  ;;  %v8985_v8 = vld [vmem:[#allocation37_spill] sm:$0xff] }
 0x57c   :  { %v2582_v34 = vadd.f32 %v2581_v48, %v2453_v51  ;;  %v2504_v35 = vadd.f32 %v8960_v57, %v2388_v53  ;;  %v8974_v51 = vld [vmem:[#allocation42_spill] sm:$0xff] }
 0x57d   :  { %v2558_v58 = vadd.f32 %v2557_v3, %v2433_v18  ;;  %v2418_v61 = vadd.f32 %v7490_v23, %v2296_v41  ;;  %v2528_v18 = vadd.f32 %v8968_v46, %v2408_v24  ;;  %v8979_v24 = vld [vmem:[#allocation45_spill] sm:$0xff] }
 0x57f   :  { %v2695_v5 = vadd.f32 %v2694_v13, %v2558_v58  ;;  %v2540_v40 = vadd.f32 %v8957_v59, %v2418_v61  ;;  %v8962_v13 = vld [vmem:[#allocation41_spill] sm:$0xff]  ;;  %v8973_v58 = vld [vmem:[#allocation47_spill] sm:$0xff] }
 0x580   :  { %v2791_v11 = vpop.f32.mrf.mxu3  ;;  %v8959_v4 = vld [vmem:[#allocation43_spill] sm:$0xff] }
 0x581   :  { %v2698_v60 = vpop.f32.mrf.mxu2  ;;  %v2792_v38 = vadd.f32 %v2791_v11, %v2695_v5  ;;  %v2788_v37 = vadd.f32 %v8959_v4, %v2691_v26  ;;  %v8961_v11 = vld [vmem:[#allocation14_spill] sm:$0xff]  ;;  %v2683_v16 = vadd.f32 %v8964_v36, %v2540_v40  ;;  %v8976_v5 = vld [vmem:[#allocation24_spill] sm:$0xff] }
 0x582   :  { %v2699_v62 = vadd.f32 %v2698_v60, %v2564_v54  ;;  %v2546_v60 = vadd.f32 %v7502_v12, %v2423_v28  ;;  %v8980_v40 = vld [vmem:[#allocation44_spill] sm:$0xff] }
 0x583   :  { %v2821_v49 = vmax.f32 %v2792_v38, 0.0  ;;  %v7577_v41 = vadd.f32 %v8970_v25, %v2683_v16  ;;  %v2820_v17 = vmax.f32 %v2788_v37, 0.0 }
 0x584   :  { %v2687_v6 = vadd.f32 %v8958_v52, %v2546_v60 }
 0x585   :  { %v7591_v61 = vand.u32 4294901760, %v2821_v49 }
 0x586   :  { %v2784_v20 = vadd.f32 %v8965_v32, %v2687_v6  ;;  %v8981_v6 = vld [vmem:[#allocation23_spill] sm:$0xff] }
 0x588   :  { %v2795_v7 = vpop.f32.mrf.mxu3 }
 0x589   :  { %v2702_v19 = vpop.f32.mrf.mxu2 }
 0x58a   :  { %v2703_v1 = vadd.f32 %v2702_v19, %v2570_v0  ;;  %v2796_v19 = vadd.f32 %v2795_v7, %v2699_v62  ;;  %v7555_v7 = vadd.f32 %v7432_v56, %v2383_v63  ;;  %v8963_v56 = vld [vmem:[#allocation27_spill] sm:$0xff]  ;;  %v2675_v62 = vadd.f32 %v8974_v51, %v2528_v18 }
 0x58b   :  { %v2534_v3 = vadd.f32 %v8963_v56, %v2413_v21  ;;  %v8969_v0 = vld [vmem:[#allocation7_spill] sm:$0xff]  ;;  %v2819_v63 = vmax.f32 %v2784_v20, 0.0 }
 0x58c   :  { %v2822_v2 = vmax.f32 %v2796_v19, 0.0  ;;  %v2516_v19 = vadd.f32 %v8976_v5, %v2398_v42  ;;  %v8978_v21 = vld [vmem:[#allocation11_spill] sm:$0xff] }
 0x58d   :  { %v7601_v60 = vadd.f32 %v8978_v21, %v2675_v62  ;;  %v8983_v56 = vld [vmem:[#allocation51_spill] sm:$0xff] }
 0x58e   :  { %v7579_v45 = vand.u32 4294901760, %v2822_v2  ;;  %v2667_v52 = vadd.f32 %v8980_v40, %v2516_v19  ;;  %v8988_v62 = vld [vmem:[#allocation35_spill] sm:$0xff] }
 0x58f   :  { %v2816_v36 = vmax.f32 %v7601_v60, 0.0 }
 0x590   :  { %v2799_v44 = vpop.f32.mrf.mxu3  ;;  %v7612_v38 = vsub.f32 %v2822_v2, %v7579_v45  ;;  %v7627_v2 = vsub.f32 %v2821_v49, %v7591_v61 }
 0x591   :  { %v2706_v31 = vpop.f32.mrf.mxu2  ;;  %v2800_v33 = vadd.f32 %v2799_v44, %v2703_v1  ;;  %v2403_v44 = vadd.f32 %v8962_v13, %v8961_v11  ;;  %v8982_v13 = vld [vmem:[#allocation16_spill] sm:$0xff] }
 0x592   :  { %v2707_v50 = vadd.f32 %v2706_v31, %v2576_v39  ;;  %v2679_v39 = vadd.f32 %v8969_v0, %v2534_v3  ;;  %v7632_v3 = vadd.f32 %v8983_v56, %v2667_v52  ;;  %v3121_v49 = vand.u32 4294901760, %v7612_v38 }
 0x593   :  { %v2823_v29 = vmax.f32 %v2800_v33, 0.0  ;;  %v8975_v33 = vld [vmem:[#allocation38_spill] sm:$0xff]  ;;  %v3127_v25 = vand.u32 4294901760, %v7627_v2 }
 0x595   :  { %v7570_v31 = vand.u32 4294901760, %v2823_v29 }
 0x597   :  { %v7596_v9 = vsub.f32 %v2823_v29, %v7570_v31 }
 0x598   :  { %v2803_v55 = vpop.f32.mrf.mxu3 }
 0x599   :  { %v2804_v30 = vadd.f32 %v2803_v55, %v2707_v50  ;;  %v2710_v14 = vpop.f32.mrf.mxu2  ;;  %v8971_v50 = vld [vmem:[#allocation40_spill] sm:$0xff]  ;;  %v2522_v55 = vadd.f32 %v8973_v58, %v2403_v44  ;;  %v3115_v11 = vand.u32 4294901760, %v7596_v9 }
 0x59a   :  { %v2711_v12 = vadd.f32 %v2710_v14, %v2582_v34  ;;  %v2393_v28 = vadd.f32 %v8972_v10, %v8971_v50  ;;  %v2818_v14 = vmax.f32 %v7577_v41, 0.0  ;;  %v7604_v34 = vand.u32 4294901760, %v2820_v17  ;;  %v8986_v41 = vld [vmem:[#allocation52_spill] sm:$0xff] }
 0x59b   :  { %v2824_v27 = vmax.f32 %v2804_v30, 0.0  ;;  %v7589_v30 = vadd.f32 %v8975_v33, %v2679_v39  ;;  %v3116_v39 = vsub.f32 %v7596_v9, %v3115_v11  ;;  %v2814_v10 = vmax.f32 %v7632_v3, 0.0 }
 0x59c   :  { %v2510_v59 = vadd.f32 %v8979_v24, %v2393_v28  ;;  %v7635_v16 = vand.u32 4294901760, %v2818_v14  ;;  %v7647_v20 = vsub.f32 %v2820_v17, %v7604_v34  ;;  %v2655_v17 = vadd.f32 %v8986_v41, %v7555_v7 }
 0x59d   :  { %v7562_v23 = vand.u32 4294901760, %v2824_v27  ;;  %v2817_v37 = vmax.f32 %v7589_v30, 0.0  ;;  %v7673_v28 = vand.u32 4294901760, %v2816_v36  ;;  %v2651_v33 = vadd.f32 %v8988_v62, %v7546_v22  ;;  %v8989_v30 = vld [vmem:[#allocation6_spill] sm:$0xff] }
 0x59e   :  { %v2663_v44 = vadd.f32 %v8982_v13, %v2510_v59  ;;  %v7681_v51 = vsub.f32 %v2818_v14, %v7635_v16  ;;  %v3133_v7 = vand.u32 4294901760, %v7647_v20  ;;  %v3128_v22 = vsub.f32 %v7627_v2, %v3127_v25  ;;  %v8990_v14 = vld [vmem:[#allocation54_spill] sm:$0xff] }
 0x59f   :  { %v7582_v1 = vsub.f32 %v2824_v27, %v7562_v23  ;;  %v8977_v27 = vld [vmem:[#allocation17_spill] sm:$0xff]  ;;  %v7655_v18 = vand.u32 4294901760, %v2817_v37  ;;  %v7706_v24 = vadd.f32 %v8990_v14, %v2651_v33  ;;  %v7709_v40 = vand.u32 4294901760, %v2814_v10 }
 0x5a0   :  { %v2807_v43 = vpop.f32.mrf.mxu3  ;;  %v2671_v53 = vadd.f32 %v8977_v27, %v2522_v55  ;;  %v7652_v42 = vadd.f32 %v8985_v8, %v2663_v44  ;;  %v3122_v55 = vsub.f32 %v7612_v38, %v3121_v49  ;;  %v4883_v27 = vld [vmem:[%s8718_s3 + $0x100] sm:$0xff]  ;;  %v7714_v52 = vsub.f32 %v2816_v36, %v7673_v28 }
 0x5a1   :  { %v2808_v15 = vadd.f32 %v2807_v43, %v2711_v12  ;;  %v3109_v29 = vand.u32 4294901760, %v7582_v1  ;;  %v7621_v12 = vand.u32 4294901760, %v2819_v63  ;;  %v7702_v21 = vsub.f32 %v2817_v37, %v7655_v18 }
 0x5a2   :  { %v7618_v4 = vadd.f32 %v8981_v6, %v2671_v53  ;;  %v2813_v5 = vmax.f32 %v7652_v42, 0.0  ;;  %v3117_v53 = vand.u32 4294901760, %v3116_v39  ;;  %v3123_v6 = vand.u32 4294901760, %v3122_v55 }
 0x5a3   :  { %v2825_v54 = vmax.f32 %v2808_v15, 0.0  ;;  %v3110_v32 = vsub.f32 %v7582_v1, %v3109_v29  ;;  %v8984_v15 = vld [vmem:[#allocation20_spill] sm:$0xff]  ;;  %v3145_v37 = vand.u32 4294901760, %v7681_v51  ;;  %v7721_v13 = vand.u32 4294901760, %v4883_v27 }
 0x5a4   :  { %v2659_v47 = vadd.f32 %v8984_v15, %v2504_v35  ;;  %v2815_v46 = vmax.f32 %v7618_v4, 0.0  ;;  %v7664_v35 = vsub.f32 %v2819_v63, %v7621_v12  ;;  %v7687_v63 = vadd.f32 %v8989_v30, %v2655_v17  ;;  %v4884_v17 = vld [vmem:[%s8718_s3 + $0x108] sm:$0xff] }
 0x5a5   :  { %v7593_v48 = vand.u32 4294901760, %v2825_v54  ;;  %v3111_v58 = vand.u32 4294901760, %v3110_v32  ;;  %v3134_v4 = vsub.f32 %v7647_v20, %v3133_v7  ;;  %v7724_v56 = vand.u32 4294901760, %v2813_v5 }
 0x5a6   :  { %v7690_v19 = vand.u32 4294901760, %v2815_v46  ;;  %v3139_v60 = vand.u32 4294901760, %v7664_v35  ;;  %v2811_v44 = vmax.f32 %v7687_v63, 0.0  ;;  %v3129_v3 = vand.u32 4294901760, %v3128_v22 }
 0x5a7   :  { %v7607_v26 = vsub.f32 %v2825_v54, %v7593_v48  ;;  %2941 = vmatpush.msrb.mxu0 %v7593_v48  ;;  %3392 = vmatpush.msrb.mxu3 %v7593_v48  ;;  %v8987_v54 = vld [vmem:[#allocation53_spill] sm:$0xff]  ;;  %v3151_v32 = vand.u32 4294901760, %v7702_v21  ;;  %v2810_v15 = vmax.f32 %v7706_v24, 0.0  ;;  %v7742_v8 = vsub.f32 %v2814_v10, %v7709_v40 }
 0x5a8   :  { %v7670_v50 = vadd.f32 %v8987_v54, %v2659_v47  ;;  %v3140_v36 = vsub.f32 %v7664_v35, %v3139_v60  ;;  %v3135_v42 = vand.u32 4294901760, %v3134_v4  ;;  %v7750_v39 = vsub.f32 %v4883_v27, %v7721_v13 }
 0x5a9   :  { %v3103_v57 = vand.u32 4294901760, %v7607_v26  ;;  %2943 = vmatpush.msrb.mxu0 %v7562_v23  ;;  %3264 = vmatpush.msrb.mxu2 %v7607_v26  ;;  %v7752_v41 = vand.u32 4294901760, %v2811_v44  ;;  %v7764_v10 = vsub.f32 %v2813_v5, %v7724_v56  ;;  %v7767_v55 = vand.u32 4294901760, %v2810_v15 }
 0x5aa   :  { %3394 = vmatpush.msrb.mxu3 %v7562_v23  ;;  %v2812_v59 = vmax.f32 %v7670_v50, 0.0  ;;  %v3141_v54 = vand.u32 4294901760, %v3140_v36  ;;  %v3152_v50 = vsub.f32 %v7702_v21, %v3151_v32  ;;  %v3169_v33 = vand.u32 4294901760, %v7742_v8 }
 0x5ab   :  { %2945 = vmatpush.msrb.mxu0 %v7570_v31  ;;  %3267 = vmatpush.msrb.mxu2 %v7582_v1  ;;  %v3104_v43 = vsub.f32 %v7607_v26, %v3103_v57  ;;  %v2974_v5 = vand.u32 4294901760, %v7750_v39  ;;  %v7780_v27 = vand.u32 4294901760, %v4884_v17  ;;  %v7789_v14 = vsub.f32 %v2811_v44, %v7752_v41 }
 0x5ac   :  { %3396 = vmatpush.msrb.mxu3 %v7570_v31  ;;  %v7737_v47 = vand.u32 4294901760, %v2812_v59  ;;  %v8749_v24 = vand.u32 4294901760, %v7764_v10  ;;  %v3170_v44 = vsub.f32 %v7742_v8, %v3169_v33 }
 0x5ad   :  { %2947 = vmatpush.msrb.mxu0 %v7579_v45  ;;  %3270 = vmatpush.msrb.mxu2 %v7596_v9  ;;  %v3105_v0 = vand.u32 4294901760, %v3104_v43  ;;  %v7733_v43 = vsub.f32 %v2815_v46, %v7690_v19  ;;  %v3146_v46 = vsub.f32 %v7681_v51, %v3145_v37  ;;  %v2981_v36 = vsub.f32 %v4884_v17, %v7780_v27  ;;  %v4887_v9 = vld [vmem:[%s8718_s3 + $0x120] sm:$0xff] }
 0x5ae   :  { %3398 = vmatpush.msrb.mxu3 %v7579_v45  ;;  %v7772_v62 = vsub.f32 %v2812_v59, %v7737_v47  ;;  %v7795_v59 = vsub.f32 %v2810_v15, %v7767_v55  ;;  %v4885_v15 = vld [vmem:[%s8718_s3 + $0x110] sm:$0xff] }
 0x5af   :  { %2949 = vmatpush.msrb.mxu0 %v7591_v61  ;;  %3106 = vmatpush.msrb.mxu1 %v3105_v0  ;;  %v3157_v0 = vand.u32 4294901760, %v7714_v52  ;;  %v3147_v30 = vand.u32 4294901760, %v3146_v46  ;;  %v3176_v46 = vsub.f32 %v7764_v10, %v8749_v24 }
 0x5b0   :  { %3273 = vmatpush.msrb.mxu2 %v7612_v38  ;;  %3400 = vmatpush.msrb.mxu3 %v7591_v61 }
 0x5b1   :  { %2951 = vmatpush.msrb.mxu0 %v7604_v34  ;;  %3112 = vmatpush.msrb.mxu1 %v3111_v58  ;;  %v3163_v58 = vand.u32 4294901760, %v7733_v43  ;;  %v3158_v63 = vsub.f32 %v7714_v52, %v3157_v0 }
 0x5b2   :  { %3276 = vmatpush.msrb.mxu2 %v7627_v2  ;;  %3402 = vmatpush.msrb.mxu3 %v7604_v34  ;;  %v4888_v2 = vld [vmem:[%s8718_s3 + $0x128] sm:$0xff] }
 0x5b3   :  { %2953 = vmatpush.msrb.mxu0 %v7621_v12  ;;  %3118 = vmatpush.msrb.mxu1 %v3117_v53  ;;  %v3153_v53 = vand.u32 4294901760, %v3152_v50  ;;  %v3164_v22 = vsub.f32 %v7733_v43, %v3163_v58  ;;  %v3159_v4 = vand.u32 4294901760, %v3158_v63  ;;  %v3193_v50 = vand.u32 4294901760, %v7795_v59 }
 0x5b4   :  { %3279 = vmatpush.msrb.mxu2 %v7647_v20  ;;  %3404 = vmatpush.msrb.mxu3 %v7621_v12  ;;  %v8991_v20 = vand.u32 4294901760, %v7764_v10 }
 0x5b5   :  { %2955 = vmatpush.msrb.mxu0 %v7635_v16  ;;  %3124 = vmatpush.msrb.mxu1 %v3123_v6  ;;  %v8748_v6 = vand.u32 4294901760, %v7772_v62 }
 0x5b6   :  { %3282 = vmatpush.msrb.mxu2 %v7664_v35  ;;  %3406 = vmatpush.msrb.mxu3 %v7635_v16 }
 0x5b7   :  { %2957 = vmatpush.msrb.mxu0 %v7655_v18  ;;  %3130 = vmatpush.msrb.mxu1 %v3129_v3  ;;  %v2975_v3 = vsub.f32 %v7750_v39, %v2974_v5  ;;  %v3182_v17 = vsub.f32 %v7772_v62, %v8748_v6 }
 0x5b8   :  { %3285 = vmatpush.msrb.mxu2 %v7681_v51  ;;  %3408 = vmatpush.msrb.mxu3 %v7655_v18 }
 0x5b9   :  { %2959 = vmatpush.msrb.mxu0 %v7673_v28  ;;  %3136 = vmatpush.msrb.mxu1 %v3135_v42  ;;  %v3165_v42 = vand.u32 4294901760, %v3164_v22  ;;  %v2976_v63 = vand.u32 4294901760, %v2975_v3  ;;  %v7821_v22 = vand.u32 4294901760, %v4885_v15  ;;  %v3194_v3 = vsub.f32 %v7795_v59, %v3193_v50 }
 0x5ba   :  { %3288 = vmatpush.msrb.mxu2 %v7702_v21  ;;  %3410 = vmatpush.msrb.mxu3 %v7673_v28 }
 0x5bb   :  { %2961 = vmatpush.msrb.mxu0 %v7690_v19  ;;  %3142 = vmatpush.msrb.mxu1 %v3141_v54  ;;  %v3187_v54 = vand.u32 4294901760, %v7789_v14  ;;  %v2989_v24 = vsub.f32 %v4885_v15, %v7821_v22 }
 0x5bc   :  { %3291 = vmatpush.msrb.mxu2 %v7714_v52  ;;  %3412 = vmatpush.msrb.mxu3 %v7690_v19 }
 0x5bd   :  { %2963 = vmatpush.msrb.mxu0 %v7709_v40  ;;  %3148 = vmatpush.msrb.mxu1 %v3147_v30  ;;  %v3171_v30 = vand.u32 4294901760, %v3170_v44  ;;  %v3188_v6 = vsub.f32 %v7789_v14, %v3187_v54  ;;  %v3183_v44 = vand.u32 4294901760, %v3182_v17 }
 0x5be   :  { %3294 = vmatpush.msrb.mxu2 %v7733_v43  ;;  %3414 = vmatpush.msrb.mxu3 %v7709_v40 }
 0x5bf   :  { %2965 = vmatpush.msrb.mxu0 %v7724_v56  ;;  %3154 = vmatpush.msrb.mxu1 %v3153_v53  ;;  %v2982_v53 = vand.u32 4294901760, %v2981_v36  ;;  %v3189_v17 = vand.u32 4294901760, %v3188_v6  ;;  %v4894_v6 = vld [vmem:[%s8718_s3 + $0x158] sm:$0xff] }
 0x5c0   :  { %3297 = vmatpush.msrb.mxu2 %v7742_v8  ;;  %3416 = vmatpush.msrb.mxu3 %v7724_v56 }
 0x5c1   :  { %2967 = vmatpush.msrb.mxu0 %v7737_v47  ;;  %3160 = vmatpush.msrb.mxu1 %v3159_v4  ;;  %v3177_v4 = vand.u32 4294901760, %v3176_v46  ;;  %v4886_v46 = vld [vmem:[%s8718_s3 + $0x118] sm:$0xff] }
 0x5c2   :  { %3300 = vmatpush.msrb.mxu2 %v7764_v10  ;;  %3418 = vmatpush.msrb.mxu3 %v7737_v47  ;;  %v7844_v26 = vand.u32 4294901760, %v4886_v46 }
 0x5c3   :  { %2969 = vmatpush.msrb.mxu0 %v7752_v41  ;;  %3166 = vmatpush.msrb.mxu1 %v3165_v42  ;;  %v2983_v42 = vsub.f32 %v2981_v36, %v2982_v53 }
 0x5c4   :  { %3303 = vmatpush.msrb.mxu2 %v7772_v62  ;;  %3420 = vmatpush.msrb.mxu3 %v7752_v41 }
 0x5c5   :  { %2971 = vmatpush.msrb.mxu0 %v7767_v55  ;;  %3172 = vmatpush.msrb.mxu1 %v3171_v30  ;;  %v3195_v30 = vand.u32 4294901760, %v3194_v3  ;;  %v2984_v15 = vand.u32 4294901760, %v2983_v42 }
 0x5c6   :  { %3306 = vmatpush.msrb.mxu2 %v7789_v14  ;;  %3422 = vmatpush.msrb.mxu3 %v7767_v55 }
 0x5c7   :  { %2977 = vmatmul.f32.vlgmr.msrb.gmra.mxu0 %v2976_v63  ;;  %3178 = vmatpush.msrb.mxu1 %v3177_v4  ;;  %v2990_v63 = vand.u32 4294901760, %v2989_v24 }
 0x5c8   :  { %3523 = vmatpush.msra.mxu0 %v3103_v57  ;;  %3309 = vmatpush.msrb.mxu2 %v7795_v59  ;;  %v7862_v57 = vand.u32 4294901760, %v4887_v9 }
 0x5c9   :  { %3184 = vmatpush.msrb.mxu1 %v3183_v44  ;;  %3312 = vmatmul.f32.vlgmr.msrb.gmra.mxu2 %v7750_v39  ;;  %v2991_v1 = vsub.f32 %v2989_v24, %v2990_v63  ;;  %v4895_v44 = vld [vmem:[%s8718_s3 + $0x160] sm:$0xff] }
 0x5ca   :  { %3527 = vmatpush.msra.mxu0 %v3109_v29  ;;  %3426 = vmatmul.f32.vlgmr.msrb.gmra.mxu3 %v2974_v5  ;;  %v2997_v29 = vsub.f32 %v4886_v46, %v7844_v26  ;;  %v7951_v46 = vand.u32 4294901760, %v4895_v44 }
 0x5cb   :  { %3190 = vmatpush.msrb.mxu1 %v3189_v17 }
 0x5cc   :  { %3531 = vmatpush.msra.mxu0 %v3115_v11  ;;  %v2998_v38 = vand.u32 4294901760, %v2997_v29  ;;  %v7881_v11 = vand.u32 4294901760, %v4888_v2 }
 0x5cd   :  { %3196 = vmatpush.msrb.mxu1 %v3195_v30  ;;  %v3069_v30 = vsub.f32 %v4895_v44, %v7951_v46 }
 0x5ce   :  { %3535 = vmatpush.msra.mxu0 %v3121_v49  ;;  %3198 = vmatmul.f32.vlgmr.msrb.gmra.mxu1 %v7721_v13  ;;  %v4889_v49 = vld [vmem:[%s8718_s3 + $0x130] sm:$0xff] }
 0x5cf   :  { %2985 = vmatmul.f32.gmra.mxu0 %v2984_v15  ;;  %3650 = vmatpush.msra.mxu1 %v7593_v48  ;;  %v2992_v48 = vand.u32 4294901760, %v2991_v1  ;;  %v4896_v15 = vld [vmem:[%s8718_s3 + $0x168] sm:$0xff]  ;;  %v3070_v1 = vand.u32 4294901760, %v3069_v30 }
 0x5d0   :  { %3539 = vmatpush.msra.mxu0 %v3127_v25  ;;  %v7900_v25 = vand.u32 4294901760, %v4889_v49 }
 0x5d1   :  { %3652 = vmatpush.msra.mxu1 %v7562_v23  ;;  %3317 = vmatmul.f32.gmra.mxu2 %v2981_v36  ;;  %v2999_v23 = vsub.f32 %v2997_v29, %v2998_v38 }
 0x5d2   :  { %3543 = vmatpush.msra.mxu0 %v3133_v7  ;;  %3432 = vmatmul.f32.gmra.mxu3 %v2982_v53  ;;  %v3021_v51 = vsub.f32 %v4889_v49, %v7900_v25  ;;  %v4890_v7 = vld [vmem:[%s8718_s3 + $0x138] sm:$0xff] }
 0x5d3   :  { %3654 = vmatpush.msra.mxu1 %v7570_v31  ;;  %v3005_v31 = vsub.f32 %v4887_v9, %v7862_v57  ;;  %v3071_v9 = vsub.f32 %v3069_v30, %v3070_v1 }
 0x5d4   :  { %3547 = vmatpush.msra.mxu0 %v3139_v60  ;;  %v3022_v21 = vand.u32 4294901760, %v3021_v51  ;;  %v7915_v60 = vand.u32 4294901760, %v4890_v7 }
 0x5d5   :  { %3656 = vmatpush.msra.mxu1 %v7579_v45  ;;  %v3000_v45 = vand.u32 4294901760, %v2999_v23  ;;  %v3072_v23 = vand.u32 4294901760, %v3071_v9 }
 0x5d6   :  { %3551 = vmatpush.msra.mxu0 %v3145_v37  ;;  %3202 = vmatmul.f32.gmra.mxu1 %v7780_v27  ;;  %v3029_v52 = vsub.f32 %v4890_v7, %v7915_v60  ;;  %v4891_v37 = vld [vmem:[%s8718_s3 + $0x140] sm:$0xff] }
 0x5d7   :  { %2993 = vmatmul.f32.gmra.mxu0 %v2992_v48  ;;  %3658 = vmatpush.msra.mxu1 %v7591_v61  ;;  %v3006_v61 = vand.u32 4294901760, %v3005_v31 }
 0x5d8   :  { %3555 = vmatpush.msra.mxu0 %v3151_v32  ;;  %v3030_v43 = vand.u32 4294901760, %v3029_v52  ;;  %v7923_v32 = vand.u32 4294901760, %v4891_v37 }
 0x5d9   :  { %3660 = vmatpush.msra.mxu1 %v7604_v34  ;;  %3322 = vmatmul.f32.gmra.mxu2 %v2989_v24  ;;  %v3007_v34 = vsub.f32 %v3005_v31, %v3006_v61 }
 0x5da   :  { %3559 = vmatpush.msra.mxu0 %v3157_v0  ;;  %3438 = vmatmul.f32.gmra.mxu3 %v2990_v63  ;;  %v3037_v8 = vsub.f32 %v4891_v37, %v7923_v32  ;;  %v4892_v0 = vld [vmem:[%s8718_s3 + $0x148] sm:$0xff] }
 0x5db   :  { %3662 = vmatpush.msra.mxu1 %v7621_v12  ;;  %v3013_v12 = vsub.f32 %v4888_v2, %v7881_v11  ;;  %v7930_v10 = vand.u32 4294901760, %v4892_v0 }
 0x5dc   :  { %3563 = vmatpush.msra.mxu0 %v3163_v58 }
 0x5dd   :  { %3664 = vmatpush.msra.mxu1 %v7635_v16  ;;  %v8992_v16 = vand.u32 4294901760, %v7772_v62  ;;  %v3014_v35 = vand.u32 4294901760, %v3013_v12  ;;  %v4893_v62 = vld [vmem:[%s8718_s3 + $0x150] sm:$0xff] }
 0x5de   :  { %3567 = vmatpush.msra.mxu0 %v3169_v33  ;;  %3206 = vmatmul.f32.gmra.mxu1 %v7821_v22  ;;  %v7937_v14 = vand.u32 4294901760, %v4893_v62 }
 0x5df   :  { %3001 = vmatmul.f32.gmra.mxu0 %v3000_v45  ;;  %3666 = vmatpush.msra.mxu1 %v7655_v18  ;;  %v3008_v18 = vand.u32 4294901760, %v3007_v34  ;;  %v4898_v34 = vld [vmem:[%s8718_s3 + $0x178] sm:$0xff] }
 0x5e0   :  { %3571 = vmatpush.msra.mxu0 %v8991_v20  ;;  %v3053_v59 = vsub.f32 %v4893_v62, %v7937_v14  ;;  %v7972_v49 = vand.u32 4294901760, %v4898_v34 }
 0x5e1   :  { %3668 = vmatpush.msra.mxu1 %v7673_v28  ;;  %3327 = vmatmul.f32.gmra.mxu2 %v2997_v29  ;;  %v3015_v28 = vsub.f32 %v3013_v12, %v3014_v35  ;;  %v7958_v29 = vand.u32 4294901760, %v4896_v15 }
 0x5e2   :  { %3575 = vmatpush.msra.mxu0 %v8992_v16  ;;  %3444 = vmatmul.f32.gmra.mxu3 %v2998_v38  ;;  %v4897_v38 = vld [vmem:[%s8718_s3 + $0x170] sm:$0xff] }
 0x5e3   :  { %3670 = vmatpush.msra.mxu1 %v7690_v19  ;;  %v3016_v19 = vand.u32 4294901760, %v3015_v28  ;;  %v3077_v48 = vsub.f32 %v4896_v15, %v7958_v29  ;;  %v7965_v2 = vand.u32 4294901760, %v4897_v38 }
 0x5e4   :  { %3579 = vmatpush.msra.mxu0 %v3187_v54  ;;  %v3054_v54 = vand.u32 4294901760, %v3053_v59 }
 0x5e5   :  { %3672 = vmatpush.msra.mxu1 %v7709_v40  ;;  %v3023_v40 = vsub.f32 %v3021_v51, %v3022_v21 }
 0x5e6   :  { %3583 = vmatpush.msra.mxu0 %v3193_v50  ;;  %3210 = vmatmul.f32.gmra.mxu1 %v7844_v26  ;;  %v7944_v50 = vand.u32 4294901760, %v4894_v6  ;;  %v3055_v53 = vsub.f32 %v3053_v59, %v3054_v54 }
 0x5e7   :  { %3009 = vmatmul.f32.gmra.mxu0 %v3008_v18  ;;  %3674 = vmatpush.msra.mxu1 %v7724_v56  ;;  %v3024_v56 = vand.u32 4294901760, %v3023_v40  ;;  %v3093_v18 = vsub.f32 %v4898_v34, %v7972_v49 }
 0x5e8   :  { %v3061_v4 = vsub.f32 %v4894_v6, %v7944_v50  ;;  %v3056_v3 = vand.u32 4294901760, %v3055_v53 }
 0x5e9   :  { %3676 = vmatpush.msra.mxu1 %v7737_v47  ;;  %3332 = vmatmul.f32.gmra.mxu2 %v3005_v31  ;;  %v3031_v47 = vsub.f32 %v3029_v52, %v3030_v43  ;;  %v3078_v31 = vand.u32 4294901760, %v3077_v48  ;;  %v3094_v28 = vand.u32 4294901760, %v3093_v18 }
 0x5ea   :  { %3450 = vmatmul.f32.gmra.mxu3 %v3006_v61  ;;  %v3062_v42 = vand.u32 4294901760, %v3061_v4  ;;  %v3085_v61 = vsub.f32 %v4897_v38, %v7965_v2 }
 0x5eb   :  { %3678 = vmatpush.msra.mxu1 %v7752_v41  ;;  %v3032_v39 = vand.u32 4294901760, %v3031_v47  ;;  %v3038_v41 = vand.u32 4294901760, %v3037_v8  ;;  %v3079_v45 = vsub.f32 %v3077_v48, %v3078_v31 }
 0x5ec   :  { %v3063_v17 = vsub.f32 %v3061_v4, %v3062_v42  ;;  %v3086_v20 = vand.u32 4294901760, %v3085_v61 }
 0x5ed   :  { %3680 = vmatpush.msra.mxu1 %v7767_v55  ;;  %v3039_v58 = vsub.f32 %v3037_v8, %v3038_v41  ;;  %v3045_v55 = vsub.f32 %v4892_v0, %v7930_v10 }
 0x5ee   :  { %3214 = vmatmul.f32.gmra.mxu1 %v7862_v57  ;;  %v3064_v63 = vand.u32 4294901760, %v3063_v17  ;;  %v3087_v16 = vsub.f32 %v3085_v61, %v3086_v20 }
 0x5ef   :  { %3017 = vmatmul.f32.gmra.mxu0 %v3016_v19  ;;  %v3040_v33 = vand.u32 4294901760, %v3039_v58  ;;  %v3046_v5 = vand.u32 4294901760, %v3045_v55 }
 0x5f1   :  { %3337 = vmatmul.f32.gmra.mxu2 %v3013_v12  ;;  %v3047_v24 = vsub.f32 %v3045_v55, %v3046_v5  ;;  %v3080_v12 = vand.u32 4294901760, %v3079_v45 }
 0x5f2   :  { %3456 = vmatmul.f32.gmra.mxu3 %v3014_v35  ;;  %v3088_v35 = vand.u32 4294901760, %v3087_v16 }
 0x5f3   :  { %v3048_v36 = vand.u32 4294901760, %v3047_v24 }
 0x5f6   :  { %3218 = vmatmul.f32.gmra.mxu1 %v7881_v11 }
 0x5f7   :  { %3025 = vmatmul.f32.gmra.mxu0 %v3024_v56 }
 0x5f9   :  { %3342 = vmatmul.f32.gmra.mxu2 %v3021_v51  ;;  %v3095_v51 = vsub.f32 %v3093_v18, %v3094_v28 }
 0x5fa   :  { %3462 = vmatmul.f32.gmra.mxu3 %v3022_v21 }
 0x5fb   :  { %v3096_v7 = vand.u32 4294901760, %v3095_v51 }
 0x5fe   :  { %3222 = vmatmul.f32.gmra.mxu1 %v7900_v25 }
 0x5ff   :  { %3033 = vmatmul.f32.gmra.mxu0 %v3032_v39 }
 0x601   :  { %3347 = vmatmul.f32.gmra.mxu2 %v3029_v52 }
 0x602   :  { %3468 = vmatmul.f32.gmra.mxu3 %v3030_v43 }
 0x606   :  { %3226 = vmatmul.f32.gmra.mxu1 %v7915_v60 }
 0x607   :  { %3041 = vmatmul.f32.gmra.mxu0 %v3040_v33 }
 0x609   :  { %3352 = vmatmul.f32.gmra.mxu2 %v3037_v8 }
 0x60a   :  { %3474 = vmatmul.f32.gmra.mxu3 %v3038_v41 }
 0x60e   :  { %3230 = vmatmul.f32.gmra.mxu1 %v7923_v32 }
 0x60f   :  { %3049 = vmatmul.f32.gmra.mxu0 %v3048_v36 }
 0x611   :  { %3357 = vmatmul.f32.gmra.mxu2 %v3045_v55 }
 0x612   :  { %3480 = vmatmul.f32.gmra.mxu3 %v3046_v5 }
 0x616   :  { %3234 = vmatmul.f32.gmra.mxu1 %v7930_v10 }
 0x617   :  { %3057 = vmatmul.f32.gmra.mxu0 %v3056_v3 }
 0x619   :  { %3362 = vmatmul.f32.gmra.mxu2 %v3053_v59 }
 0x61a   :  { %3486 = vmatmul.f32.gmra.mxu3 %v3054_v54 }
 0x61e   :  { %3238 = vmatmul.f32.gmra.mxu1 %v7937_v14 }
 0x61f   :  { %3065 = vmatmul.f32.gmra.mxu0 %v3064_v63 }
 0x621   :  { %3367 = vmatmul.f32.gmra.mxu2 %v3061_v4 }
 0x622   :  { %3492 = vmatmul.f32.gmra.mxu3 %v3062_v42 }
 0x626   :  { %3242 = vmatmul.f32.gmra.mxu1 %v7944_v50 }
 0x627   :  { %3073 = vmatmul.f32.gmra.mxu0 %v3072_v23 }
 0x629   :  { %3372 = vmatmul.f32.gmra.mxu2 %v3069_v30 }
 0x62a   :  { %3498 = vmatmul.f32.gmra.mxu3 %v3070_v1 }
 0x62e   :  { %3246 = vmatmul.f32.gmra.mxu1 %v7951_v46 }
 0x62f   :  { %3081 = vmatmul.f32.gmra.mxu0 %v3080_v12  ;;  %v2933_v12 = vpop.permute.xlu0 %2932 }
 0x631   :  { %3377 = vmatmul.f32.gmra.mxu2 %v3077_v48 }
 0x632   :  { %3504 = vmatmul.f32.gmra.mxu3 %v3078_v31 }
 0x636   :  { %3250 = vmatmul.f32.gmra.mxu1 %v7958_v29 }
 0x637   :  { %3089 = vmatmul.f32.gmra.mxu0 %v3088_v35  ;;  %v2918_v35 = vpop.permute.xlu0 %2917 }
 0x639   :  { %3382 = vmatmul.f32.gmra.mxu2 %v3085_v61 }
 0x63a   :  { %3510 = vmatmul.f32.gmra.mxu3 %v3086_v20 }
 0x63e   :  { %3254 = vmatmul.f32.gmra.mxu1 %v7965_v2 }
 0x63f   :  { %3097 = vmatmul.f32.gmra.mxu0 %v3096_v7 }
 0x641   :  { %3387 = vmatmul.f32.gmra.mxu2 %v3093_v18 }
 0x642   :  { %3516 = vmatmul.f32.gmra.mxu3 %v3094_v28 }
 0x644   :  { %v7978_v19 = vpop.f32.mrf.mxu0 }
 0x646   :  { %3258 = vmatmul.f32.gmra.mxu1 %v7972_v49 }
 0x647   :  { %3585 = vmatmul.f32.vlgmr.msra.gmra.mxu0 %v7721_v13 }
 0x64b   :  { %v7982_v21 = vpop.f32.mrf.mxu1 }
 0x64c   :  { %v7984_v40 = vpop.f32.mrf.mxu0  ;;  %v8048_v33 = vpop.f32.mrf.mxu2 }
 0x64d   :  { %v8055_v24 = vpop.f32.mrf.mxu3 }
 0x64e   :  { %3682 = vmatmul.f32.vlgmr.msra.gmra.mxu1 %v7721_v13 }
 0x64f   :  { %3589 = vmatmul.f32.gmra.mxu0 %v7780_v27 }
 0x653   :  { %v7988_v52 = vpop.f32.mrf.mxu1 }
 0x654   :  { %v7990_v37 = vpop.f32.mrf.mxu0  ;;  %v8062_v6 = vpop.f32.mrf.mxu2 }
 0x656   :  { %3686 = vmatmul.f32.gmra.mxu1 %v7780_v27 }
 0x657   :  { %3593 = vmatmul.f32.gmra.mxu0 %v7821_v22 }
 0x65b   :  { %v7994_v56 = vpop.f32.mrf.mxu1 }
 0x65c   :  { %v7996_v43 = vpop.f32.mrf.mxu0 }
 0x65e   :  { %3690 = vmatmul.f32.gmra.mxu1 %v7821_v22 }
 0x65f   :  { %3597 = vmatmul.f32.gmra.mxu0 %v7844_v26 }
 0x663   :  { %v8000_v47 = vpop.f32.mrf.mxu1 }
 0x664   :  { %8993 = vst [vmem:[#allocation21_spill] sm:$0xff] %v8000_v47  ;;  %v8002_v13 = vpop.f32.mrf.mxu0 }
 0x665   :  { %8994 = vst [vmem:[#allocation29_spill] sm:$0xff] %v8002_v13 }
 0x666   :  { %3694 = vmatmul.f32.gmra.mxu1 %v7844_v26 }
 0x667   :  { %3601 = vmatmul.f32.gmra.mxu0 %v7862_v57 }
 0x66b   :  { %v8006_v8 = vpop.f32.mrf.mxu1 }
 0x66c   :  { %8995 = vst [vmem:[#allocation39_spill] sm:$0xff] %v8006_v8  ;;  %v8008_v27 = vpop.f32.mrf.mxu0 }
 0x66e   :  { %3698 = vmatmul.f32.gmra.mxu1 %v7862_v57 }
 0x66f   :  { %3605 = vmatmul.f32.gmra.mxu0 %v7881_v11 }
 0x673   :  { %v8012_v0 = vpop.f32.mrf.mxu1 }
 0x674   :  { %8996 = vst [vmem:[#allocation8_spill] sm:$0xff] %v8012_v0  ;;  %v8014_v22 = vpop.f32.mrf.mxu0 }
 0x676   :  { %3702 = vmatmul.f32.gmra.mxu1 %v7881_v11 }
 0x677   :  { %3609 = vmatmul.f32.gmra.mxu0 %v7900_v25 }
 0x67b   :  { %v8018_v39 = vpop.f32.mrf.mxu1 }
 0x67c   :  { %v8020_v26 = vpop.f32.mrf.mxu0 }
 0x67e   :  { %3706 = vmatmul.f32.gmra.mxu1 %v7900_v25 }
 0x67f   :  { %3613 = vmatmul.f32.gmra.mxu0 %v7915_v60 }
 0x683   :  { %v8024_v41 = vpop.f32.mrf.mxu1 }
 0x684   :  { %v8026_v57 = vpop.f32.mrf.mxu0 }
 0x686   :  { %3710 = vmatmul.f32.gmra.mxu1 %v7915_v60 }
 0x687   :  { %3617 = vmatmul.f32.gmra.mxu0 %v7923_v32 }
 0x68b   :  { %v8030_v58 = vpop.f32.mrf.mxu1 }
 0x68c   :  { %v8032_v11 = vpop.f32.mrf.mxu0 }
 0x68e   :  { %3714 = vmatmul.f32.gmra.mxu1 %v7923_v32 }
 0x68f   :  { %3621 = vmatmul.f32.gmra.mxu0 %v7930_v10 }
 0x693   :  { %v8036_v55 = vpop.f32.mrf.mxu1 }
 0x694   :  { %v8038_v25 = vpop.f32.mrf.mxu0 }
 0x696   :  { %3718 = vmatmul.f32.gmra.mxu1 %v7930_v10 }
 0x697   :  { %3625 = vmatmul.f32.gmra.mxu0 %v7937_v14 }
 0x69b   :  { %v8042_v62 = vpop.f32.mrf.mxu1 }
 0x69c   :  { %v8044_v60 = vpop.f32.mrf.mxu0 }
 0x69d   :  { %v3067_v13 = vadd.f32 %v8044_v60, %v2918_v35 }
 0x69e   :  { %3722 = vmatmul.f32.gmra.mxu1 %v7937_v14  ;;  %v8066_v14 = vpop.f32.mrf.mxu3 }
 0x69f   :  { %3629 = vmatmul.f32.gmra.mxu0 %v7944_v50  ;;  %8997 = vst [vmem:[#allocation34_spill] sm:$0xff] %v8066_v14 }
 0x6a3   :  { %v8050_v32 = vpop.f32.mrf.mxu1 }
 0x6a4   :  { %v8052_v5 = vpop.f32.mrf.mxu0 }
 0x6a6   :  { %3726 = vmatmul.f32.gmra.mxu1 %v7944_v50  ;;  %v8073_v50 = vpop.f32.mrf.mxu2  ;;  %v8076_v53 = vpop.f32.mrf.mxu3 }
 0x6a7   :  { %3633 = vmatmul.f32.gmra.mxu0 %v7951_v46  ;;  %8998 = vst [vmem:[#allocation36_spill] sm:$0xff] %v8073_v50 }
 0x6a8   :  { %8999 = vst [vmem:[#allocation19_spill] sm:$0xff] %v8076_v53 }
 0x6ab   :  { %v8058_v10 = vpop.f32.mrf.mxu1 }
 0x6ac   :  { %v8060_v59 = vpop.f32.mrf.mxu0 }
 0x6ae   :  { %3730 = vmatmul.f32.gmra.mxu1 %v7951_v46  ;;  %v8084_v3 = vpop.f32.mrf.mxu2  ;;  %v8090_v17 = vpop.f32.mrf.mxu3 }
 0x6af   :  { %3637 = vmatmul.f32.gmra.mxu0 %v7958_v29  ;;  %9000 = vst [vmem:[#allocation25_spill] sm:$0xff] %v8084_v3 }
 0x6b0   :  { %9002 = vst [vmem:[#allocation13_spill] sm:$0xff] %v8090_v17 }
 0x6b3   :  { %v8068_v36 = vpop.f32.mrf.mxu1 }
 0x6b4   :  { %v8070_v54 = vpop.f32.mrf.mxu0 }
 0x6b6   :  { %3734 = vmatmul.f32.gmra.mxu1 %v7958_v29  ;;  %v8093_v30 = vpop.f32.mrf.mxu2  ;;  %v8099_v1 = vpop.f32.mrf.mxu3 }
 0x6b7   :  { %3641 = vmatmul.f32.gmra.mxu0 %v7965_v2  ;;  %9003 = vst [vmem:[#allocation10_spill] sm:$0xff] %v8093_v30 }
 0x6b8   :  { %9006 = vst [vmem:[#allocation31_spill] sm:$0xff] %v8099_v1 }
 0x6bb   :  { %v8078_v4 = vpop.f32.mrf.mxu1 }
 0x6bc   :  { %v8080_v44 = vpop.f32.mrf.mxu0 }
 0x6be   :  { %3738 = vmatmul.f32.gmra.mxu1 %v7965_v2  ;;  %v8105_v48 = vpop.f32.mrf.mxu2  ;;  %v8107_v38 = vpop.f32.mrf.mxu3 }
 0x6bf   :  { %3645 = vmatmul.f32.gmra.mxu0 %v7972_v49  ;;  %9009 = vst [vmem:[#allocation32_spill] sm:$0xff] %v8105_v48 }
 0x6c0   :  { %9010 = vst [vmem:[#allocation43_spill] sm:$0xff] %v8107_v38 }
 0x6c3   :  { %v8086_v42 = vpop.f32.mrf.mxu1 }
 0x6c4   :  { %v8088_v46 = vpop.f32.mrf.mxu0 }
 0x6c5   :  { %9001 = vst [vmem:[#allocation22_spill] sm:$0xff] %v8088_v46  ;;  %v8135_v46 = vpop.permute.xlu2 %2937 }
 0x6c6   :  { %3742 = vmatmul.f32.gmra.mxu1 %v7972_v49  ;;  %v8113_v2 = vpop.f32.mrf.mxu2  ;;  %v8115_v45 = vpop.f32.mrf.mxu3 }
 0x6c7   :  { %9013 = vst [vmem:[#allocation41_spill] sm:$0xff] %v8113_v2 }
 0x6c8   :  { %9014 = vst [vmem:[#allocation27_spill] sm:$0xff] %v8115_v45 }
 0x6cb   :  { %v8095_v15 = vpop.f32.mrf.mxu1 }
 0x6cc   :  { %9004 = vst [vmem:[#allocation26_spill] sm:$0xff] %v8095_v15  ;;  %v8097_v63 = vpop.f32.mrf.mxu0 }
 0x6cd   :  { %9005 = vst [vmem:[#allocation28_spill] sm:$0xff] %v8097_v63  ;;  %v2903_v63 = vpop.permute.xlu0 %2902 }
 0x6ce   :  { %v8121_v20 = vpop.f32.mrf.mxu2  ;;  %v8127_v18 = vpop.f32.mrf.mxu3 }
 0x6cf   :  { %9017 = vst [vmem:[#allocation49_spill] sm:$0xff] %v8121_v20 }
 0x6d0   :  { %9020 = vst [vmem:[#allocation7_spill] sm:$0xff] %v8127_v18 }
 0x6d3   :  { %v8101_v29 = vpop.f32.mrf.mxu1 }
 0x6d4   :  { %9007 = vst [vmem:[#allocation12_spill] sm:$0xff] %v8101_v29  ;;  %v8103_v9 = vpop.f32.mrf.mxu0 }
 0x6d5   :  { %9008 = vst [vmem:[#allocation48_spill] sm:$0xff] %v8103_v9  ;;  %v3043_v9 = vadd.f32 %v8026_v57, %v2903_v63 }
 0x6d6   :  { %v3353_v28 = vpop.f32.mrf.mxu2  ;;  %v3475_v15 = vpop.f32.mrf.mxu3 }
 0x6db   :  { %v8109_v23 = vpop.f32.mrf.mxu1 }
 0x6dc   :  { %9011 = vst [vmem:[#allocation30_spill] sm:$0xff] %v8109_v23  ;;  %v8111_v31 = vpop.f32.mrf.mxu0 }
 0x6dd   :  { %9012 = vst [vmem:[#allocation14_spill] sm:$0xff] %v8111_v31 }
 0x6de   :  { %v8143_v31 = vpop.f32.mrf.mxu3 }
 0x6df   :  { %9025 = vst [vmem:[#allocation42_spill] sm:$0xff] %v8143_v31 }
 0x6e3   :  { %v8117_v61 = vpop.f32.mrf.mxu1 }
 0x6e4   :  { %9015 = vst [vmem:[#allocation46_spill] sm:$0xff] %v8117_v61  ;;  %v8119_v34 = vpop.f32.mrf.mxu0  ;;  %v8139_v61 = vpop.f32.mrf.mxu2 }
 0x6e5   :  { %9016 = vst [vmem:[#allocation33_spill] sm:$0xff] %v8119_v34 }
 0x6e6   :  { %v8149_v3 = vpop.f32.mrf.mxu3 }
 0x6eb   :  { %v8123_v49 = vpop.f32.mrf.mxu1 }
 0x6ec   :  { %9018 = vst [vmem:[#allocation50_spill] sm:$0xff] %v8123_v49  ;;  %v8125_v16 = vpop.f32.mrf.mxu0  ;;  %v3232_v49 = vadd.f32 %v8030_v58, %v3043_v9  ;;  %v8147_v1 = vpop.f32.mrf.mxu2 }
 0x6ed   :  { %9019 = vst [vmem:[#allocation18_spill] sm:$0xff] %v8125_v16  ;;  %v2923_v16 = vpop.permute.xlu2 %2922 }
 0x6ee   :  { %v3075_v31 = vadd.f32 %v8052_v5, %v2923_v16 }
 0x6f3   :  { %v8129_v51 = vpop.f32.mrf.mxu1 }
 0x6f4   :  { %9021 = vst [vmem:[#allocation15_spill] sm:$0xff] %v8129_v51  ;;  %v8131_v7 = vpop.f32.mrf.mxu0  ;;  %v3354_v51 = vadd.f32 %v3353_v28, %v3232_v49  ;;  %v3368_v63 = vpop.f32.mrf.mxu2 }
 0x6f5   :  { %9022 = vst [vmem:[#allocation40_spill] sm:$0xff] %v8131_v7  ;;  %v2928_v7 = vpop.permute.xlu1 %2927  ;;  %v2908_v58 = vpop.permute.xlu2 %2907 }
 0x6f6   :  { %v3493_v28 = vpop.f32.mrf.mxu3  ;;  %v3083_v8 = vadd.f32 %v8060_v59, %v2928_v7 }
 0x6fb   :  { %v8133_v29 = vpop.f32.mrf.mxu1 }
 0x6fc   :  { %9023 = vst [vmem:[#allocation9_spill] sm:$0xff] %v8133_v29  ;;  %v8137_v23 = vpop.f32.mrf.mxu0  ;;  %v3476_v29 = vadd.f32 %v3475_v15, %v3354_v51  ;;  %v3373_v53 = vpop.f32.mrf.mxu2 }
 0x6fd   :  { %9024 = vst [vmem:[#allocation47_spill] sm:$0xff] %v8137_v23  ;;  %v2893_v30 = vpop.permute.xlu2 %2892 }
 0x6fe   :  { %v3499_v51 = vpop.f32.mrf.mxu3 }
 0x703   :  { %v8145_v34 = vpop.f32.mrf.mxu1 }
 0x704   :  { %9026 = vst [vmem:[#allocation38_spill] sm:$0xff] %v8145_v34  ;;  %v3618_v17 = vpop.f32.mrf.mxu0  ;;  %v2913_v34 = vpop.permute.xlu1 %2912 }
 0x705   :  { %v3619_v38 = vadd.f32 %v3618_v17, %v3476_v29 }
 0x70b   :  { %v3715_v23 = vpop.f32.mrf.mxu1 }
 0x70c   :  { %v8151_v45 = vpop.f32.mrf.mxu0  ;;  %v8153_v57 = vadd.f32 %v3715_v23, %v3619_v38  ;;  %v2898_v29 = vpop.permute.xlu1 %2897 }
 0x70d   :  { %9027 = vst [vmem:[#allocation24_spill] sm:$0xff] %v8151_v45  ;;  %v2878_v38 = vpop.permute.xlu2 %2877  ;;  %v2888_v45 = vpop.permute.xlu0 %2887 }
 0x70e   :  { %9028 = vst [vmem:[#allocation17_spill] sm:$0xff] %v8153_v57  ;;  %v3378_v57 = vpop.f32.mrf.mxu2 }
 0x713   :  { %v8155_v9 = vpop.f32.mrf.mxu1 }
 0x714   :  { %9029 = vst [vmem:[#allocation11_spill] sm:$0xff] %v8155_v9  ;;  %v8157_v49 = vpop.f32.mrf.mxu0  ;;  %v8165_v48 = vpop.permute.xlu1 %2882 }
 0x715   :  { %9030 = vst [vmem:[#allocation45_spill] sm:$0xff] %v8157_v49  ;;  %v3505_v9 = vpop.f32.mrf.mxu3  ;;  %v2863_v2 = vpop.permute.xlu2 %2862 }
 0x716   :  { %9034 = vst [vmem:[#allocation51_spill] sm:$0xff] %v8165_v48  ;;  %v2979_v50 = vadd.f32 %v7978_v19, %v2863_v2  ;;  %v3383_v49 = vpop.f32.mrf.mxu2  ;;  %v3059_v2 = vadd.f32 %v8038_v25, %v2913_v34  ;;  %v3027_v34 = vadd.f32 %v8014_v22, %v2893_v30 }
 0x718   :  { %v3200_v0 = vadd.f32 %v7982_v21, %v2979_v50  ;;  %v3051_v21 = vadd.f32 %v8032_v11, %v2908_v58  ;;  %v3240_v50 = vadd.f32 %v8042_v62, %v3059_v2  ;;  %v3035_v62 = vadd.f32 %v8020_v26, %v2898_v29  ;;  %v9039_v29 = vld [vmem:[#allocation49_spill] sm:$0xff] }
 0x719   :  { %v3003_v26 = vadd.f32 %v7996_v43, %v2878_v38  ;;  %v9045_v2 = vld [vmem:[#allocation41_spill] sm:$0xff] }
 0x71b   :  { %v8159_v15 = vpop.f32.mrf.mxu1 }
 0x71c   :  { %9031 = vst [vmem:[#allocation44_spill] sm:$0xff] %v8159_v15  ;;  %v8161_v17 = vpop.f32.mrf.mxu0  ;;  %v3091_v15 = vadd.f32 %v8070_v54, %v2933_v12  ;;  %v2868_v48 = vpop.permute.xlu1 %2867  ;;  %v3244_v54 = vadd.f32 %v8050_v32, %v3067_v13  ;;  %v3236_v13 = vadd.f32 %v8036_v55, %v3051_v21 }
 0x71d   :  { %9032 = vst [vmem:[#allocation23_spill] sm:$0xff] %v8161_v17  ;;  %v3248_v17 = vadd.f32 %v8058_v10, %v3075_v31  ;;  %v2987_v59 = vadd.f32 %v7984_v40, %v2868_v48  ;;  %v3511_v12 = vpop.f32.mrf.mxu3  ;;  %v3099_v40 = vadd.f32 %v8080_v44, %v8135_v46 }
 0x71e   :  { %v3256_v20 = vadd.f32 %v8078_v4, %v3091_v15  ;;  %v3369_v32 = vadd.f32 %v3368_v63, %v3244_v54  ;;  %v2873_v4 = vpop.permute.xlu0 %2872  ;;  %v9038_v15 = vld [vmem:[#allocation8_spill] sm:$0xff] }
 0x71f   :  { %v3374_v10 = vadd.f32 %v3373_v53, %v3248_v17  ;;  %v3260_v31 = vadd.f32 %v8086_v42, %v3099_v40  ;;  %v3364_v53 = vadd.f32 %v8147_v1, %v3240_v50  ;;  %v3359_v42 = vadd.f32 %v8139_v61, %v3236_v13  ;;  %v9043_v54 = vld [vmem:[#allocation36_spill] sm:$0xff]  ;;  %v9048_v40 = vld [vmem:[#allocation34_spill] sm:$0xff] }
 0x720   :  { %v3384_v16 = vadd.f32 %v3383_v49, %v3256_v20  ;;  %v3228_v20 = vadd.f32 %v8024_v41, %v3035_v62  ;;  %v3019_v1 = vadd.f32 %v8008_v27, %v2888_v45  ;;  %v9037_v49 = vld [vmem:[#allocation29_spill] sm:$0xff] }
 0x721   :  { %v3500_v44 = vadd.f32 %v3499_v51, %v3374_v10  ;;  %v3488_v22 = vadd.f32 %v8149_v3, %v3364_v53  ;;  %v9040_v51 = vld [vmem:[#allocation42_spill] sm:$0xff]  ;;  %v9041_v45 = vld [vmem:[#allocation45_spill] sm:$0xff] }
 0x722   :  { %v3512_v48 = vadd.f32 %v3511_v12, %v3384_v16  ;;  %v3220_v17 = vadd.f32 %v9038_v15, %v3019_v1  ;;  %v3349_v43 = vadd.f32 %v9039_v29, %v3228_v20  ;;  %v9046_v16 = vld [vmem:[#allocation24_spill] sm:$0xff]  ;;  %v9057_v1 = vld [vmem:[#allocation25_spill] sm:$0xff] }
 0x723   :  { %v8163_v18 = vpop.f32.mrf.mxu1 }
 0x724   :  { %9033 = vst [vmem:[#allocation16_spill] sm:$0xff] %v8163_v18  ;;  %v3634_v23 = vpop.f32.mrf.mxu0  ;;  %v3252_v18 = vadd.f32 %v8068_v36, %v3083_v8  ;;  %v3314_v8 = vadd.f32 %v8048_v33, %v3200_v0  ;;  %v3204_v36 = vadd.f32 %v7988_v52, %v2987_v59  ;;  %v2995_v52 = vadd.f32 %v7990_v37, %v2873_v4  ;;  %v3388_v33 = vpop.f32.mrf.mxu2  ;;  %v9035_v41 = vld [vmem:[#allocation23_spill] sm:$0xff] }
 0x725   :  { %v3389_v35 = vadd.f32 %v3388_v33, %v3260_v31  ;;  %v3635_v37 = vadd.f32 %v3634_v23, %v3500_v44  ;;  %v3517_v58 = vpop.f32.mrf.mxu3  ;;  %v9051_v31 = vld [vmem:[#allocation7_spill] sm:$0xff] }
 0x726   :  { %v3379_v5 = vadd.f32 %v3378_v57, %v3252_v18  ;;  %v8188_v0 = vadd.f32 %v8055_v24, %v3314_v8  ;;  %v3319_v11 = vadd.f32 %v8062_v6, %v3204_v36  ;;  %v3494_v24 = vadd.f32 %v3493_v28, %v3369_v32  ;;  %v9047_v36 = vld [vmem:[#allocation44_spill] sm:$0xff]  ;;  %v9049_v32 = vld [vmem:[#allocation21_spill] sm:$0xff]  ;;  %v9052_v33 = vld [vmem:[#allocation11_spill] sm:$0xff] }
 0x727   :  { %v3208_v57 = vadd.f32 %v7994_v56, %v2995_v52  ;;  %v3482_v56 = vadd.f32 %v9040_v51, %v3359_v42  ;;  %v3518_v27 = vadd.f32 %v3517_v58, %v3389_v35  ;;  %v3212_v4 = vadd.f32 %v9049_v32, %v3003_v26  ;;  %v9054_v42 = vld [vmem:[#allocation10_spill] sm:$0xff]  ;;  %v9056_v35 = vld [vmem:[#allocation47_spill] sm:$0xff] }
 0x728   :  { %v3506_v25 = vadd.f32 %v3505_v9, %v3379_v5  ;;  %v3631_v30 = vadd.f32 %v9035_v41, %v3494_v24  ;;  %v9036_v9 = vld [vmem:[#allocation51_spill] sm:$0xff]  ;;  %v8218_v13 = vadd.f32 %v9048_v40, %v3319_v11  ;;  %v3470_v52 = vadd.f32 %v9051_v31, %v3349_v43  ;;  %v9059_v41 = vld [vmem:[#allocation40_spill] sm:$0xff]  ;;  %v9062_v43 = vld [vmem:[#allocation18_spill] sm:$0xff] }
 0x729   :  { %v3011_v28 = vadd.f32 %v9037_v49, %v9036_v9  ;;  %v3324_v12 = vadd.f32 %v9043_v54, %v3208_v57  ;;  %v3623_v8 = vadd.f32 %v9046_v16, %v3482_v56  ;;  %v9058_v58 = vld [vmem:[#allocation43_spill] sm:$0xff]  ;;  %v9063_v56 = vld [vmem:[#allocation9_spill] sm:$0xff]  ;;  %v9069_v32 = vld [vmem:[#allocation50_spill] sm:$0xff] }
 0x72a   :  { %v9065_v54 = vld [vmem:[#allocation13_spill] sm:$0xff] }
 0x72b   :  { %v3731_v47 = vpop.f32.mrf.mxu1  ;;  %v9042_v23 = vld [vmem:[#allocation16_spill] sm:$0xff]  ;;  %v3720_v53 = vadd.f32 %v9052_v33, %v3623_v8 }
 0x72c   :  { %v3638_v14 = vpop.f32.mrf.mxu0  ;;  %v3732_v61 = vadd.f32 %v3731_v47, %v3635_v37  ;;  %v3728_v59 = vadd.f32 %v9042_v23, %v3631_v30  ;;  %v9044_v47 = vld [vmem:[#allocation39_spill] sm:$0xff]  ;;  %v3615_v37 = vadd.f32 %v9056_v35, %v3470_v52 }
 0x72d   :  { %v3639_v55 = vadd.f32 %v3638_v14, %v3506_v25  ;;  %v3224_v14 = vadd.f32 %v8018_v39, %v3027_v34  ;;  %v3627_v39 = vadd.f32 %v9041_v45, %v3488_v22  ;;  %v9050_v25 = vld [vmem:[#allocation32_spill] sm:$0xff]  ;;  %v9053_v34 = vld [vmem:[#allocation19_spill] sm:$0xff]  ;;  %v3755_v49 = vmax.f32 %v3720_v53, 0.0 }
 0x72e   :  { %v3757_v44 = vmax.f32 %v3728_v59, 0.0  ;;  %v3440_v20 = vadd.f32 %v9053_v34, %v3324_v12  ;;  %v9070_v53 = vld [vmem:[#allocation48_spill] sm:$0xff] }
 0x72f   :  { %v3344_v5 = vadd.f32 %v9045_v2, %v3224_v14  ;;  %v3724_v21 = vadd.f32 %v9047_v36, %v3627_v39  ;;  %v3329_v14 = vadd.f32 %v9057_v1, %v3212_v4  ;;  %v9067_v2 = vld [vmem:[#allocation15_spill] sm:$0xff]  ;;  %v8271_v8 = vand.u32 4294901760, %v3755_v49 }
 0x731   :  { %v3446_v12 = vadd.f32 %v9065_v54, %v3329_v14 }
 0x733   :  { %v3735_v19 = vpop.f32.mrf.mxu1 }
 0x734   :  { %v3642_v60 = vpop.f32.mrf.mxu0  ;;  %v3736_v7 = vadd.f32 %v3735_v19, %v3639_v55  ;;  %v3216_v19 = vadd.f32 %v9044_v47, %v3011_v28  ;;  %v8241_v28 = vand.u32 4294901760, %v3757_v44  ;;  %v9066_v47 = vld [vmem:[#allocation33_spill] sm:$0xff] }
 0x735   :  { %v3643_v46 = vadd.f32 %v3642_v60, %v3512_v48  ;;  %v3758_v60 = vmax.f32 %v3732_v61, 0.0  ;;  %v3339_v48 = vadd.f32 %v9050_v25, %v3220_v17  ;;  %v9060_v61 = vld [vmem:[#allocation38_spill] sm:$0xff] }
 0x736   :  { %v3759_v3 = vmax.f32 %v3736_v7, 0.0  ;;  %v3334_v24 = vadd.f32 %v9054_v42, %v3216_v19  ;;  %v3756_v7 = vmax.f32 %v3724_v21, 0.0  ;;  %v8239_v9 = vadd.f32 %v9060_v61, %v3615_v37  ;;  %v9072_v37 = vld [vmem:[#allocation28_spill] sm:$0xff]  ;;  %v9074_v61 = vld [vmem:[#allocation22_spill] sm:$0xff] }
 0x737   :  { %v3458_v22 = vadd.f32 %v9058_v58, %v3339_v48  ;;  %v8274_v36 = vsub.f32 %v3757_v44, %v8241_v28  ;;  %v3595_v44 = vadd.f32 %v9070_v53, %v3440_v20 }
 0x738   :  { %v8224_v55 = vand.u32 4294901760, %v3759_v3  ;;  %v8254_v39 = vand.u32 4294901760, %v3756_v7  ;;  %v3753_v16 = vmax.f32 %v8239_v9, 0.0  ;;  %v3587_v9 = vadd.f32 %v9074_v61, %v8188_v0 }
 0x739   :  { %v3607_v51 = vadd.f32 %v9062_v43, %v3458_v22  ;;  %v4063_v35 = vand.u32 4294901760, %v8274_v36 }
 0x73a   :  { %v8244_v15 = vsub.f32 %v3759_v3, %v8224_v55  ;;  %v8289_v31 = vsub.f32 %v3756_v7, %v8254_v39  ;;  %v3591_v7 = vadd.f32 %v9072_v37, %v8218_v13 }
 0x73b   :  { %v3739_v18 = vpop.f32.mrf.mxu1  ;;  %v4064_v0 = vsub.f32 %v8274_v36, %v4063_v35 }
 0x73c   :  { %v3740_v6 = vadd.f32 %v3739_v18, %v3643_v46  ;;  %v3646_v38 = vpop.f32.mrf.mxu0  ;;  %v9055_v18 = vld [vmem:[#allocation27_spill] sm:$0xff] }
 0x73d   :  { %v3647_v50 = vadd.f32 %v3646_v38, %v3518_v27  ;;  %v3464_v11 = vadd.f32 %v9055_v18, %v3344_v5  ;;  %v9064_v27 = vld [vmem:[#allocation17_spill] sm:$0xff]  ;;  %v8268_v5 = vadd.f32 %v9067_v2, %v3607_v51  ;;  %v8309_v18 = vsub.f32 %v3755_v49, %v8271_v8  ;;  %v9075_v49 = vld [vmem:[#allocation12_spill] sm:$0xff] }
 0x73e   :  { %v3760_v63 = vmax.f32 %v3740_v6, 0.0  ;;  %v8230_v6 = vand.u32 4294901760, %v3758_v60  ;;  %v3754_v45 = vmax.f32 %v9064_v27, 0.0  ;;  %v4915_v51 = vld [vmem:[%s8718_s3 + $0x180] sm:$0xff] }
 0x73f   :  { %v3611_v30 = vadd.f32 %v9059_v41, %v3464_v11  ;;  %v3751_v42 = vmax.f32 %v8268_v5, 0.0  ;;  %v4075_v27 = vand.u32 4294901760, %v8309_v18 }
 0x740   :  { %v8215_v10 = vand.u32 4294901760, %v3760_v63  ;;  %v8257_v23 = vsub.f32 %v3758_v60, %v8230_v6  ;;  %v4051_v60 = vand.u32 4294901760, %v8244_v15  ;;  %v8285_v48 = vand.u32 4294901760, %v3754_v45 }
 0x741   :  { %v8251_v38 = vadd.f32 %v9063_v56, %v3611_v30  ;;  %v4069_v30 = vand.u32 4294901760, %v8289_v31  ;;  %v8340_v43 = vand.u32 4294901760, %v3751_v42 }
 0x742   :  { %v8233_v26 = vsub.f32 %v3760_v63, %v8215_v10  ;;  %v9061_v63 = vld [vmem:[#allocation31_spill] sm:$0xff]  ;;  %v4057_v33 = vand.u32 4294901760, %v8257_v23  ;;  %v4052_v20 = vsub.f32 %v8244_v15, %v4051_v60  ;;  %v8327_v22 = vsub.f32 %v3754_v45, %v8285_v48  ;;  %v9076_v45 = vld [vmem:[#allocation26_spill] sm:$0xff] }
 0x743   :  { %v3743_v62 = vpop.f32.mrf.mxu1  ;;  %v3452_v29 = vadd.f32 %v9061_v63, %v3334_v24  ;;  %v3752_v25 = vmax.f32 %v8251_v38, 0.0  ;;  %v8305_v24 = vand.u32 4294901760, %v3753_v16  ;;  %v8337_v63 = vadd.f32 %v9075_v49, %v3591_v7  ;;  %v4916_v7 = vld [vmem:[%s8718_s3 + $0x188] sm:$0xff] }
 0x744   :  { %v3744_v46 = vadd.f32 %v3743_v62, %v3647_v50  ;;  %v4045_v3 = vand.u32 4294901760, %v8233_v26  ;;  %v9068_v50 = vld [vmem:[#allocation14_spill] sm:$0xff]  ;;  %v4058_v13 = vsub.f32 %v8257_v23, %v4057_v33  ;;  %v4053_v56 = vand.u32 4294901760, %v4052_v20 }
 0x745   :  { %v3603_v19 = vadd.f32 %v9066_v47, %v3452_v29  ;;  %v3599_v40 = vadd.f32 %v9068_v50, %v3446_v12  ;;  %v8323_v58 = vand.u32 4294901760, %v3752_v25  ;;  %v8352_v38 = vsub.f32 %v3753_v16, %v8305_v24 }
 0x746   :  { %v3761_v57 = vmax.f32 %v3744_v46, 0.0  ;;  %v4046_v62 = vsub.f32 %v8233_v26, %v4045_v3  ;;  %v9071_v46 = vld [vmem:[#allocation46_spill] sm:$0xff]  ;;  %v8356_v54 = vadd.f32 %v9076_v45, %v3587_v9  ;;  %v4059_v2 = vand.u32 4294901760, %v4058_v13 }
 0x747   :  { %v8282_v4 = vadd.f32 %v9069_v32, %v3603_v19  ;;  %v8302_v34 = vadd.f32 %v9071_v46, %v3599_v40  ;;  %v8364_v19 = vsub.f32 %v3752_v25, %v8323_v58  ;;  %v4070_v5 = vsub.f32 %v8289_v31, %v4069_v30 }
 0x748   :  { %v8246_v17 = vand.u32 4294901760, %v3761_v57  ;;  %v4047_v41 = vand.u32 4294901760, %v4046_v62  ;;  %v4081_v16 = vand.u32 4294901760, %v8327_v22  ;;  %v8371_v50 = vand.u32 4294901760, %v4915_v51 }
 0x749   :  { %v3750_v14 = vmax.f32 %v8282_v4, 0.0  ;;  %v3749_v29 = vmax.f32 %v8302_v34, 0.0  ;;  %v3747_v40 = vmax.f32 %v8337_v63, 0.0  ;;  %v4065_v4 = vand.u32 4294901760, %v4064_v0 }
 0x74a   :  { %v8260_v59 = vsub.f32 %v3761_v57, %v8246_v17  ;;  %3877 = vmatpush.msra.mxu2 %v8246_v17  ;;  %4328 = vmatpush.msrb.mxu1 %v8246_v17  ;;  %v9073_v57 = vld [vmem:[#allocation30_spill] sm:$0xff]  ;;  %v4076_v25 = vsub.f32 %v8309_v18, %v4075_v27  ;;  %v4087_v62 = vand.u32 4294901760, %v8352_v38  ;;  %v3746_v53 = vmax.f32 %v8356_v54, 0.0 }
 0x74b   :  { %v8320_v1 = vadd.f32 %v9073_v57, %v3595_v44  ;;  %v8359_v47 = vand.u32 4294901760, %v3750_v14  ;;  %v8374_v32 = vand.u32 4294901760, %v3749_v29  ;;  %v4071_v34 = vand.u32 4294901760, %v4070_v5 }
 0x74c   :  { %v4039_v21 = vand.u32 4294901760, %v8260_v59  ;;  %3879 = vmatpush.msra.mxu2 %v8215_v10  ;;  %4200 = vmatpush.msrb.mxu0 %v8260_v59  ;;  %v8400_v20 = vsub.f32 %v4915_v51, %v8371_v50  ;;  %v8402_v37 = vand.u32 4294901760, %v3747_v40  ;;  %v4077_v57 = vand.u32 4294901760, %v4076_v25 }
 0x74d   :  { %4330 = vmatpush.msrb.mxu1 %v8215_v10  ;;  %v3748_v12 = vmax.f32 %v8320_v1, 0.0  ;;  %v8392_v46 = vsub.f32 %v3750_v14, %v8359_v47  ;;  %v4088_v1 = vsub.f32 %v8352_v38, %v4087_v62  ;;  %v8414_v14 = vsub.f32 %v3749_v29, %v8374_v32 }
 0x74e   :  { %v4040_v52 = vsub.f32 %v8260_v59, %v4039_v21  ;;  %3881 = vmatpush.msra.mxu2 %v8224_v55  ;;  %4203 = vmatpush.msrb.mxu0 %v8233_v26  ;;  %v8417_v13 = vand.u32 4294901760, %v3746_v53  ;;  %v3910_v29 = vand.u32 4294901760, %v8400_v20  ;;  %v8430_v51 = vand.u32 4294901760, %v4916_v7 }
 0x74f   :  { %4332 = vmatpush.msrb.mxu1 %v8224_v55  ;;  %v8387_v44 = vand.u32 4294901760, %v3748_v12  ;;  %v4105_v9 = vand.u32 4294901760, %v8392_v46  ;;  %v8439_v45 = vsub.f32 %v3747_v40, %v8402_v37  ;;  %v8751_v54 = vand.u32 4294901760, %v8414_v14 }
 0x750   :  { %3883 = vmatpush.msra.mxu2 %v8230_v6  ;;  %4206 = vmatpush.msrb.mxu0 %v8244_v15  ;;  %v4041_v11 = vand.u32 4294901760, %v4040_v52  ;;  %v8383_v52 = vsub.f32 %v3751_v42, %v8340_v43  ;;  %v4082_v42 = vsub.f32 %v8327_v22, %v4081_v16  ;;  %v3917_v25 = vsub.f32 %v4916_v7, %v8430_v51  ;;  %v4919_v15 = vld [vmem:[%s8718_s3 + $0x1a0] sm:$0xff] }
 0x751   :  { %4334 = vmatpush.msrb.mxu1 %v8230_v6  ;;  %v8422_v61 = vsub.f32 %v3748_v12, %v8387_v44  ;;  %v8445_v12 = vsub.f32 %v3746_v53, %v8417_v13  ;;  %v4106_v40 = vsub.f32 %v8392_v46, %v4105_v9  ;;  %v4917_v53 = vld [vmem:[%s8718_s3 + $0x190] sm:$0xff] }
 0x752   :  { %3885 = vmatpush.msra.mxu2 %v8241_v28  ;;  %4042 = vmatpush.msra.mxu3 %v4041_v11  ;;  %v4093_v11 = vand.u32 4294901760, %v8364_v19  ;;  %v4083_v49 = vand.u32 4294901760, %v4082_v42  ;;  %v4112_v42 = vsub.f32 %v8414_v14, %v8751_v54 }
 0x753   :  { %4209 = vmatpush.msrb.mxu0 %v8257_v23  ;;  %4336 = vmatpush.msrb.mxu1 %v8241_v28 }
 0x754   :  { %3887 = vmatpush.msra.mxu2 %v8254_v39  ;;  %4048 = vmatpush.msra.mxu3 %v4047_v41  ;;  %v4099_v41 = vand.u32 4294901760, %v8383_v52  ;;  %v4094_v63 = vsub.f32 %v8364_v19, %v4093_v11 }
 0x755   :  { %4212 = vmatpush.msrb.mxu0 %v8274_v36  ;;  %4338 = vmatpush.msrb.mxu1 %v8254_v39  ;;  %v4920_v36 = vld [vmem:[%s8718_s3 + $0x1a8] sm:$0xff] }
 0x756   :  { %3889 = vmatpush.msra.mxu2 %v8271_v8  ;;  %4054 = vmatpush.msra.mxu3 %v4053_v56  ;;  %v4089_v56 = vand.u32 4294901760, %v4088_v1  ;;  %v4100_v0 = vsub.f32 %v8383_v52, %v4099_v41  ;;  %v4095_v5 = vand.u32 4294901760, %v4094_v63  ;;  %v4129_v1 = vand.u32 4294901760, %v8445_v12 }
 0x757   :  { %4215 = vmatpush.msrb.mxu0 %v8289_v31  ;;  %4340 = vmatpush.msrb.mxu1 %v8271_v8  ;;  %v9077_v31 = vand.u32 4294901760, %v8414_v14 }
 0x758   :  { %3891 = vmatpush.msra.mxu2 %v8285_v48  ;;  %4060 = vmatpush.msra.mxu3 %v4059_v2  ;;  %v8750_v2 = vand.u32 4294901760, %v8422_v61 }
 0x759   :  { %4218 = vmatpush.msrb.mxu0 %v8309_v18  ;;  %4342 = vmatpush.msrb.mxu1 %v8285_v48 }
 0x75a   :  { %3893 = vmatpush.msra.mxu2 %v8305_v24  ;;  %4066 = vmatpush.msra.mxu3 %v4065_v4  ;;  %v3911_v4 = vsub.f32 %v8400_v20, %v3910_v29  ;;  %v4118_v7 = vsub.f32 %v8422_v61, %v8750_v2 }
 0x75b   :  { %4221 = vmatpush.msrb.mxu0 %v8327_v22  ;;  %4344 = vmatpush.msrb.mxu1 %v8305_v24 }
 0x75c   :  { %3895 = vmatpush.msra.mxu2 %v8323_v58  ;;  %4072 = vmatpush.msra.mxu3 %v4071_v34  ;;  %v4101_v34 = vand.u32 4294901760, %v4100_v0  ;;  %v3912_v63 = vand.u32 4294901760, %v3911_v4  ;;  %v8471_v0 = vand.u32 4294901760, %v4917_v53  ;;  %v4130_v4 = vsub.f32 %v8445_v12, %v4129_v1 }
 0x75d   :  { %4224 = vmatpush.msrb.mxu0 %v8352_v38  ;;  %4346 = vmatpush.msrb.mxu1 %v8323_v58 }
 0x75e   :  { %3897 = vmatpush.msra.mxu2 %v8340_v43  ;;  %4078 = vmatpush.msra.mxu3 %v4077_v57  ;;  %v4123_v57 = vand.u32 4294901760, %v8439_v45  ;;  %v3925_v54 = vsub.f32 %v4917_v53, %v8471_v0 }
 0x75f   :  { %4227 = vmatpush.msrb.mxu0 %v8364_v19  ;;  %4348 = vmatpush.msrb.mxu1 %v8340_v43 }
 0x760   :  { %3899 = vmatpush.msra.mxu2 %v8359_v47  ;;  %4084 = vmatpush.msra.mxu3 %v4083_v49  ;;  %v4107_v49 = vand.u32 4294901760, %v4106_v40  ;;  %v4124_v2 = vsub.f32 %v8439_v45, %v4123_v57  ;;  %v4119_v40 = vand.u32 4294901760, %v4118_v7  ;;  %v4131_v7 = vand.u32 4294901760, %v4130_v4 }
 0x761   :  { %4230 = vmatpush.msrb.mxu0 %v8383_v52  ;;  %4350 = vmatpush.msrb.mxu1 %v8359_v47 }
 0x762   :  { %3901 = vmatpush.msra.mxu2 %v8374_v32  ;;  %4090 = vmatpush.msra.mxu3 %v4089_v56  ;;  %v3918_v56 = vand.u32 4294901760, %v3917_v25 }
 0x763   :  { %4233 = vmatpush.msrb.mxu0 %v8392_v46  ;;  %4352 = vmatpush.msrb.mxu1 %v8374_v32 }
 0x764   :  { %3903 = vmatpush.msra.mxu2 %v8387_v44  ;;  %4096 = vmatpush.msra.mxu3 %v4095_v5  ;;  %v4113_v5 = vand.u32 4294901760, %v4112_v42  ;;  %v4918_v42 = vld [vmem:[%s8718_s3 + $0x198] sm:$0xff] }
 0x765   :  { %4236 = vmatpush.msrb.mxu0 %v8414_v14  ;;  %4354 = vmatpush.msrb.mxu1 %v8387_v44  ;;  %v8494_v59 = vand.u32 4294901760, %v4918_v42 }
 0x766   :  { %3905 = vmatpush.msra.mxu2 %v8402_v37  ;;  %4102 = vmatpush.msra.mxu3 %v4101_v34  ;;  %v3919_v34 = vsub.f32 %v3917_v25, %v3918_v56 }
 0x767   :  { %4239 = vmatpush.msrb.mxu0 %v8422_v61  ;;  %4356 = vmatpush.msrb.mxu1 %v8402_v37 }
 0x768   :  { %3907 = vmatpush.msra.mxu2 %v8417_v13  ;;  %4108 = vmatpush.msra.mxu3 %v4107_v49  ;;  %v4125_v49 = vand.u32 4294901760, %v4124_v2  ;;  %v3920_v53 = vand.u32 4294901760, %v3919_v34  ;;  %v4926_v2 = vld [vmem:[%s8718_s3 + $0x1d8] sm:$0xff] }
 0x769   :  { %4242 = vmatpush.msrb.mxu0 %v8439_v45  ;;  %4358 = vmatpush.msrb.mxu1 %v8417_v13 }
 0x76a   :  { %3913 = vmatmul.f32.vlgmr.msra.gmra.mxu2 %v3912_v63  ;;  %4114 = vmatpush.msra.mxu3 %v4113_v5  ;;  %v3926_v63 = vand.u32 4294901760, %v3925_v54 }
 0x76b   :  { %4459 = vmatpush.msrb.mxu2 %v4039_v21  ;;  %4245 = vmatpush.msrb.mxu0 %v8445_v12  ;;  %v8512_v21 = vand.u32 4294901760, %v4919_v15 }
 0x76c   :  { %4120 = vmatpush.msra.mxu3 %v4119_v40  ;;  %4248 = vmatmul.f32.vlgmr.msrb.gmra.mxu0 %v8400_v20  ;;  %v3927_v26 = vsub.f32 %v3925_v54, %v3926_v63  ;;  %v4927_v40 = vld [vmem:[%s8718_s3 + $0x1e0] sm:$0xff] }
 0x76d   :  { %4463 = vmatpush.msrb.mxu2 %v4045_v3  ;;  %4362 = vmatmul.f32.vlgmr.msrb.gmra.mxu1 %v3910_v29  ;;  %v3933_v3 = vsub.f32 %v4918_v42, %v8494_v59  ;;  %v8601_v42 = vand.u32 4294901760, %v4927_v40 }
 0x76e   :  { %4126 = vmatpush.msra.mxu3 %v4125_v49 }
 0x76f   :  { %4467 = vmatpush.msrb.mxu2 %v4051_v60  ;;  %v3934_v23 = vand.u32 4294901760, %v3933_v3  ;;  %v8531_v60 = vand.u32 4294901760, %v4920_v36 }
 0x770   :  { %4132 = vmatpush.msra.mxu3 %v4131_v7  ;;  %v4005_v7 = vsub.f32 %v4927_v40, %v8601_v42 }
 0x771   :  { %4471 = vmatpush.msrb.mxu2 %v4057_v33  ;;  %4134 = vmatmul.f32.vlgmr.msra.gmra.mxu3 %v8371_v50  ;;  %v4921_v33 = vld [vmem:[%s8718_s3 + $0x1b0] sm:$0xff] }
 0x772   :  { %3921 = vmatmul.f32.gmra.mxu2 %v3920_v53  ;;  %4586 = vmatpush.msrb.mxu3 %v8246_v17  ;;  %v3928_v17 = vand.u32 4294901760, %v3927_v26  ;;  %v4928_v53 = vld [vmem:[%s8718_s3 + $0x1e8] sm:$0xff]  ;;  %v4006_v26 = vand.u32 4294901760, %v4005_v7 }
 0x773   :  { %4475 = vmatpush.msrb.mxu2 %v4063_v35  ;;  %v8550_v35 = vand.u32 4294901760, %v4921_v33 }
 0x774   :  { %4588 = vmatpush.msrb.mxu3 %v8215_v10  ;;  %4253 = vmatmul.f32.gmra.mxu0 %v3917_v25  ;;  %v3935_v10 = vsub.f32 %v3933_v3, %v3934_v23 }
 0x775   :  { %4479 = vmatpush.msrb.mxu2 %v4069_v30  ;;  %4368 = vmatmul.f32.gmra.mxu1 %v3918_v56  ;;  %v3957_v22 = vsub.f32 %v4921_v33, %v8550_v35  ;;  %v4922_v30 = vld [vmem:[%s8718_s3 + $0x1b8] sm:$0xff] }
 0x776   :  { %4590 = vmatpush.msrb.mxu3 %v8224_v55  ;;  %v3941_v55 = vsub.f32 %v4919_v15, %v8512_v21  ;;  %v4007_v15 = vsub.f32 %v4005_v7, %v4006_v26 }
 0x777   :  { %4483 = vmatpush.msrb.mxu2 %v4075_v27  ;;  %v3958_v38 = vand.u32 4294901760, %v3957_v22  ;;  %v8565_v27 = vand.u32 4294901760, %v4922_v30 }
 0x778   :  { %4592 = vmatpush.msrb.mxu3 %v8230_v6  ;;  %v3936_v6 = vand.u32 4294901760, %v3935_v10  ;;  %v4008_v10 = vand.u32 4294901760, %v4007_v15 }
 0x779   :  { %4487 = vmatpush.msrb.mxu2 %v4081_v16  ;;  %4138 = vmatmul.f32.gmra.mxu3 %v8430_v51  ;;  %v3965_v19 = vsub.f32 %v4922_v30, %v8565_v27  ;;  %v4923_v16 = vld [vmem:[%s8718_s3 + $0x1c0] sm:$0xff] }
 0x77a   :  { %3929 = vmatmul.f32.gmra.mxu2 %v3928_v17  ;;  %4594 = vmatpush.msrb.mxu3 %v8241_v28  ;;  %v3942_v28 = vand.u32 4294901760, %v3941_v55 }
 0x77b   :  { %4491 = vmatpush.msrb.mxu2 %v4087_v62  ;;  %v3966_v52 = vand.u32 4294901760, %v3965_v19  ;;  %v8573_v62 = vand.u32 4294901760, %v4923_v16 }
 0x77c   :  { %4596 = vmatpush.msrb.mxu3 %v8254_v39  ;;  %4258 = vmatmul.f32.gmra.mxu0 %v3925_v54  ;;  %v3943_v39 = vsub.f32 %v3941_v55, %v3942_v28 }
 0x77d   :  { %4495 = vmatpush.msrb.mxu2 %v4093_v11  ;;  %4374 = vmatmul.f32.gmra.mxu1 %v3926_v63  ;;  %v3973_v46 = vsub.f32 %v4923_v16, %v8573_v62  ;;  %v4924_v11 = vld [vmem:[%s8718_s3 + $0x1c8] sm:$0xff] }
 0x77e   :  { %4598 = vmatpush.msrb.mxu3 %v8271_v8  ;;  %v3949_v8 = vsub.f32 %v4920_v36, %v8531_v60  ;;  %v8580_v14 = vand.u32 4294901760, %v4924_v11 }
 0x77f   :  { %4499 = vmatpush.msrb.mxu2 %v4099_v41 }
 0x780   :  { %4600 = vmatpush.msrb.mxu3 %v8285_v48  ;;  %v9078_v48 = vand.u32 4294901760, %v8422_v61  ;;  %v3950_v18 = vand.u32 4294901760, %v3949_v8  ;;  %v4925_v61 = vld [vmem:[%s8718_s3 + $0x1d0] sm:$0xff] }
 0x781   :  { %4503 = vmatpush.msrb.mxu2 %v4105_v9  ;;  %4142 = vmatmul.f32.gmra.mxu3 %v8471_v0  ;;  %v8587_v45 = vand.u32 4294901760, %v4925_v61 }
 0x782   :  { %3937 = vmatmul.f32.gmra.mxu2 %v3936_v6  ;;  %4602 = vmatpush.msrb.mxu3 %v8305_v24  ;;  %v3944_v24 = vand.u32 4294901760, %v3943_v39  ;;  %v4930_v39 = vld [vmem:[%s8718_s3 + $0x1f8] sm:$0xff] }
 0x783   :  { %4507 = vmatpush.msrb.mxu2 %v9077_v31  ;;  %v3989_v12 = vsub.f32 %v4925_v61, %v8587_v45  ;;  %v8622_v33 = vand.u32 4294901760, %v4930_v39 }
 0x784   :  { %4604 = vmatpush.msrb.mxu3 %v8323_v58  ;;  %4263 = vmatmul.f32.gmra.mxu0 %v3933_v3  ;;  %v3951_v58 = vsub.f32 %v3949_v8, %v3950_v18  ;;  %v8608_v3 = vand.u32 4294901760, %v4928_v53 }
 0x785   :  { %4511 = vmatpush.msrb.mxu2 %v9078_v48  ;;  %4380 = vmatmul.f32.gmra.mxu1 %v3934_v23  ;;  %v4929_v23 = vld [vmem:[%s8718_s3 + $0x1f0] sm:$0xff] }
 0x786   :  { %4606 = vmatpush.msrb.mxu3 %v8340_v43  ;;  %v3952_v43 = vand.u32 4294901760, %v3951_v58  ;;  %v4013_v17 = vsub.f32 %v4928_v53, %v8608_v3  ;;  %v8615_v36 = vand.u32 4294901760, %v4929_v23 }
 0x787   :  { %4515 = vmatpush.msrb.mxu2 %v4123_v57  ;;  %v3990_v57 = vand.u32 4294901760, %v3989_v12 }
 0x788   :  { %4608 = vmatpush.msrb.mxu3 %v8359_v47  ;;  %v3959_v47 = vsub.f32 %v3957_v22, %v3958_v38 }
 0x789   :  { %4519 = vmatpush.msrb.mxu2 %v4129_v1  ;;  %4146 = vmatmul.f32.gmra.mxu3 %v8494_v59  ;;  %v8594_v1 = vand.u32 4294901760, %v4926_v2  ;;  %v3991_v56 = vsub.f32 %v3989_v12, %v3990_v57 }
 0x78a   :  { %3945 = vmatmul.f32.gmra.mxu2 %v3944_v24  ;;  %4610 = vmatpush.msrb.mxu3 %v8374_v32  ;;  %v3960_v32 = vand.u32 4294901760, %v3959_v47  ;;  %v4029_v24 = vsub.f32 %v4930_v39, %v8622_v33 }
 0x78b   :  { %v3997_v5 = vsub.f32 %v4926_v2, %v8594_v1  ;;  %v3992_v4 = vand.u32 4294901760, %v3991_v56  ;;  %v3809_v2 = vpop.permute.xlu2 %3808 }
 0x78c   :  { %4612 = vmatpush.msrb.mxu3 %v8387_v44  ;;  %4268 = vmatmul.f32.gmra.mxu0 %v3941_v55  ;;  %v3967_v44 = vsub.f32 %v3965_v19, %v3966_v52  ;;  %v4014_v55 = vand.u32 4294901760, %v4013_v17  ;;  %v4030_v58 = vand.u32 4294901760, %v4029_v24 }
 0x78d   :  { %4386 = vmatmul.f32.gmra.mxu1 %v3942_v28  ;;  %v3998_v34 = vand.u32 4294901760, %v3997_v5  ;;  %v4021_v28 = vsub.f32 %v4929_v23, %v8615_v36 }
 0x78e   :  { %4614 = vmatpush.msrb.mxu3 %v8402_v37  ;;  %v3968_v20 = vand.u32 4294901760, %v3967_v44  ;;  %v3974_v37 = vand.u32 4294901760, %v3973_v46  ;;  %v4015_v6 = vsub.f32 %v4013_v17, %v4014_v55 }
 0x78f   :  { %v3999_v49 = vsub.f32 %v3997_v5, %v3998_v34  ;;  %v4022_v31 = vand.u32 4294901760, %v4021_v28 }
 0x790   :  { %4616 = vmatpush.msrb.mxu3 %v8417_v13  ;;  %v3975_v41 = vsub.f32 %v3973_v46, %v3974_v37  ;;  %v3981_v13 = vsub.f32 %v4924_v11, %v8580_v14 }
 0x791   :  { %4150 = vmatmul.f32.gmra.mxu3 %v8512_v21  ;;  %v4000_v63 = vand.u32 4294901760, %v3999_v49  ;;  %v4023_v48 = vsub.f32 %v4021_v28, %v4022_v31 }
 0x792   :  { %3953 = vmatmul.f32.gmra.mxu2 %v3952_v43  ;;  %v3976_v9 = vand.u32 4294901760, %v3975_v41  ;;  %v3982_v29 = vand.u32 4294901760, %v3981_v13  ;;  %v3804_v41 = vpop.permute.xlu1 %3803 }
 0x794   :  { %4273 = vmatmul.f32.gmra.mxu0 %v3949_v8  ;;  %v3983_v54 = vsub.f32 %v3981_v13, %v3982_v29  ;;  %v4016_v8 = vand.u32 4294901760, %v4015_v6 }
 0x795   :  { %4392 = vmatmul.f32.gmra.mxu1 %v3950_v18  ;;  %v4024_v18 = vand.u32 4294901760, %v4023_v48  ;;  %v3824_v48 = vpop.permute.xlu2 %3823 }
 0x796   :  { %v3984_v25 = vand.u32 4294901760, %v3983_v54 }
 0x799   :  { %4154 = vmatmul.f32.gmra.mxu3 %v8531_v60 }
 0x79a   :  { %3961 = vmatmul.f32.gmra.mxu2 %v3960_v32  ;;  %v3819_v23 = vpop.permute.xlu1 %3818 }
 0x79c   :  { %4278 = vmatmul.f32.gmra.mxu0 %v3957_v22  ;;  %v4031_v22 = vsub.f32 %v4029_v24, %v4030_v58 }
 0x79d   :  { %4398 = vmatmul.f32.gmra.mxu1 %v3958_v38 }
 0x79e   :  { %v4032_v30 = vand.u32 4294901760, %v4031_v22 }
 0x7a1   :  { %4158 = vmatmul.f32.gmra.mxu3 %v8550_v35 }
 0x7a2   :  { %3969 = vmatmul.f32.gmra.mxu2 %v3968_v20 }
 0x7a4   :  { %4283 = vmatmul.f32.gmra.mxu0 %v3965_v19  ;;  %v3799_v19 = vpop.permute.xlu0 %3798 }
 0x7a5   :  { %4404 = vmatmul.f32.gmra.mxu1 %v3966_v52 }
 0x7a9   :  { %4162 = vmatmul.f32.gmra.mxu3 %v8565_v27 }
 0x7aa   :  { %3977 = vmatmul.f32.gmra.mxu2 %v3976_v9 }
 0x7ac   :  { %4288 = vmatmul.f32.gmra.mxu0 %v3973_v46 }
 0x7ad   :  { %4410 = vmatmul.f32.gmra.mxu1 %v3974_v37 }
 0x7b1   :  { %4166 = vmatmul.f32.gmra.mxu3 %v8573_v62 }
 0x7b2   :  { %3985 = vmatmul.f32.gmra.mxu2 %v3984_v25 }
 0x7b4   :  { %4293 = vmatmul.f32.gmra.mxu0 %v3981_v13 }
 0x7b5   :  { %4416 = vmatmul.f32.gmra.mxu1 %v3982_v29 }
 0x7b9   :  { %4170 = vmatmul.f32.gmra.mxu3 %v8580_v14 }
 0x7ba   :  { %3993 = vmatmul.f32.gmra.mxu2 %v3992_v4 }
 0x7bc   :  { %4298 = vmatmul.f32.gmra.mxu0 %v3989_v12 }
 0x7bd   :  { %4422 = vmatmul.f32.gmra.mxu1 %v3990_v57 }
 0x7c1   :  { %4174 = vmatmul.f32.gmra.mxu3 %v8587_v45 }
 0x7c2   :  { %4001 = vmatmul.f32.gmra.mxu2 %v4000_v63 }
 0x7c4   :  { %4303 = vmatmul.f32.gmra.mxu0 %v3997_v5 }
 0x7c5   :  { %4428 = vmatmul.f32.gmra.mxu1 %v3998_v34  ;;  %v3814_v34 = vpop.permute.xlu0 %3813 }
 0x7c9   :  { %4178 = vmatmul.f32.gmra.mxu3 %v8594_v1 }
 0x7ca   :  { %4009 = vmatmul.f32.gmra.mxu2 %v4008_v10 }
 0x7cc   :  { %4308 = vmatmul.f32.gmra.mxu0 %v4005_v7 }
 0x7cd   :  { %4434 = vmatmul.f32.gmra.mxu1 %v4006_v26  ;;  %v3829_v22 = vpop.permute.xlu0 %3828 }
 0x7d1   :  { %4182 = vmatmul.f32.gmra.mxu3 %v8601_v42 }
 0x7d2   :  { %4017 = vmatmul.f32.gmra.mxu2 %v4016_v8 }
 0x7d4   :  { %4313 = vmatmul.f32.gmra.mxu0 %v4013_v17 }
 0x7d5   :  { %4440 = vmatmul.f32.gmra.mxu1 %v4014_v55 }
 0x7d9   :  { %4186 = vmatmul.f32.gmra.mxu3 %v8608_v3 }
 0x7da   :  { %4025 = vmatmul.f32.gmra.mxu2 %v4024_v18 }
 0x7dc   :  { %4318 = vmatmul.f32.gmra.mxu0 %v4021_v28 }
 0x7dd   :  { %4446 = vmatmul.f32.gmra.mxu1 %v4022_v31 }
 0x7e1   :  { %4190 = vmatmul.f32.gmra.mxu3 %v8615_v36 }
 0x7e2   :  { %4033 = vmatmul.f32.gmra.mxu2 %v4032_v30 }
 0x7e4   :  { %4323 = vmatmul.f32.gmra.mxu0 %v4029_v24 }
 0x7e5   :  { %4452 = vmatmul.f32.gmra.mxu1 %v4030_v58 }
 0x7e9   :  { %4194 = vmatmul.f32.gmra.mxu3 %v8622_v33  ;;  %v4249_v43 = vpop.f32.mrf.mxu0 }
 0x7ea   :  { %4521 = vmatmul.f32.vlgmr.msrb.gmra.mxu2 %v8371_v50  ;;  %v4363_v47 = vpop.f32.mrf.mxu1 }
 0x7ed   :  { %v3914_v38 = vpop.f32.mrf.mxu2 }
 0x7ee   :  { %v3915_v16 = vadd.f32 %v3914_v38, %v3799_v19 }
 0x7f1   :  { %4618 = vmatmul.f32.vlgmr.msrb.gmra.mxu3 %v8371_v50  ;;  %v4254_v46 = vpop.f32.mrf.mxu0 }
 0x7f2   :  { %4525 = vmatmul.f32.gmra.mxu2 %v8430_v51  ;;  %v4369_v20 = vpop.f32.mrf.mxu1 }
 0x7f4   :  { %v4135_v32 = vpop.f32.mrf.mxu3 }
 0x7f5   :  { %v3922_v52 = vpop.f32.mrf.mxu2  ;;  %v4136_v44 = vadd.f32 %v4135_v32, %v3915_v16 }
 0x7f6   :  { %v3923_v13 = vadd.f32 %v3922_v52, %v3804_v41 }
 0x7f7   :  { %v4250_v11 = vadd.f32 %v4249_v43, %v4136_v44 }
 0x7f9   :  { %v8632_v37 = vadd.f32 %v4363_v47, %v4250_v11  ;;  %4622 = vmatmul.f32.gmra.mxu3 %v8430_v51  ;;  %v4259_v54 = vpop.f32.mrf.mxu0 }
 0x7fa   :  { %4529 = vmatmul.f32.gmra.mxu2 %v8471_v0  ;;  %v4375_v25 = vpop.f32.mrf.mxu1 }
 0x7fc   :  { %v4139_v61 = vpop.f32.mrf.mxu3 }
 0x7fd   :  { %v3930_v50 = vpop.f32.mrf.mxu2  ;;  %v4140_v9 = vadd.f32 %v4139_v61, %v3923_v13 }
 0x7fe   :  { %v3931_v57 = vadd.f32 %v3930_v50, %v3809_v2 }
 0x7ff   :  { %v4255_v29 = vadd.f32 %v4254_v46, %v4140_v9 }
 0x801   :  { %v8636_v12 = vadd.f32 %v4369_v20, %v4255_v29  ;;  %4626 = vmatmul.f32.gmra.mxu3 %v8471_v0  ;;  %v4264_v49 = vpop.f32.mrf.mxu0 }
 0x802   :  { %4533 = vmatmul.f32.gmra.mxu2 %v8494_v59  ;;  %v4381_v0 = vpop.f32.mrf.mxu1 }
 0x804   :  { %v4143_v56 = vpop.f32.mrf.mxu3 }
 0x805   :  { %v3938_v51 = vpop.f32.mrf.mxu2  ;;  %v4144_v5 = vadd.f32 %v4143_v56, %v3931_v57 }
 0x806   :  { %v3939_v7 = vadd.f32 %v3938_v51, %v3814_v34 }
 0x807   :  { %v4260_v40 = vadd.f32 %v4259_v54, %v4144_v5 }
 0x809   :  { %v8640_v4 = vadd.f32 %v4375_v25, %v4260_v40  ;;  %4630 = vmatmul.f32.gmra.mxu3 %v8494_v59  ;;  %v4269_v59 = vpop.f32.mrf.mxu0 }
 0x80a   :  { %4537 = vmatmul.f32.gmra.mxu2 %v8512_v21  ;;  %v4387_v39 = vpop.f32.mrf.mxu1 }
 0x80c   :  { %v4147_v53 = vpop.f32.mrf.mxu3 }
 0x80d   :  { %v3946_v63 = vpop.f32.mrf.mxu2  ;;  %v4148_v26 = vadd.f32 %v4147_v53, %v3939_v7 }
 0x80e   :  { %v3947_v10 = vadd.f32 %v3946_v63, %v3819_v23 }
 0x80f   :  { %v4265_v15 = vadd.f32 %v4264_v49, %v4148_v26 }
 0x811   :  { %v8644_v17 = vadd.f32 %v4381_v0, %v4265_v15  ;;  %4634 = vmatmul.f32.gmra.mxu3 %v8512_v21 }
 0x812   :  { %4541 = vmatmul.f32.gmra.mxu2 %v8531_v60 }
 0x814   :  { %v4151_v55 = vpop.f32.mrf.mxu3 }
 0x815   :  { %v3954_v6 = vpop.f32.mrf.mxu2  ;;  %v4152_v28 = vadd.f32 %v4151_v55, %v3947_v10 }
 0x816   :  { %v3955_v24 = vadd.f32 %v3954_v6, %v3824_v48 }
 0x817   :  { %v4270_v8 = vadd.f32 %v4269_v59, %v4152_v28 }
 0x819   :  { %v8648_v31 = vadd.f32 %v4387_v39, %v4270_v8  ;;  %4638 = vmatmul.f32.gmra.mxu3 %v8531_v60  ;;  %v3834_v60 = vpop.permute.xlu1 %3833 }
 0x81a   :  { %4545 = vmatmul.f32.gmra.mxu2 %v8550_v35 }
 0x81c   :  { %v4155_v18 = vpop.f32.mrf.mxu3 }
 0x81d   :  { %v3962_v21 = vpop.f32.mrf.mxu2  ;;  %v8652_v58 = vadd.f32 %v4155_v18, %v3955_v24 }
 0x81e   :  { %v3963_v30 = vadd.f32 %v3962_v21, %v3829_v22 }
 0x821   :  { %4642 = vmatmul.f32.gmra.mxu3 %v8550_v35  ;;  %v3839_v35 = vpop.permute.xlu2 %3838 }
 0x822   :  { %4549 = vmatmul.f32.gmra.mxu2 %v8565_v27 }
 0x824   :  { %v4159_v43 = vpop.f32.mrf.mxu3 }
 0x825   :  { %v3970_v38 = vpop.f32.mrf.mxu2  ;;  %v8656_v47 = vadd.f32 %v4159_v43, %v3963_v30  ;;  %v4274_v43 = vpop.f32.mrf.mxu0 }
 0x826   :  { %v3971_v19 = vadd.f32 %v3970_v38, %v3834_v60 }
 0x829   :  { %4646 = vmatmul.f32.gmra.mxu3 %v8565_v27  ;;  %v3844_v27 = vpop.permute.xlu0 %3843 }
 0x82a   :  { %4553 = vmatmul.f32.gmra.mxu2 %v8573_v62 }
 0x82c   :  { %v4163_v16 = vpop.f32.mrf.mxu3 }
 0x82d   :  { %v3978_v32 = vpop.f32.mrf.mxu2  ;;  %v8660_v52 = vadd.f32 %v4163_v16, %v3971_v19 }
 0x82e   :  { %v3979_v44 = vadd.f32 %v3978_v32, %v3839_v35  ;;  %v4393_v35 = vpop.f32.mrf.mxu1 }
 0x831   :  { %4650 = vmatmul.f32.gmra.mxu3 %v8573_v62  ;;  %v3849_v62 = vpop.permute.xlu1 %3848 }
 0x832   :  { %4557 = vmatmul.f32.gmra.mxu2 %v8580_v14 }
 0x834   :  { %v4167_v46 = vpop.f32.mrf.mxu3 }
 0x835   :  { %v3986_v11 = vpop.f32.mrf.mxu2  ;;  %v8664_v20 = vadd.f32 %v4167_v46, %v3979_v44 }
 0x836   :  { %v3987_v41 = vadd.f32 %v3986_v11, %v3844_v27 }
 0x839   :  { %4654 = vmatmul.f32.gmra.mxu3 %v8580_v14  ;;  %v3854_v14 = vpop.permute.xlu2 %3853 }
 0x83a   :  { %4561 = vmatmul.f32.gmra.mxu2 %v8587_v45 }
 0x83c   :  { %v4171_v13 = vpop.f32.mrf.mxu3 }
 0x83d   :  { %v3994_v61 = vpop.f32.mrf.mxu2  ;;  %v8668_v50 = vadd.f32 %v4171_v13, %v3987_v41  ;;  %v4279_v13 = vpop.f32.mrf.mxu0 }
 0x83e   :  { %v3995_v9 = vadd.f32 %v3994_v61, %v3849_v62 }
 0x841   :  { %4658 = vmatmul.f32.gmra.mxu3 %v8587_v45  ;;  %v3859_v45 = vpop.permute.xlu0 %3858 }
 0x842   :  { %4565 = vmatmul.f32.gmra.mxu2 %v8594_v1 }
 0x844   :  { %v4175_v29 = vpop.f32.mrf.mxu3 }
 0x845   :  { %v4002_v54 = vpop.f32.mrf.mxu2  ;;  %v8672_v2 = vadd.f32 %v4175_v29, %v3995_v9  ;;  %v4399_v9 = vpop.f32.mrf.mxu1 }
 0x846   :  { %v4003_v25 = vadd.f32 %v4002_v54, %v3854_v14 }
 0x849   :  { %4662 = vmatmul.f32.gmra.mxu3 %v8594_v1  ;;  %v3864_v1 = vpop.permute.xlu1 %3863 }
 0x84a   :  { %4569 = vmatmul.f32.gmra.mxu2 %v8601_v42 }
 0x84c   :  { %v4179_v57 = vpop.f32.mrf.mxu3 }
 0x84d   :  { %v4010_v56 = vpop.f32.mrf.mxu2  ;;  %v8676_v51 = vadd.f32 %v4179_v57, %v4003_v25 }
 0x84e   :  { %v4011_v5 = vadd.f32 %v4010_v56, %v3859_v45  ;;  %v4284_v45 = vpop.f32.mrf.mxu0 }
 0x851   :  { %4666 = vmatmul.f32.gmra.mxu3 %v8601_v42  ;;  %v3869_v42 = vpop.permute.xlu2 %3868  ;;  %v4717_v19 = vpop.permute.xlu1 %4716 }
 0x852   :  { %4573 = vmatmul.f32.gmra.mxu2 %v8608_v3 }
 0x854   :  { %v4183_v40 = vpop.f32.mrf.mxu3 }
 0x855   :  { %v4018_v34 = vpop.f32.mrf.mxu2  ;;  %v8680_v49 = vadd.f32 %v4183_v40, %v4011_v5 }
 0x856   :  { %v4019_v7 = vadd.f32 %v4018_v34, %v3864_v1  ;;  %v4275_v34 = vadd.f32 %v4274_v43, %v8652_v58 }
 0x859   :  { %4670 = vmatmul.f32.gmra.mxu3 %v8608_v3  ;;  %v3874_v3 = vpop.permute.xlu0 %3873  ;;  %v4722_v60 = vpop.permute.xlu2 %4721 }
 0x85a   :  { %4577 = vmatmul.f32.gmra.mxu2 %v8615_v36  ;;  %v4732_v57 = vpop.permute.xlu1 %4731 }
 0x85c   :  { %v4187_v53 = vpop.f32.mrf.mxu3 }
 0x85d   :  { %v4026_v0 = vpop.f32.mrf.mxu2  ;;  %v8684_v63 = vadd.f32 %v4187_v53, %v4019_v7  ;;  %v4405_v7 = vpop.f32.mrf.mxu1 }
 0x85e   :  { %v4027_v26 = vadd.f32 %v4026_v0, %v3869_v42  ;;  %v4394_v42 = vadd.f32 %v4393_v35, %v4275_v34 }
 0x861   :  { %4674 = vmatmul.f32.gmra.mxu3 %v8615_v36  ;;  %v4727_v41 = vpop.permute.xlu0 %4726  ;;  %v4737_v0 = vpop.permute.xlu2 %4736 }
 0x862   :  { %4581 = vmatmul.f32.gmra.mxu2 %v8622_v33 }
 0x864   :  { %v4191_v15 = vpop.f32.mrf.mxu3 }
 0x865   :  { %v4034_v23 = vpop.f32.mrf.mxu2  ;;  %v8688_v10 = vadd.f32 %v4191_v15, %v4027_v26 }
 0x866   :  { %v4035_v55 = vadd.f32 %v4034_v23, %v3874_v3  ;;  %v4289_v3 = vpop.f32.mrf.mxu0 }
 0x869   :  { %4678 = vmatmul.f32.gmra.mxu3 %v8622_v33 }
 0x86c   :  { %v4195_v59 = vpop.f32.mrf.mxu3 }
 0x86d   :  { %v8691_v6 = vadd.f32 %v4195_v59, %v4035_v55  ;;  %v4522_v28 = vpop.f32.mrf.mxu2 }
 0x86e   :  { %v4523_v39 = vadd.f32 %v4522_v28, %v8632_v37 }
 0x874   :  { %v4619_v8 = vpop.f32.mrf.mxu3 }
 0x875   :  { %v4526_v36 = vpop.f32.mrf.mxu2  ;;  %v4620_v48 = vadd.f32 %v4619_v8, %v4523_v39  ;;  %v4742_v8 = vpop.permute.xlu0 %4741 }
 0x876   :  { %v4527_v24 = vadd.f32 %v4526_v36, %v8636_v12  ;;  %v4411_v36 = vpop.f32.mrf.mxu1 }
 0x877   :  { %v4682_v21 = vmax.f32 %v4620_v48, 0.0 }
 0x879   :  { %v4794_v16 = vmul.f32 %v4717_v19, %v4682_v21 }
 0x87c   :  { %v4623_v18 = vpop.f32.mrf.mxu3 }
 0x87d   :  { %v4530_v22 = vpop.f32.mrf.mxu2  ;;  %v4624_v30 = vadd.f32 %v4623_v18, %v4527_v24 }
 0x87e   :  { %v4531_v33 = vadd.f32 %v4530_v22, %v8640_v4  ;;  %v4285_v22 = vadd.f32 %v4284_v45, %v8660_v52 }
 0x87f   :  { %v4683_v38 = vmax.f32 %v4624_v30, 0.0 }
 0x880   :  { %v4406_v19 = vadd.f32 %v4405_v7, %v4285_v22 }
 0x881   :  { %v4795_v32 = vmul.f32 %v4722_v60, %v4683_v38  ;;  %v4747_v60 = vpop.permute.xlu1 %4746 }
 0x883   :  { %v4810_v44 = vadd.f32 %v4795_v32, %v4794_v16 }
 0x884   :  { %v4627_v37 = vpop.f32.mrf.mxu3 }
 0x885   :  { %v4534_v46 = vpop.f32.mrf.mxu2  ;;  %v4628_v11 = vadd.f32 %v4627_v37, %v4531_v33  ;;  %v4294_v33 = vpop.f32.mrf.mxu0  ;;  %v4290_v37 = vadd.f32 %v4289_v3, %v8664_v20 }
 0x886   :  { %v4535_v27 = vadd.f32 %v4534_v46, %v8644_v17 }
 0x887   :  { %v4684_v12 = vmax.f32 %v4628_v11, 0.0 }
 0x889   :  { %v4796_v61 = vmul.f32 %v4727_v41, %v4684_v12  ;;  %v4752_v12 = vpop.permute.xlu2 %4751 }
 0x88b   :  { %v4811_v62 = vadd.f32 %v4810_v44, %v4796_v61 }
 0x88c   :  { %v4631_v29 = vpop.f32.mrf.mxu3 }
 0x88d   :  { %v4538_v4 = vpop.f32.mrf.mxu2  ;;  %v4632_v54 = vadd.f32 %v4631_v29, %v4535_v27  ;;  %v4299_v41 = vpop.f32.mrf.mxu0 }
 0x88e   :  { %v4539_v14 = vadd.f32 %v4538_v4, %v8648_v31  ;;  %v4280_v31 = vadd.f32 %v4279_v13, %v8656_v47  ;;  %v4417_v47 = vpop.f32.mrf.mxu1  ;;  %v4412_v13 = vadd.f32 %v4411_v36, %v4290_v37  ;;  %v4295_v4 = vadd.f32 %v4294_v33, %v8668_v50 }
 0x88f   :  { %v4685_v25 = vmax.f32 %v4632_v54, 0.0 }
 0x890   :  { %v4400_v48 = vadd.f32 %v4399_v9, %v4280_v31 }
 0x891   :  { %v4797_v56 = vmul.f32 %v4732_v57, %v4685_v25  ;;  %v4757_v57 = vpop.permute.xlu0 %4756 }
 0x893   :  { %v4812_v5 = vadd.f32 %v4811_v62, %v4797_v56  ;;  %v4418_v56 = vadd.f32 %v4417_v47, %v4295_v4 }
 0x894   :  { %v4635_v40 = vpop.f32.mrf.mxu3 }
 0x895   :  { %v4542_v17 = vpop.f32.mrf.mxu2  ;;  %v4636_v1 = vadd.f32 %v4635_v40, %v4539_v14  ;;  %v4304_v20 = vpop.f32.mrf.mxu0 }
 0x896   :  { %v4543_v15 = vadd.f32 %v4542_v17, %v4394_v42  ;;  %v4423_v9 = vpop.f32.mrf.mxu1  ;;  %v4300_v17 = vadd.f32 %v4299_v41, %v8672_v2  ;;  %v4762_v42 = vpop.permute.xlu1 %4761  ;;  %v4305_v31 = vadd.f32 %v4304_v20, %v8676_v51 }
 0x897   :  { %v4686_v53 = vmax.f32 %v4636_v1, 0.0 }
 0x899   :  { %v4798_v26 = vmul.f32 %v4737_v0, %v4686_v53 }
 0x89b   :  { %v4813_v23 = vadd.f32 %v4812_v5, %v4798_v26  ;;  %v4424_v26 = vadd.f32 %v4423_v9, %v4300_v17 }
 0x89c   :  { %v4639_v55 = vpop.f32.mrf.mxu3 }
 0x89d   :  { %v4546_v59 = vpop.f32.mrf.mxu2  ;;  %v4640_v28 = vadd.f32 %v4639_v55, %v4543_v15  ;;  %v4309_v3 = vpop.f32.mrf.mxu0 }
 0x89e   :  { %v4547_v24 = vadd.f32 %v4546_v59, %v4400_v48  ;;  %v4429_v53 = vpop.f32.mrf.mxu1 }
 0x89f   :  { %v4687_v39 = vmax.f32 %v4640_v28, 0.0  ;;  %v4430_v48 = vadd.f32 %v4429_v53, %v4305_v31 }
 0x8a1   :  { %v4799_v58 = vmul.f32 %v4742_v8, %v4687_v39  ;;  %v4767_v8 = vpop.permute.xlu2 %4766 }
 0x8a3   :  { %v4814_v18 = vadd.f32 %v4813_v23, %v4799_v58 }
 0x8a4   :  { %v4643_v21 = vpop.f32.mrf.mxu3 }
 0x8a5   :  { %v4550_v30 = vpop.f32.mrf.mxu2  ;;  %v4644_v43 = vadd.f32 %v4643_v21, %v4547_v24  ;;  %v4310_v21 = vadd.f32 %v4309_v3, %v8680_v49 }
 0x8a6   :  { %v4551_v32 = vadd.f32 %v4550_v30, %v4406_v19  ;;  %v4435_v36 = vpop.f32.mrf.mxu1 }
 0x8a7   :  { %v4688_v38 = vmax.f32 %v4644_v43, 0.0  ;;  %v4314_v43 = vpop.f32.mrf.mxu0 }
 0x8a9   :  { %v4800_v16 = vmul.f32 %v4747_v60, %v4688_v38  ;;  %v4772_v38 = vpop.permute.xlu0 %4771  ;;  %v4436_v60 = vadd.f32 %v4435_v36, %v4310_v21 }
 0x8ab   :  { %v4815_v35 = vadd.f32 %v4814_v18, %v4800_v16 }
 0x8ac   :  { %v4647_v44 = vpop.f32.mrf.mxu3 }
 0x8ad   :  { %v4554_v46 = vpop.f32.mrf.mxu2  ;;  %v4648_v11 = vadd.f32 %v4647_v44, %v4551_v32 }
 0x8ae   :  { %v4555_v61 = vadd.f32 %v4554_v46, %v4412_v13  ;;  %v4441_v51 = vpop.f32.mrf.mxu1 }
 0x8af   :  { %v4689_v27 = vmax.f32 %v4648_v11, 0.0  ;;  %v4777_v11 = vpop.permute.xlu1 %4776 }
 0x8b1   :  { %v4801_v52 = vmul.f32 %v4752_v12, %v4689_v27  ;;  %v4319_v27 = vpop.f32.mrf.mxu0  ;;  %v4787_v17 = vpop.permute.xlu0 %4786 }
 0x8b3   :  { %v4816_v62 = vadd.f32 %v4815_v35, %v4801_v52  ;;  %v4315_v35 = vadd.f32 %v4314_v43, %v8684_v63 }
 0x8b4   :  { %v4651_v29 = vpop.f32.mrf.mxu3 }
 0x8b5   :  { %v4558_v54 = vpop.f32.mrf.mxu2  ;;  %v4652_v14 = vadd.f32 %v4651_v29, %v4555_v61  ;;  %v4442_v12 = vadd.f32 %v4441_v51, %v4315_v35 }
 0x8b6   :  { %v4559_v5 = vadd.f32 %v4558_v54, %v4418_v56  ;;  %v4447_v52 = vpop.f32.mrf.mxu1  ;;  %v4782_v54 = vpop.permute.xlu2 %4781 }
 0x8b7   :  { %v4690_v25 = vmax.f32 %v4652_v14, 0.0 }
 0x8b9   :  { %v4802_v45 = vmul.f32 %v4757_v57, %v4690_v25  ;;  %v4324_v63 = vpop.f32.mrf.mxu0 }
 0x8ba   :  { %v4325_v20 = vadd.f32 %v4324_v63, %v8691_v6 }
 0x8bb   :  { %v4817_v40 = vadd.f32 %v4816_v62, %v4802_v45  ;;  %v4320_v62 = vadd.f32 %v4319_v27, %v8688_v10 }
 0x8bc   :  { %v4655_v34 = vpop.f32.mrf.mxu3 }
 0x8bd   :  { %v4562_v1 = vpop.f32.mrf.mxu2  ;;  %v4656_v7 = vadd.f32 %v4655_v34, %v4559_v5  ;;  %v4448_v14 = vadd.f32 %v4447_v52, %v4320_v62 }
 0x8be   :  { %v4563_v50 = vadd.f32 %v4562_v1, %v4424_v26 }
 0x8bf   :  { %v4691_v0 = vmax.f32 %v4656_v7, 0.0 }
 0x8c1   :  { %v4803_v15 = vmul.f32 %v4762_v42, %v4691_v0 }
 0x8c3   :  { %v4818_v23 = vadd.f32 %v4817_v40, %v4803_v15  ;;  %v4453_v40 = vpop.f32.mrf.mxu1 }
 0x8c4   :  { %v4659_v55 = vpop.f32.mrf.mxu3  ;;  %v4454_v7 = vadd.f32 %v4453_v40, %v4325_v20 }
 0x8c5   :  { %v4566_v59 = vpop.f32.mrf.mxu2  ;;  %v4660_v28 = vadd.f32 %v4659_v55, %v4563_v50  ;;  %v4792_v50 = vpop.permute.xlu1 %4791 }
 0x8c6   :  { %v4567_v58 = vadd.f32 %v4566_v59, %v4430_v48 }
 0x8c7   :  { %v4692_v39 = vmax.f32 %v4660_v28, 0.0 }
 0x8c9   :  { %v4804_v2 = vmul.f32 %v4767_v8, %v4692_v39  ;;  %v4832_v39 = vstv %s8721_s6 }
 0x8cb   :  { %v4819_v24 = vadd.f32 %v4818_v23, %v4804_v2 }
 0x8cc   :  { %v4663_v18 = vpop.f32.mrf.mxu3 }
 0x8cd   :  { %v4570_v22 = vpop.f32.mrf.mxu2  ;;  %v4664_v30 = vadd.f32 %v4663_v18, %v4567_v58 }
 0x8ce   :  { %v4571_v16 = vadd.f32 %v4570_v22, %v4436_v60 }
 0x8cf   :  { %v4693_v33 = vmax.f32 %v4664_v30, 0.0 }
 0x8d1   :  { %v4805_v19 = vmul.f32 %v4772_v38, %v4693_v33 }
 0x8d3   :  { %v4820_v47 = vadd.f32 %v4819_v24, %v4805_v19 }
 0x8d4   :  { %v4667_v32 = vpop.f32.mrf.mxu3 }
 0x8d5   :  { %v4574_v44 = vpop.f32.mrf.mxu2  ;;  %v4668_v37 = vadd.f32 %v4667_v32, %v4571_v16 }
 0x8d6   :  { %v4575_v41 = vadd.f32 %v4574_v44, %v4442_v12 }
 0x8d7   :  { %v4694_v46 = vmax.f32 %v4668_v37, 0.0 }
 0x8d9   :  { %v4806_v49 = vmul.f32 %v4777_v11, %v4694_v46 }
 0x8db   :  { %v4821_v13 = vadd.f32 %v4820_v47, %v4806_v49 }
 0x8dc   :  { %v4671_v61 = vpop.f32.mrf.mxu3 }
 0x8dd   :  { %v4672_v9 = vadd.f32 %v4671_v61, %v4575_v41  ;;  %v4578_v29 = vpop.f32.mrf.mxu2 }
 0x8de   :  { %v4579_v57 = vadd.f32 %v4578_v29, %v4448_v14 }
 0x8df   :  { %v4695_v4 = vmax.f32 %v4672_v9, 0.0 }
 0x8e1   :  { %v4807_v25 = vmul.f32 %v4782_v54, %v4695_v4 }
 0x8e3   :  { %v4822_v56 = vadd.f32 %v4821_v13, %v4807_v25 }
 0x8e4   :  { %v4675_v45 = vpop.f32.mrf.mxu3 }
 0x8e5   :  { %v4676_v5 = vadd.f32 %v4675_v45, %v4579_v57  ;;  %v4582_v1 = vpop.f32.mrf.mxu2 }
 0x8e6   :  { %v4583_v10 = vadd.f32 %v4582_v1, %v4454_v7 }
 0x8e7   :  { %v4696_v34 = vmax.f32 %v4676_v5, 0.0 }
 0x8e9   :  { %v4808_v53 = vmul.f32 %v4787_v17, %v4696_v34 }
 0x8eb   :  { %v4823_v0 = vadd.f32 %v4822_v56, %v4808_v53 }
 0x8ec   :  { %v4679_v42 = vpop.f32.mrf.mxu3 }
 0x8ed   :  { %v4680_v26 = vadd.f32 %v4679_v42, %v4583_v10 }
 0x8ef   :  { %v4697_v15 = vmax.f32 %v4680_v26, 0.0 }
 0x8f1   :  { %v4809_v23 = vmul.f32 %v4792_v50, %v4697_v15 }
 0x8f3   :  { %v4824_v3 = vadd.f32 %v4823_v0, %v4809_v23 }
 0x8f5   :  { %v4825_v55 = vrot.slane %v4824_v3, 4 }
 0x8f7   :  { %v4826_v31 = vadd.f32 %v4825_v55, %v4824_v3 }
 0x8f9   :  { %v4827_v59 = vrot.slane %v4826_v31, 2 }
 0x8fb   :  { %v4828_v28 = vadd.f32 %v4827_v59, %v4826_v31 }
 0x8fd   :  { %v4829_v6 = vrot.slane %v4828_v28, 1 }
 0x8ff   :  { %v4830_v8 = vadd.f32 %v4829_v6, %v4828_v28 }
 0x901   :  { %v4833_v36 = vadd.f32 %v4832_v39, %v4830_v8 }
 0x903   :  { %4834 = vst [vmem:[#allocation3] sm:$0x1] %v4833_v36 }
 0x904   :  { %4845 = dma.vmem_to_hbm [thread:$0]  %s4841_s10, 16, %s4843_s13, [#allocation4]  }
 0x905   :  { %5119 = dma.done.wait [#allocation4], 16  }
 0x906   :  { %5120 = vsyncadd [#allocation4], 4294967280 }
 0x907   :  { %4850 = vsyncpa [#allocation4], 1 }

</bundles_post_ra>
